<compile_context>
chip_gen: v7x
topology: tpu7x:2x2x1
jax: 0.10.0
libtpu: 0.0.40
codegen_flags: <defaults>
</compile_context>

<pallas_src>
import numpy as np

import jax
import jax.numpy as jnp
from jax import lax
from jax.experimental import pallas as pl
from jax.experimental.pallas import tpu as pltpu


IN_CHANNELS = 16
OUT_CHANNELS = 6
MID_CHANNELS = (IN_CHANNELS + OUT_CHANNELS) // 2   # 11
BN_EPS = 1e-5

# Static layer specification of the PyTorch OutputUpsampler module.
LAYER_SPECS = (
    dict(kind="convT", Ci=IN_CHANNELS, Co=MID_CHANNELS, k=(3, 5, 3),
         s=(1, 1, 1), p=(3, 1, 1), op=(0, 0, 0), act="relu", bn=True),
    dict(kind="convT", Ci=MID_CHANNELS, Co=MID_CHANNELS, k=(3, 5, 5),
         s=(2, 2, 2), p=(2, 2, 2), op=(1, 1, 1), act="relu", bn=True),
    dict(kind="conv", Ci=MID_CHANNELS, Co=OUT_CHANNELS, k=(2, 3, 3),
         s=(1, 1, 1), p=(0, 1, 1), op=(0, 0, 0), act="sigmoid", bn=False),
)


# ----------------------------------------------------------------------------
# Static planning (pure Python, once at setup).
# ----------------------------------------------------------------------------
def _axis_pairs(size_in, k, s, p, op, transposed):
    """All (out_idx, in_idx, kernel_idx) triples contributing along one axis."""
    if transposed:
        size_out = (size_in - 1) * s - 2 * p + k + op
        pairs = [(i * s - p + kk, i, kk)
                 for i in range(size_in) for kk in range(k)
                 if 0 <= i * s - p + kk < size_out]
    else:
        size_out = (size_in + 2 * p - k) // s + 1
        pairs = [(o, o * s + kk - p, kk)
                 for o in range(size_out) for kk in range(k)
                 if 0 <= o * s + kk - p < size_in]
    return size_out, pairs


def build_plan(batch, depth, height, width):
    layers = []
    d_in, h_in, w_in = depth, height, width
    for spec in LAYER_SPECS:
        kd, kh, kw = spec["k"]
        sd, sh, sw = spec["s"]
        pd, ph, pw = spec["p"]
        od, oh, ow = spec["op"]
        tr = spec["kind"] == "convT"
        d_out, d_pairs = _axis_pairs(d_in, kd, sd, pd, od, tr)
        w_out, w_pairs = _axis_pairs(w_in, kw, sw, pw, ow, tr)
        if tr:
            h_out = (h_in - 1) * sh - 2 * ph + kh + oh
            lo_h = kh - 1 - ph
            hi_h = kh - 1 - ph + oh
            hp = (h_in - 1) * sh + 1 + lo_h + hi_h
            st_h = sh
        else:
            h_out = (h_in + 2 * ph - kh) // sh + 1
            lo_h, hi_h, st_h = ph, ph, 1
            hp = h_in + 2 * ph
        layers.append(dict(spec,
                           Din=d_in, Hin=h_in, Win=w_in,
                           Dout=d_out, Hout=h_out, Wout=w_out,
                           d_pairs=d_pairs, w_pairs=w_pairs,
                           lo_h=lo_h, hi_h=hi_h, Hp=hp, st_h=st_h,
                           cols_in=d_in * w_in * spec["Ci"],
                           cols_out=d_out * w_out * spec["Co"]))
        d_in, h_in, w_in = d_out, h_out, w_out
    return dict(N=batch, layers=layers)


def pack_params(params, plan):
    """One-time (outside jit) packing of module parameters into kernel operands."""
    weights = (params["w1"], params["w2"], params["w3"])
    biases = (params["b1"], params["b2"], params["b3"])
    gammas = (params.get("g1"), params.get("g2"), None)
    betas = (params.get("be1"), params.get("be2"), None)

    packed = {}
    for li, lp in enumerate(plan["layers"]):
        ci, co = lp["Ci"], lp["Co"]
        kh_taps = lp["k"][1]
        w = np.asarray(weights[li], np.float32)
        if lp["kind"] == "conv":                   # (Co, Ci, ...) -> (Ci, Co, ...)
            w = np.transpose(w, (1, 0, 2, 3, 4))

        # Block-Toeplitz matrices: one per H-tap; D/W taps (with their stride-2
        # zero-dilation, padding and kernel flip) are folded in.
        t = np.zeros((kh_taps, lp["cols_in"], lp["cols_out"]), np.float32)
        for kh in range(kh_taps):
            kap_h = kh_taps - 1 - kh if lp["kind"] == "convT" else kh
            for (d_o, d_i, kap_d) in lp["d_pairs"]:
                for (w_o, w_i, kap_w) in lp["w_pairs"]:
                    r0 = (d_i * lp["Win"] + w_i) * ci
                    c0 = (d_o * lp["Wout"] + w_o) * co
                    t[kh, r0:r0 + ci, c0:c0 + co] += w[:, :, kap_d, kap_h, kap_w]
        packed[f"T{li}"] = jnp.asarray(t, jnp.bfloat16)

        reps = lp["Dout"] * lp["Wout"]
        bias_t = np.tile(np.asarray(biases[li], np.float32), reps)
        if lp["bn"]:
            gamma = np.asarray(gammas[li], np.float32)
            beta = np.asarray(betas[li], np.float32)
            sel = np.tile(np.eye(co, dtype=np.float32), (reps, 1))    # (cols_out, Co)
            gsel = np.tile(np.diag(gamma), (1, reps))                 # (Co, cols_out)
            beta_t = np.tile(beta, reps)
            p = np.concatenate([bias_t[None], beta_t[None], gsel], axis=0)
            packed[f"S{li}"] = jnp.asarray(sel, jnp.float32)
            packed[f"P{li}"] = jnp.asarray(p, jnp.float32)
        else:
            packed[f"P{li}"] = jnp.asarray(bias_t[None], jnp.float32)
    return packed


# ----------------------------------------------------------------------------
# The single fused Pallas kernel.
# ----------------------------------------------------------------------------
def make_fused_call(plan):
    n = plan["N"]
    layers = plan["layers"]
    l_last = layers[-1]

    def kernel(x_ref, t0_ref, s0_ref, p0_ref, t1_ref, s1_ref, p1_ref,
               t2_ref, p2_ref, o_ref, buf1_ref, buf2_ref):
        in_refs = (x_ref, buf1_ref, buf2_ref)
        t_refs = (t0_ref, t1_ref, t2_ref)
        s_refs = (s0_ref, s1_ref, None)
        p_refs = (p0_ref, p1_ref, p2_ref)

        for li, lp in enumerate(layers):
            rows = lp["Hout"] * n

            # --- conv(transpose) as KH shifted-row MXU matmuls (D/W taps are
            # folded into the block-Toeplitz weights) -> f32 accumulator.
            acc = None
            for kh in range(lp["k"][1]):
                lhs = in_refs[li][n * kh:n * kh + rows, :].astype(jnp.bfloat16)
                part = jnp.dot(lhs, t_refs[li][kh, :, :],
                               preferred_element_type=jnp.float32)
                acc = part if acc is None else acc + part
            y = acc + p_refs[li][0:1, :]                    # bias (tiled per column)

            # --- activation (module order: conv -> act -> BN).
            if lp["act"] == "relu":
                y = jnp.maximum(y, 0.0)
            else:  # sigmoid(x) == 0.5*tanh(x/2) + 0.5  (EUP slot, exact [0, 1])
                y = 0.5 * jnp.tanh(0.5 * y) + 0.5

            # --- training-mode BatchNorm3d (batch stats, biased variance),
            # one-pass sum / sum-of-squares; per-channel reduce & re-broadcast
            # via tiny precomputed selection matmuls (no in-kernel reshapes).
            if lp["bn"]:
                co = lp["Co"]
                inv_cnt = 1.0 / float(rows * lp["Dout"] * lp["Wout"])
                ssum = jnp.sum(y, axis=0, keepdims=True)
                ssq = jnp.sum(y * y, axis=0, keepdims=True)
                mean = jnp.dot(ssum, s_refs[li][...],
                               preferred_element_type=jnp.float32) * inv_cnt
                ex2 = jnp.dot(ssq, s_refs[li][...],
                              preferred_element_type=jnp.float32) * inv_cnt
                var = jnp.maximum(ex2 - mean * mean, 0.0)
                rstd = lax.rsqrt(var + BN_EPS)                       # (1, Co)
                gsel = p_refs[li][2:2 + co, :]                       # (Co, cols_out)
                scale = jnp.dot(rstd, gsel,
                                preferred_element_type=jnp.float32)  # gamma*rstd tiled
                shift = p_refs[li][1:2, :] - jnp.dot(
                    mean * rstd, gsel, preferred_element_type=jnp.float32)
                y = y * scale + shift

            if li + 1 < len(layers):
                # --- write into the next layer's zero-padded / H-dilated input
                # buffer: H padding & stride-2 zero-dilation are contiguous row
                # stores into a zeroed VMEM scratch.
                nxt = layers[li + 1]
                buf = in_refs[li + 1]
                buf[...] = jnp.zeros((nxt["Hp"] * n, nxt["cols_in"]), jnp.float32)
                lo, st = nxt["lo_h"], nxt["st_h"]
                if st == 1:
                    buf[n * lo:n * lo + rows, :] = y
                else:
                    for hi in range(lp["Hout"]):
                        r0 = (lo + st * hi) * n
                        buf[r0:r0 + n, :] = y[n * hi:n * hi + n, :]
            else:
                o_ref[...] = y

    vmem = pltpu.MemorySpace.VMEM
    scratch = [pltpu.VMEM((layers[i]["Hp"] * n, layers[i]["cols_in"]), jnp.float32)
               for i in (1, 2)]
    return pl.pallas_call(
        kernel,
        out_shape=jax.ShapeDtypeStruct(
            (l_last["Hout"] * n, l_last["cols_out"]), jnp.float32),
        in_specs=[pl.BlockSpec(memory_space=vmem)] * 9,
        out_specs=pl.BlockSpec(memory_space=vmem),
        scratch_shapes=scratch,
    )


def make_model(plan):
    fused = make_fused_call(plan)
    n = plan["N"]
    l0 = plan["layers"][0]
    l2 = plan["layers"][-1]

    @jax.jit
    def forward(x_ncdhw, packed):
        # NCDHW -> rows=(H, N), cols=(D, W, C); pad H for layer 0; cast bf16.
        xt = jnp.transpose(x_ncdhw, (3, 0, 2, 4, 1))       # (H, N, D, W, C)
        x2 = xt.reshape(l0["Hin"] * n, l0["cols_in"])
        x2 = jnp.pad(x2, ((l0["lo_h"] * n, l0["hi_h"] * n), (0, 0)))
        x2 = x2.astype(jnp.bfloat16)
        out2d = fused(x2,
                      packed["T0"], packed["S0"], packed["P0"],
                      packed["T1"], packed["S1"], packed["P1"],
                      packed["T2"], packed["P2"])
        out = out2d.reshape(l2["Hout"], n, l2["Dout"], l2["Wout"], l2["Co"])
        return jnp.transpose(out, (1, 4, 2, 0, 3))          # back to NCDHW
    return forward


# ----------------------------------------------------------------------------
# Parameters and pure-JAX f32 reference (PyTorch train-mode semantics).
# ----------------------------------------------------------------------------
def init_params(key):
    ks = jax.random.split(key, 3)
    return {
        "w1": 0.05 * jax.random.normal(ks[0], (IN_CHANNELS, MID_CHANNELS, 3, 5, 3), jnp.float32),
        "b1": 0.01 * jnp.arange(MID_CHANNELS, dtype=jnp.float32),
        "g1": 1.0 + 0.05 * jnp.arange(MID_CHANNELS, dtype=jnp.float32),
        "be1": 0.02 * jnp.arange(MID_CHANNELS, dtype=jnp.float32),
        "w2": 0.05 * jax.random.normal(ks[1], (MID_CHANNELS, MID_CHANNELS, 3, 5, 5), jnp.float32),
        "b2": 0.01 * jnp.arange(MID_CHANNELS, dtype=jnp.float32),
        "g2": 1.0 + 0.05 * jnp.arange(MID_CHANNELS, dtype=jnp.float32),
        "be2": 0.02 * jnp.arange(MID_CHANNELS, dtype=jnp.float32),
        "w3": 0.05 * jax.random.normal(ks[2], (OUT_CHANNELS, MID_CHANNELS, 2, 3, 3), jnp.float32),
        "b3": 0.01 * jnp.arange(OUT_CHANNELS, dtype=jnp.float32),
    }


def reference_forward(x, params):
    def bn(y, gamma, beta):
        mean = jnp.mean(y, axis=(0, 2, 3, 4), keepdims=True)
        var = jnp.mean(jnp.square(y - mean), axis=(0, 2, 3, 4), keepdims=True)
        g = gamma.reshape(1, -1, 1, 1, 1)
        b = beta.reshape(1, -1, 1, 1, 1)
        return (y - mean) * lax.rsqrt(var + BN_EPS) * g + b

    def conv_t(x, w, b, s, p, op):
        k = w.shape[2:]
        wf = jnp.transpose(jnp.flip(w, axis=(2, 3, 4)), (1, 0, 2, 3, 4))
        pads, slc = [], [slice(None), slice(None)]
        for d in range(3):
            lo = k[d] - 1 - p[d]
            hi = k[d] - 1 - p[d] + op[d]
            start, stop = 0, x.shape[2 + d]
            if lo < 0:   # crop instead of negative padding (stride is 1 here)
                start, lo = -lo, 0
            if hi < 0:
                stop, hi = stop + hi, 0
            slc.append(slice(start, stop))
            pads.append((lo, hi))
        y = lax.conv_general_dilated(x[tuple(slc)], wf, (1, 1, 1), pads,
                                     lhs_dilation=s,
                                     dimension_numbers=("NCDHW", "OIDHW", "NCDHW"))
        return y + b.reshape(1, -1, 1, 1, 1)

    def conv(x, w, b, p):
        y = lax.conv_general_dilated(x, w, (1, 1, 1), [(pp, pp) for pp in p],
                                     dimension_numbers=("NCDHW", "OIDHW", "NCDHW"))
        return y + b.reshape(1, -1, 1, 1, 1)

    y = conv_t(x, params["w1"], params["b1"], (1, 1, 1), (3, 1, 1), (0, 0, 0))
    y = bn(jax.nn.relu(y), params["g1"], params["be1"])
    y = conv_t(y, params["w2"], params["b2"], (2, 2, 2), (2, 2, 2), (1, 1, 1))
    y = bn(jax.nn.relu(y), params["g2"], params["be2"])
    y = conv(y, params["w3"], params["b3"], (0, 1, 1))
    return jax.nn.sigmoid(y)


# ----------------------------------------------------------------------------
# Demo / self-check.
# ----------------------------------------------------------------------------
if __name__ == "__main__":
    key = jax.random.PRNGKey(0)
    kp, kx = jax.random.split(key)
    params = init_params(kp)

    batch, depth, height, width = 2, 6, 8, 8
    x = jax.random.normal(kx, (batch, IN_CHANNELS, depth, height, width), jnp.float32)

    plan = build_plan(batch, depth, height, width)
    packed = pack_params(params, plan)        # parameter packing: once, outside jit
    forward = make_model(plan)

    out = jax.block_until_ready(forward(x, packed))

    # D: 6 -> 2 -> 2 -> 1 ;  H: 8 -> 10 -> 20 -> 20 ;  W: 8 -> 8 -> 16 -> 16.
    assert out.shape == (batch, OUT_CHANNELS, 1, 20, 16), out.shape
    assert bool(jnp.isfinite(out).all())
    assert bool((out >= 0.0).all()) and bool((out <= 1.0).all())   # sigmoid range

    ref = jax.block_until_ready(reference_forward(x, params))
    max_err = float(jnp.max(jnp.abs(out - ref)))
    assert max_err < 0.1, f"max abs err vs f32 reference: {max_err}"

    print("KERNEL_OK")
</pallas_src>

<mosaic_0001>
module attributes {stable_mosaic.version = 11 : i64} {
  func.func @kernel(%arg0: memref<28x768xbf16, #tpu.memory_space<vmem>>, %arg1: memref<5x768x176xbf16, #tpu.memory_space<vmem>>, %arg2: memref<176x11xf32, #tpu.memory_space<vmem>>, %arg3: memref<13x176xf32, #tpu.memory_space<vmem>>, %arg4: memref<5x176x352xbf16, #tpu.memory_space<vmem>>, %arg5: memref<352x11xf32, #tpu.memory_space<vmem>>, %arg6: memref<13x352xf32, #tpu.memory_space<vmem>>, %arg7: memref<3x352x96xbf16, #tpu.memory_space<vmem>>, %arg8: memref<1x96xf32, #tpu.memory_space<vmem>>, %arg9: memref<40x96xf32, #tpu.memory_space<vmem>>, %arg10: memref<48x176xf32, #tpu.memory_space<vmem>>, %arg11: memref<44x352xf32, #tpu.memory_space<vmem>>) attributes {dimension_semantics = [], scalar_prefetch = 0 : i64, scratch_operands = 2 : i64, tpu.core_type = #tpu.core_type<tc>} {
    %c0 = arith.constant 0 : index
    %c0_0 = arith.constant 0 : index
    %0 = vector.load %arg0[%c0, %c0_0] : memref<28x768xbf16, #tpu.memory_space<vmem>>, vector<20x768xbf16>
    %c0_1 = arith.constant 0 : index
    %c0_2 = arith.constant 0 : index
    %c0_3 = arith.constant 0 : index
    %1 = vector.load %arg1[%c0_1, %c0_2, %c0_3] : memref<5x768x176xbf16, #tpu.memory_space<vmem>>, vector<1x768x176xbf16>
    %2 = vector.shape_cast %1 : vector<1x768x176xbf16> to vector<768x176xbf16>
    %cst = arith.constant dense<0.000000e+00> : vector<20x176xf32>
    %3 = tpu.matmul %0, %2, %cst {dimension_numbers = #tpu.dot_dimension_numbers<[1], [0], [0], [1], [0, 0, 1, 1], [], []>} : vector<20x768xbf16>, vector<768x176xbf16>, vector<20x176xf32> -> vector<20x176xf32>
    %c2 = arith.constant 2 : index
    %c0_4 = arith.constant 0 : index
    %4 = vector.load %arg0[%c2, %c0_4] : memref<28x768xbf16, #tpu.memory_space<vmem>>, vector<20x768xbf16>
    %c1 = arith.constant 1 : index
    %c0_5 = arith.constant 0 : index
    %c0_6 = arith.constant 0 : index
    %5 = vector.load %arg1[%c1, %c0_5, %c0_6] : memref<5x768x176xbf16, #tpu.memory_space<vmem>>, vector<1x768x176xbf16>
    %6 = vector.shape_cast %5 : vector<1x768x176xbf16> to vector<768x176xbf16>
    %cst_7 = arith.constant dense<0.000000e+00> : vector<20x176xf32>
    %7 = tpu.matmul %4, %6, %cst_7 {dimension_numbers = #tpu.dot_dimension_numbers<[1], [0], [0], [1], [0, 0, 1, 1], [], []>} : vector<20x768xbf16>, vector<768x176xbf16>, vector<20x176xf32> -> vector<20x176xf32>
    %8 = arith.addf %3, %7 : vector<20x176xf32>
    %c4 = arith.constant 4 : index
    %c0_8 = arith.constant 0 : index
    %9 = vector.load %arg0[%c4, %c0_8] : memref<28x768xbf16, #tpu.memory_space<vmem>>, vector<20x768xbf16>
    %c2_9 = arith.constant 2 : index
    %c0_10 = arith.constant 0 : index
    %c0_11 = arith.constant 0 : index
    %10 = vector.load %arg1[%c2_9, %c0_10, %c0_11] : memref<5x768x176xbf16, #tpu.memory_space<vmem>>, vector<1x768x176xbf16>
    %11 = vector.shape_cast %10 : vector<1x768x176xbf16> to vector<768x176xbf16>
    %cst_12 = arith.constant dense<0.000000e+00> : vector<20x176xf32>
    %12 = tpu.matmul %9, %11, %cst_12 {dimension_numbers = #tpu.dot_dimension_numbers<[1], [0], [0], [1], [0, 0, 1, 1], [], []>} : vector<20x768xbf16>, vector<768x176xbf16>, vector<20x176xf32> -> vector<20x176xf32>
    %13 = arith.addf %8, %12 : vector<20x176xf32>
    %c6 = arith.constant 6 : index
    %c0_13 = arith.constant 0 : index
    %14 = vector.load %arg0[%c6, %c0_13] : memref<28x768xbf16, #tpu.memory_space<vmem>>, vector<20x768xbf16>
    %c3 = arith.constant 3 : index
    %c0_14 = arith.constant 0 : index
    %c0_15 = arith.constant 0 : index
    %15 = vector.load %arg1[%c3, %c0_14, %c0_15] : memref<5x768x176xbf16, #tpu.memory_space<vmem>>, vector<1x768x176xbf16>
    %16 = vector.shape_cast %15 : vector<1x768x176xbf16> to vector<768x176xbf16>
    %cst_16 = arith.constant dense<0.000000e+00> : vector<20x176xf32>
    %17 = tpu.matmul %14, %16, %cst_16 {dimension_numbers = #tpu.dot_dimension_numbers<[1], [0], [0], [1], [0, 0, 1, 1], [], []>} : vector<20x768xbf16>, vector<768x176xbf16>, vector<20x176xf32> -> vector<20x176xf32>
    %18 = arith.addf %13, %17 : vector<20x176xf32>
    %c8 = arith.constant 8 : index
    %c0_17 = arith.constant 0 : index
    %19 = vector.load %arg0[%c8, %c0_17] : memref<28x768xbf16, #tpu.memory_space<vmem>>, vector<20x768xbf16>
    %c4_18 = arith.constant 4 : index
    %c0_19 = arith.constant 0 : index
    %c0_20 = arith.constant 0 : index
    %20 = vector.load %arg1[%c4_18, %c0_19, %c0_20] : memref<5x768x176xbf16, #tpu.memory_space<vmem>>, vector<1x768x176xbf16>
    %21 = vector.shape_cast %20 : vector<1x768x176xbf16> to vector<768x176xbf16>
    %cst_21 = arith.constant dense<0.000000e+00> : vector<20x176xf32>
    %22 = tpu.matmul %19, %21, %cst_21 {dimension_numbers = #tpu.dot_dimension_numbers<[1], [0], [0], [1], [0, 0, 1, 1], [], []>} : vector<20x768xbf16>, vector<768x176xbf16>, vector<20x176xf32> -> vector<20x176xf32>
    %23 = arith.addf %18, %22 : vector<20x176xf32>
    %c0_22 = arith.constant 0 : index
    %c0_23 = arith.constant 0 : index
    %24 = vector.load %arg3[%c0_22, %c0_23] : memref<13x176xf32, #tpu.memory_space<vmem>>, vector<1x176xf32>
    %25 = vector.broadcast %24 : vector<1x176xf32> to vector<20x176xf32>
    %26 = arith.addf %23, %25 : vector<20x176xf32>
    %cst_24 = arith.constant 0.000000e+00 : f32
    %27 = vector.broadcast %cst_24 : f32 to vector<20x176xf32>
    %28 = arith.maximumf %26, %27 : vector<20x176xf32>
    %cst_25 = arith.constant dense<0.000000e+00> : vector<176xf32>
    %29 = vector.multi_reduction <add>, %28, %cst_25 [0] : vector<20x176xf32> to vector<176xf32>
    %30 = vector.shape_cast %29 : vector<176xf32> to vector<1x176xf32>
    %31 = arith.mulf %28, %28 : vector<20x176xf32>
    %cst_26 = arith.constant dense<0.000000e+00> : vector<176xf32>
    %32 = vector.multi_reduction <add>, %31, %cst_26 [0] : vector<20x176xf32> to vector<176xf32>
    %33 = vector.shape_cast %32 : vector<176xf32> to vector<1x176xf32>
    %c0_27 = arith.constant 0 : index
    %c0_28 = arith.constant 0 : index
    %34 = vector.load %arg2[%c0_27, %c0_28] : memref<176x11xf32, #tpu.memory_space<vmem>>, vector<176x11xf32>
    %cst_29 = arith.constant dense<0.000000e+00> : vector<1x11xf32>
    %35 = tpu.matmul %30, %34, %cst_29 {dimension_numbers = #tpu.dot_dimension_numbers<[1], [0], [0], [1], [0, 0, 1, 1], [], []>} : vector<1x176xf32>, vector<176x11xf32>, vector<1x11xf32> -> vector<1x11xf32>
    %cst_30 = arith.constant 3.125000e-03 : f32
    %36 = vector.broadcast %cst_30 : f32 to vector<1x11xf32>
    %37 = arith.mulf %35, %36 : vector<1x11xf32>
    %c0_31 = arith.constant 0 : index
    %c0_32 = arith.constant 0 : index
    %38 = vector.load %arg2[%c0_31, %c0_32] : memref<176x11xf32, #tpu.memory_space<vmem>>, vector<176x11xf32>
    %cst_33 = arith.constant dense<0.000000e+00> : vector<1x11xf32>
    %39 = tpu.matmul %33, %38, %cst_33 {dimension_numbers = #tpu.dot_dimension_numbers<[1], [0], [0], [1], [0, 0, 1, 1], [], []>} : vector<1x176xf32>, vector<176x11xf32>, vector<1x11xf32> -> vector<1x11xf32>
    %cst_34 = arith.constant 3.125000e-03 : f32
    %40 = vector.broadcast %cst_34 : f32 to vector<1x11xf32>
    %41 = arith.mulf %39, %40 : vector<1x11xf32>
    %42 = arith.mulf %37, %37 : vector<1x11xf32>
    %43 = arith.subf %41, %42 : vector<1x11xf32>
    %cst_35 = arith.constant 0.000000e+00 : f32
    %44 = vector.broadcast %cst_35 : f32 to vector<1x11xf32>
    %45 = arith.maximumf %43, %44 : vector<1x11xf32>
    %cst_36 = arith.constant 9.99999974E-6 : f32
    %46 = vector.broadcast %cst_36 : f32 to vector<1x11xf32>
    %47 = arith.addf %45, %46 : vector<1x11xf32>
    %48 = math.rsqrt %47 : vector<1x11xf32>
    %c2_37 = arith.constant 2 : index
    %c0_38 = arith.constant 0 : index
    %49 = vector.load %arg3[%c2_37, %c0_38] : memref<13x176xf32, #tpu.memory_space<vmem>>, vector<11x176xf32>
    %cst_39 = arith.constant dense<0.000000e+00> : vector<1x176xf32>
    %50 = tpu.matmul %48, %49, %cst_39 {dimension_numbers = #tpu.dot_dimension_numbers<[1], [0], [0], [1], [0, 0, 1, 1], [], []>} : vector<1x11xf32>, vector<11x176xf32>, vector<1x176xf32> -> vector<1x176xf32>
    %c1_40 = arith.constant 1 : index
    %c0_41 = arith.constant 0 : index
    %51 = vector.load %arg3[%c1_40, %c0_41] : memref<13x176xf32, #tpu.memory_space<vmem>>, vector<1x176xf32>
    %52 = arith.mulf %37, %48 : vector<1x11xf32>
    %cst_42 = arith.constant dense<0.000000e+00> : vector<1x176xf32>
    %53 = tpu.matmul %52, %49, %cst_42 {dimension_numbers = #tpu.dot_dimension_numbers<[1], [0], [0], [1], [0, 0, 1, 1], [], []>} : vector<1x11xf32>, vector<11x176xf32>, vector<1x176xf32> -> vector<1x176xf32>
    %54 = arith.subf %51, %53 : vector<1x176xf32>
    %55 = vector.broadcast %50 : vector<1x176xf32> to vector<20x176xf32>
    %56 = arith.mulf %28, %55 : vector<20x176xf32>
    %57 = vector.broadcast %54 : vector<1x176xf32> to vector<20x176xf32>
    %58 = arith.addf %56, %57 : vector<20x176xf32>
    %cst_43 = arith.constant 0.000000e+00 : f32
    %59 = vector.broadcast %cst_43 : f32 to vector<48x176xf32>
    %c0_44 = arith.constant 0 : index
    %c0_45 = arith.constant 0 : index
    %60 = vector.load %arg10[%c0_44, %c0_45] : memref<48x176xf32, #tpu.memory_space<vmem>>, vector<48x176xf32>
    tpu.vector_store %arg10[%c0_44, %c0_45], %59 {strides = array<i32>} : memref<48x176xf32, #tpu.memory_space<vmem>>, vector<48x176xf32>,
    %61 = vector.extract_strided_slice %58 {offsets = [0, 0], sizes = [2, 176], strides = [1, 1]} : vector<20x176xf32> to vector<2x176xf32>
    %c4_46 = arith.constant 4 : index
    %c0_47 = arith.constant 0 : index
    %62 = vector.load %arg10[%c4_46, %c0_47] : memref<48x176xf32, #tpu.memory_space<vmem>>, vector<2x176xf32>
    tpu.vector_store %arg10[%c4_46, %c0_47], %61 {strides = array<i32>} : memref<48x176xf32, #tpu.memory_space<vmem>>, vector<2x176xf32>,
    %63 = vector.extract_strided_slice %58 {offsets = [2, 0], sizes = [2, 176], strides = [1, 1]} : vector<20x176xf32> to vector<2x176xf32>
    %c8_48 = arith.constant 8 : index
    %c0_49 = arith.constant 0 : index
    %64 = vector.load %arg10[%c8_48, %c0_49] : memref<48x176xf32, #tpu.memory_space<vmem>>, vector<2x176xf32>
    tpu.vector_store %arg10[%c8_48, %c0_49], %63 {strides = array<i32>} : memref<48x176xf32, #tpu.memory_space<vmem>>, vector<2x176xf32>,
    %65 = vector.extract_strided_slice %58 {offsets = [4, 0], sizes = [2, 176], strides = [1, 1]} : vector<20x176xf32> to vector<2x176xf32>
    %c12 = arith.constant 12 : index
    %c0_50 = arith.constant 0 : index
    %66 = vector.load %arg10[%c12, %c0_50] : memref<48x176xf32, #tpu.memory_space<vmem>>, vector<2x176xf32>
    tpu.vector_store %arg10[%c12, %c0_50], %65 {strides = array<i32>} : memref<48x176xf32, #tpu.memory_space<vmem>>, vector<2x176xf32>,
    %67 = vector.extract_strided_slice %58 {offsets = [6, 0], sizes = [2, 176], strides = [1, 1]} : vector<20x176xf32> to vector<2x176xf32>
    %c16 = arith.constant 16 : index
    %c0_51 = arith.constant 0 : index
    %68 = vector.load %arg10[%c16, %c0_51] : memref<48x176xf32, #tpu.memory_space<vmem>>, vector<2x176xf32>
    tpu.vector_store %arg10[%c16, %c0_51], %67 {strides = array<i32>} : memref<48x176xf32, #tpu.memory_space<vmem>>, vector<2x176xf32>,
    %69 = vector.extract_strided_slice %58 {offsets = [8, 0], sizes = [2, 176], strides = [1, 1]} : vector<20x176xf32> to vector<2x176xf32>
    %c20 = arith.constant 20 : index
    %c0_52 = arith.constant 0 : index
    %70 = vector.load %arg10[%c20, %c0_52] : memref<48x176xf32, #tpu.memory_space<vmem>>, vector<2x176xf32>
    tpu.vector_store %arg10[%c20, %c0_52], %69 {strides = array<i32>} : memref<48x176xf32, #tpu.memory_space<vmem>>, vector<2x176xf32>,
    %71 = vector.extract_strided_slice %58 {offsets = [10, 0], sizes = [2, 176], strides = [1, 1]} : vector<20x176xf32> to vector<2x176xf32>
    %c24 = arith.constant 24 : index
    %c0_53 = arith.constant 0 : index
    %72 = vector.load %arg10[%c24, %c0_53] : memref<48x176xf32, #tpu.memory_space<vmem>>, vector<2x176xf32>
    tpu.vector_store %arg10[%c24, %c0_53], %71 {strides = array<i32>} : memref<48x176xf32, #tpu.memory_space<vmem>>, vector<2x176xf32>,
    %73 = vector.extract_strided_slice %58 {offsets = [12, 0], sizes = [2, 176], strides = [1, 1]} : vector<20x176xf32> to vector<2x176xf32>
    %c28 = arith.constant 28 : index
    %c0_54 = arith.constant 0 : index
    %74 = vector.load %arg10[%c28, %c0_54] : memref<48x176xf32, #tpu.memory_space<vmem>>, vector<2x176xf32>
    tpu.vector_store %arg10[%c28, %c0_54], %73 {strides = array<i32>} : memref<48x176xf32, #tpu.memory_space<vmem>>, vector<2x176xf32>,
    %75 = vector.extract_strided_slice %58 {offsets = [14, 0], sizes = [2, 176], strides = [1, 1]} : vector<20x176xf32> to vector<2x176xf32>
    %c32 = arith.constant 32 : index
    %c0_55 = arith.constant 0 : index
    %76 = vector.load %arg10[%c32, %c0_55] : memref<48x176xf32, #tpu.memory_space<vmem>>, vector<2x176xf32>
    tpu.vector_store %arg10[%c32, %c0_55], %75 {strides = array<i32>} : memref<48x176xf32, #tpu.memory_space<vmem>>, vector<2x176xf32>,
    %77 = vector.extract_strided_slice %58 {offsets = [16, 0], sizes = [2, 176], strides = [1, 1]} : vector<20x176xf32> to vector<2x176xf32>
    %c36 = arith.constant 36 : index
    %c0_56 = arith.constant 0 : index
    %78 = vector.load %arg10[%c36, %c0_56] : memref<48x176xf32, #tpu.memory_space<vmem>>, vector<2x176xf32>
    tpu.vector_store %arg10[%c36, %c0_56], %77 {strides = array<i32>} : memref<48x176xf32, #tpu.memory_space<vmem>>, vector<2x176xf32>,
    %79 = vector.extract_strided_slice %58 {offsets = [18, 0], sizes = [2, 176], strides = [1, 1]} : vector<20x176xf32> to vector<2x176xf32>
    %c40 = arith.constant 40 : index
    %c0_57 = arith.constant 0 : index
    %80 = vector.load %arg10[%c40, %c0_57] : memref<48x176xf32, #tpu.memory_space<vmem>>, vector<2x176xf32>
    tpu.vector_store %arg10[%c40, %c0_57], %79 {strides = array<i32>} : memref<48x176xf32, #tpu.memory_space<vmem>>, vector<2x176xf32>,
    %c0_58 = arith.constant 0 : index
    %c0_59 = arith.constant 0 : index
    %81 = vector.load %arg10[%c0_58, %c0_59] : memref<48x176xf32, #tpu.memory_space<vmem>>, vector<40x176xf32>
    %82 = arith.truncf %81 : vector<40x176xf32> to vector<40x176xbf16>
    %c0_60 = arith.constant 0 : index
    %c0_61 = arith.constant 0 : index
    %c0_62 = arith.constant 0 : index
    %83 = vector.load %arg4[%c0_60, %c0_61, %c0_62] : memref<5x176x352xbf16, #tpu.memory_space<vmem>>, vector<1x176x352xbf16>
    %84 = vector.shape_cast %83 : vector<1x176x352xbf16> to vector<176x352xbf16>
    %cst_63 = arith.constant dense<0.000000e+00> : vector<40x352xf32>
    %85 = tpu.matmul %82, %84, %cst_63 {dimension_numbers = #tpu.dot_dimension_numbers<[1], [0], [0], [1], [0, 0, 1, 1], [], []>} : vector<40x176xbf16>, vector<176x352xbf16>, vector<40x352xf32> -> vector<40x352xf32>
    %c2_64 = arith.constant 2 : index
    %c0_65 = arith.constant 0 : index
    %86 = vector.load %arg10[%c2_64, %c0_65] : memref<48x176xf32, #tpu.memory_space<vmem>>, vector<40x176xf32>
    %87 = arith.truncf %86 : vector<40x176xf32> to vector<40x176xbf16>
    %c1_66 = arith.constant 1 : index
    %c0_67 = arith.constant 0 : index
    %c0_68 = arith.constant 0 : index
    %88 = vector.load %arg4[%c1_66, %c0_67, %c0_68] : memref<5x176x352xbf16, #tpu.memory_space<vmem>>, vector<1x176x352xbf16>
    %89 = vector.shape_cast %88 : vector<1x176x352xbf16> to vector<176x352xbf16>
    %cst_69 = arith.constant dense<0.000000e+00> : vector<40x352xf32>
    %90 = tpu.matmul %87, %89, %cst_69 {dimension_numbers = #tpu.dot_dimension_numbers<[1], [0], [0], [1], [0, 0, 1, 1], [], []>} : vector<40x176xbf16>, vector<176x352xbf16>, vector<40x352xf32> -> vector<40x352xf32>
    %91 = arith.addf %85, %90 : vector<40x352xf32>
    %c4_70 = arith.constant 4 : index
    %c0_71 = arith.constant 0 : index
    %92 = vector.load %arg10[%c4_70, %c0_71] : memref<48x176xf32, #tpu.memory_space<vmem>>, vector<40x176xf32>
    %93 = arith.truncf %92 : vector<40x176xf32> to vector<40x176xbf16>
    %c2_72 = arith.constant 2 : index
    %c0_73 = arith.constant 0 : index
    %c0_74 = arith.constant 0 : index
    %94 = vector.load %arg4[%c2_72, %c0_73, %c0_74] : memref<5x176x352xbf16, #tpu.memory_space<vmem>>, vector<1x176x352xbf16>
    %95 = vector.shape_cast %94 : vector<1x176x352xbf16> to vector<176x352xbf16>
    %cst_75 = arith.constant dense<0.000000e+00> : vector<40x352xf32>
    %96 = tpu.matmul %93, %95, %cst_75 {dimension_numbers = #tpu.dot_dimension_numbers<[1], [0], [0], [1], [0, 0, 1, 1], [], []>} : vector<40x176xbf16>, vector<176x352xbf16>, vector<40x352xf32> -> vector<40x352xf32>
    %97 = arith.addf %91, %96 : vector<40x352xf32>
    %c6_76 = arith.constant 6 : index
    %c0_77 = arith.constant 0 : index
    %98 = vector.load %arg10[%c6_76, %c0_77] : memref<48x176xf32, #tpu.memory_space<vmem>>, vector<40x176xf32>
    %99 = arith.truncf %98 : vector<40x176xf32> to vector<40x176xbf16>
    %c3_78 = arith.constant 3 : index
    %c0_79 = arith.constant 0 : index
    %c0_80 = arith.constant 0 : index
    %100 = vector.load %arg4[%c3_78, %c0_79, %c0_80] : memref<5x176x352xbf16, #tpu.memory_space<vmem>>, vector<1x176x352xbf16>
    %101 = vector.shape_cast %100 : vector<1x176x352xbf16> to vector<176x352xbf16>
    %cst_81 = arith.constant dense<0.000000e+00> : vector<40x352xf32>
    %102 = tpu.matmul %99, %101, %cst_81 {dimension_numbers = #tpu.dot_dimension_numbers<[1], [0], [0], [1], [0, 0, 1, 1], [], []>} : vector<40x176xbf16>, vector<176x352xbf16>, vector<40x352xf32> -> vector<40x352xf32>
    %103 = arith.addf %97, %102 : vector<40x352xf32>
    %c8_82 = arith.constant 8 : index
    %c0_83 = arith.constant 0 : index
    %104 = vector.load %arg10[%c8_82, %c0_83] : memref<48x176xf32, #tpu.memory_space<vmem>>, vector<40x176xf32>
    %105 = arith.truncf %104 : vector<40x176xf32> to vector<40x176xbf16>
    %c4_84 = arith.constant 4 : index
    %c0_85 = arith.constant 0 : index
    %c0_86 = arith.constant 0 : index
    %106 = vector.load %arg4[%c4_84, %c0_85, %c0_86] : memref<5x176x352xbf16, #tpu.memory_space<vmem>>, vector<1x176x352xbf16>
    %107 = vector.shape_cast %106 : vector<1x176x352xbf16> to vector<176x352xbf16>
    %cst_87 = arith.constant dense<0.000000e+00> : vector<40x352xf32>
    %108 = tpu.matmul %105, %107, %cst_87 {dimension_numbers = #tpu.dot_dimension_numbers<[1], [0], [0], [1], [0, 0, 1, 1], [], []>} : vector<40x176xbf16>, vector<176x352xbf16>, vector<40x352xf32> -> vector<40x352xf32>
    %109 = arith.addf %103, %108 : vector<40x352xf32>
    %c0_88 = arith.constant 0 : index
    %c0_89 = arith.constant 0 : index
    %110 = vector.load %arg6[%c0_88, %c0_89] : memref<13x352xf32, #tpu.memory_space<vmem>>, vector<1x352xf32>
    %111 = vector.broadcast %110 : vector<1x352xf32> to vector<40x352xf32>
    %112 = arith.addf %109, %111 : vector<40x352xf32>
    %cst_90 = arith.constant 0.000000e+00 : f32
    %113 = vector.broadcast %cst_90 : f32 to vector<40x352xf32>
    %114 = arith.maximumf %112, %113 : vector<40x352xf32>
    %cst_91 = arith.constant dense<0.000000e+00> : vector<352xf32>
    %115 = vector.multi_reduction <add>, %114, %cst_91 [0] : vector<40x352xf32> to vector<352xf32>
    %116 = vector.shape_cast %115 : vector<352xf32> to vector<1x352xf32>
    %117 = arith.mulf %114, %114 : vector<40x352xf32>
    %cst_92 = arith.constant dense<0.000000e+00> : vector<352xf32>
    %118 = vector.multi_reduction <add>, %117, %cst_92 [0] : vector<40x352xf32> to vector<352xf32>
    %119 = vector.shape_cast %118 : vector<352xf32> to vector<1x352xf32>
    %c0_93 = arith.constant 0 : index
    %c0_94 = arith.constant 0 : index
    %120 = vector.load %arg5[%c0_93, %c0_94] : memref<352x11xf32, #tpu.memory_space<vmem>>, vector<352x11xf32>
    %cst_95 = arith.constant dense<0.000000e+00> : vector<1x11xf32>
    %121 = tpu.matmul %116, %120, %cst_95 {dimension_numbers = #tpu.dot_dimension_numbers<[1], [0], [0], [1], [0, 0, 1, 1], [], []>} : vector<1x352xf32>, vector<352x11xf32>, vector<1x11xf32> -> vector<1x11xf32>
    %cst_96 = arith.constant 7.812500e-04 : f32
    %122 = vector.broadcast %cst_96 : f32 to vector<1x11xf32>
    %123 = arith.mulf %121, %122 : vector<1x11xf32>
    %c0_97 = arith.constant 0 : index
    %c0_98 = arith.constant 0 : index
    %124 = vector.load %arg5[%c0_97, %c0_98] : memref<352x11xf32, #tpu.memory_space<vmem>>, vector<352x11xf32>
    %cst_99 = arith.constant dense<0.000000e+00> : vector<1x11xf32>
    %125 = tpu.matmul %119, %124, %cst_99 {dimension_numbers = #tpu.dot_dimension_numbers<[1], [0], [0], [1], [0, 0, 1, 1], [], []>} : vector<1x352xf32>, vector<352x11xf32>, vector<1x11xf32> -> vector<1x11xf32>
    %cst_100 = arith.constant 7.812500e-04 : f32
    %126 = vector.broadcast %cst_100 : f32 to vector<1x11xf32>
    %127 = arith.mulf %125, %126 : vector<1x11xf32>
    %128 = arith.mulf %123, %123 : vector<1x11xf32>
    %129 = arith.subf %127, %128 : vector<1x11xf32>
    %cst_101 = arith.constant 0.000000e+00 : f32
    %130 = vector.broadcast %cst_101 : f32 to vector<1x11xf32>
    %131 = arith.maximumf %129, %130 : vector<1x11xf32>
    %cst_102 = arith.constant 9.99999974E-6 : f32
    %132 = vector.broadcast %cst_102 : f32 to vector<1x11xf32>
    %133 = arith.addf %131, %132 : vector<1x11xf32>
    %134 = math.rsqrt %133 : vector<1x11xf32>
    %c2_103 = arith.constant 2 : index
    %c0_104 = arith.constant 0 : index
    %135 = vector.load %arg6[%c2_103, %c0_104] : memref<13x352xf32, #tpu.memory_space<vmem>>, vector<11x352xf32>
    %cst_105 = arith.constant dense<0.000000e+00> : vector<1x352xf32>
    %136 = tpu.matmul %134, %135, %cst_105 {dimension_numbers = #tpu.dot_dimension_numbers<[1], [0], [0], [1], [0, 0, 1, 1], [], []>} : vector<1x11xf32>, vector<11x352xf32>, vector<1x352xf32> -> vector<1x352xf32>
    %c1_106 = arith.constant 1 : index
    %c0_107 = arith.constant 0 : index
    %137 = vector.load %arg6[%c1_106, %c0_107] : memref<13x352xf32, #tpu.memory_space<vmem>>, vector<1x352xf32>
    %138 = arith.mulf %123, %134 : vector<1x11xf32>
    %cst_108 = arith.constant dense<0.000000e+00> : vector<1x352xf32>
    %139 = tpu.matmul %138, %135, %cst_108 {dimension_numbers = #tpu.dot_dimension_numbers<[1], [0], [0], [1], [0, 0, 1, 1], [], []>} : vector<1x11xf32>, vector<11x352xf32>, vector<1x352xf32> -> vector<1x352xf32>
    %140 = arith.subf %137, %139 : vector<1x352xf32>
    %141 = vector.broadcast %136 : vector<1x352xf32> to vector<40x352xf32>
    %142 = arith.mulf %114, %141 : vector<40x352xf32>
    %143 = vector.broadcast %140 : vector<1x352xf32> to vector<40x352xf32>
    %144 = arith.addf %142, %143 : vector<40x352xf32>
    %cst_109 = arith.constant 0.000000e+00 : f32
    %145 = vector.broadcast %cst_109 : f32 to vector<44x352xf32>
    %c0_110 = arith.constant 0 : index
    %c0_111 = arith.constant 0 : index
    %146 = vector.load %arg11[%c0_110, %c0_111] : memref<44x352xf32, #tpu.memory_space<vmem>>, vector<44x352xf32>
    tpu.vector_store %arg11[%c0_110, %c0_111], %145 {strides = array<i32>} : memref<44x352xf32, #tpu.memory_space<vmem>>, vector<44x352xf32>,
    %c2_112 = arith.constant 2 : index
    %c0_113 = arith.constant 0 : index
    %147 = vector.load %arg11[%c2_112, %c0_113] : memref<44x352xf32, #tpu.memory_space<vmem>>, vector<40x352xf32>
    tpu.vector_store %arg11[%c2_112, %c0_113], %144 {strides = array<i32>} : memref<44x352xf32, #tpu.memory_space<vmem>>, vector<40x352xf32>,
    %c0_114 = arith.constant 0 : index
    %c0_115 = arith.constant 0 : index
    %148 = vector.load %arg11[%c0_114, %c0_115] : memref<44x352xf32, #tpu.memory_space<vmem>>, vector<40x352xf32>
    %149 = arith.truncf %148 : vector<40x352xf32> to vector<40x352xbf16>
    %c0_116 = arith.constant 0 : index
    %c0_117 = arith.constant 0 : index
    %c0_118 = arith.constant 0 : index
    %150 = vector.load %arg7[%c0_116, %c0_117, %c0_118] : memref<3x352x96xbf16, #tpu.memory_space<vmem>>, vector<1x352x96xbf16>
    %151 = vector.shape_cast %150 : vector<1x352x96xbf16> to vector<352x96xbf16>
    %cst_119 = arith.constant dense<0.000000e+00> : vector<40x96xf32>
    %152 = tpu.matmul %149, %151, %cst_119 {dimension_numbers = #tpu.dot_dimension_numbers<[1], [0], [0], [1], [0, 0, 1, 1], [], []>} : vector<40x352xbf16>, vector<352x96xbf16>, vector<40x96xf32> -> vector<40x96xf32>
    %c2_120 = arith.constant 2 : index
    %c0_121 = arith.constant 0 : index
    %153 = vector.load %arg11[%c2_120, %c0_121] : memref<44x352xf32, #tpu.memory_space<vmem>>, vector<40x352xf32>
    %154 = arith.truncf %153 : vector<40x352xf32> to vector<40x352xbf16>
    %c1_122 = arith.constant 1 : index
    %c0_123 = arith.constant 0 : index
    %c0_124 = arith.constant 0 : index
    %155 = vector.load %arg7[%c1_122, %c0_123, %c0_124] : memref<3x352x96xbf16, #tpu.memory_space<vmem>>, vector<1x352x96xbf16>
    %156 = vector.shape_cast %155 : vector<1x352x96xbf16> to vector<352x96xbf16>
    %cst_125 = arith.constant dense<0.000000e+00> : vector<40x96xf32>
    %157 = tpu.matmul %154, %156, %cst_125 {dimension_numbers = #tpu.dot_dimension_numbers<[1], [0], [0], [1], [0, 0, 1, 1], [], []>} : vector<40x352xbf16>, vector<352x96xbf16>, vector<40x96xf32> -> vector<40x96xf32>
    %158 = arith.addf %152, %157 : vector<40x96xf32>
    %c4_126 = arith.constant 4 : index
    %c0_127 = arith.constant 0 : index
    %159 = vector.load %arg11[%c4_126, %c0_127] : memref<44x352xf32, #tpu.memory_space<vmem>>, vector<40x352xf32>
    %160 = arith.truncf %159 : vector<40x352xf32> to vector<40x352xbf16>
    %c2_128 = arith.constant 2 : index
    %c0_129 = arith.constant 0 : index
    %c0_130 = arith.constant 0 : index
    %161 = vector.load %arg7[%c2_128, %c0_129, %c0_130] : memref<3x352x96xbf16, #tpu.memory_space<vmem>>, vector<1x352x96xbf16>
    %162 = vector.shape_cast %161 : vector<1x352x96xbf16> to vector<352x96xbf16>
    %cst_131 = arith.constant dense<0.000000e+00> : vector<40x96xf32>
    %163 = tpu.matmul %160, %162, %cst_131 {dimension_numbers = #tpu.dot_dimension_numbers<[1], [0], [0], [1], [0, 0, 1, 1], [], []>} : vector<40x352xbf16>, vector<352x96xbf16>, vector<40x96xf32> -> vector<40x96xf32>
    %164 = arith.addf %158, %163 : vector<40x96xf32>
    %c0_132 = arith.constant 0 : index
    %c0_133 = arith.constant 0 : index
    %165 = vector.load %arg8[%c0_132, %c0_133] : memref<1x96xf32, #tpu.memory_space<vmem>>, vector<1x96xf32>
    %166 = vector.broadcast %165 : vector<1x96xf32> to vector<40x96xf32>
    %167 = arith.addf %164, %166 : vector<40x96xf32>
    %cst_134 = arith.constant 5.000000e-01 : f32
    %168 = vector.broadcast %cst_134 : f32 to vector<40x96xf32>
    %169 = arith.mulf %168, %167 : vector<40x96xf32>
    %170 = math.tanh %169 : vector<40x96xf32>
    %cst_135 = arith.constant 5.000000e-01 : f32
    %171 = vector.broadcast %cst_135 : f32 to vector<40x96xf32>
    %172 = arith.mulf %171, %170 : vector<40x96xf32>
    %cst_136 = arith.constant 5.000000e-01 : f32
    %173 = vector.broadcast %cst_136 : f32 to vector<40x96xf32>
    %174 = arith.addf %172, %173 : vector<40x96xf32>
    %c0_137 = arith.constant 0 : index
    %c0_138 = arith.constant 0 : index
    %175 = vector.load %arg9[%c0_137, %c0_138] : memref<40x96xf32, #tpu.memory_space<vmem>>, vector<40x96xf32>
    tpu.vector_store %arg9[%c0_137, %c0_138], %174 {strides = array<i32>} : memref<40x96xf32, #tpu.memory_space<vmem>>, vector<40x96xf32>,
    return
  }
}

</mosaic_0001>

<bundles_post_ra>
// kernel: forward.1
= control target key start
LH: loop header
LB: loop body
LE: loop exit
PB: predicated region body
PF: predicated region fallthrough
CT: control target
= control target key end

     0   :  { %vm280_vm0 = vcmask 1046528   ;;  %vm1752_vm1 = vcmask 1045504   ;;  %vm2579_vm2 = vcmask 1044480   ;;  %vm4055_vm3 = vcmask 392192   ;;  %s15349_s1 = inlined_call_operand.vmem [shape: bf16[5,768,176], index: 1, kind: input, shape index: {}]   ;;  %s15350_s0 = inlined_call_operand.vmem [shape: bf16[28,768], index: 0, kind: input, shape index: {}]   ;;  %s15351_s2 = inlined_call_operand.vmem [shape: f32[176,11], index: 2, kind: input, shape index: {}]   ;;  %s15352_s3 = inlined_call_operand.vmem [shape: f32[13,176], index: 3, kind: input, shape index: {}]   ;;  %s15353_s4 = inlined_call_operand.vmem [shape: bf16[5,176,352], index: 4, kind: input, shape index: {}]   ;;  %s15354_s5 = inlined_call_operand.vmem [shape: f32[352,11], index: 5, kind: input, shape index: {}]   ;;  %s15355_s6 = inlined_call_operand.vmem [shape: f32[13,352], index: 6, kind: input, shape index: {}]   ;;  %s15356_s7 = inlined_call_operand.vmem [shape: bf16[3,352,96], index: 7, kind: input, shape index: {}]   ;;  %s15357_s8 = inlined_call_operand.vmem [shape: f32[1,96], index: 8, kind: input, shape index: {}]   ;;  %s15358_s9 = inlined_call_operand.vmem [shape: f32[40,96], index: 9, kind: output, shape index: {}]  }
   0x1   :  { %v10610_v0 = vld [vmem:[%s15349_s1 + $0x404] ss:$8 sps:$4 sm:$0xff]   ;;  %v10612_v1 = vld [vmem:[%s15349_s1 + $0x400] ss:$8 sps:$4 sm:$0xff]   ;;  %v10613_v2 = vld [vmem:[%s15349_s1 + $0x414] ss:$8 sps:$4 sm:$0xff]  }
   0x2   :  { %842 = vmatprep.subr.bf16.mxu0 %v10610_v0  ;;  %v10615_v3 = vld [vmem:[%s15349_s1 + $0x410] ss:$8 sps:$4 sm:$0xff]   ;;  %v10616_v4 = vld [vmem:[%s15349_s1 + $0x424] ss:$8 sps:$4 sm:$0xff]   ;;  %v10618_v5 = vld [vmem:[%s15349_s1 + $0x420] ss:$8 sps:$4 sm:$0xff]  }
   0x3   :  { %843 = vmatpush1.bf16.msra.mxu0 %v10612_v1  ;;  %v10619_v6 = vld [vmem:[%s15349_s1 + $0x434] ss:$8 sps:$4 sm:$0xff]   ;;  %v10621_v7 = vld [vmem:[%s15349_s1 + $0x430] ss:$8 sps:$4 sm:$0xff]   ;;  %v10622_v8 = vld [vmem:[%s15349_s1 + $0x444] ss:$8 sps:$4 sm:$0xff]  }
   0x4   :  { %844 = vmatprep.subr.bf16.mxu0 %v10613_v2  ;;  %v10624_v9 = vld [vmem:[%s15349_s1 + $0x440] ss:$8 sps:$4 sm:$0xff]   ;;  %v10625_v10 = vld [vmem:[%s15349_s1 + $0x454] ss:$8 sps:$4 sm:$0xff]   ;;  %v10646_v11 = vld [vmem:[%s15349_s1 + $0x304] ss:$8 sps:$4 sm:$0xff]  }
   0x5   :  { %v10627_v12 = vld [vmem:[%s15349_s1 + $0x450] ss:$8 sps:$4 sm:$0xff]   ;;  %791 = vmatprep.subr.bf16.mxu1 %v10646_v11  ;;  %v10650_v13 = vld [vmem:[%s15349_s1 + $0x300] ss:$8 sps:$4 sm:$0xff]   ;;  %v10652_v14 = vld [vmem:[%s15349_s1 + $0x314] ss:$8 sps:$4 sm:$0xff]  }
   0x6   :  { %v10628_v15 = vld [vmem:[%s15349_s1 + $0x464] ss:$8 sps:$4 sm:$0xff]   ;;  %792 = vmatpush1.bf16.msra.mxu1 %v10650_v13  ;;  %v10656_v16 = vld [vmem:[%s15349_s1 + $0x310] ss:$8 sps:$4 sm:$0xff]   ;;  %v10630_v18 = vld [vmem:[%s15349_s1 + $0x460] ss:$8 sps:$4 sm:$0xff]  }
   0x7   :  { %845 = vmatpush1.bf16.msra.mxu0 %v10615_v3  ;;  %793 = vmatprep.subr.bf16.mxu1 %v10652_v14  ;;  %v10658_v17 = vld [vmem:[%s15349_s1 + $0x324] ss:$8 sps:$4 sm:$0xff]   ;;  %v10631_v19 = vld [vmem:[%s15349_s1 + $0x474] ss:$8 sps:$4 sm:$0xff]   ;;  %v10662_v20 = vld [vmem:[%s15349_s1 + $0x320] ss:$8 sps:$4 sm:$0xff]  }
   0x8   :  { %846 = vmatprep.subr.bf16.mxu0 %v10616_v4  ;;  %v10664_v21 = vld [vmem:[%s15349_s1 + $0x334] ss:$8 sps:$4 sm:$0xff]   ;;  %v10633_v22 = vld [vmem:[%s15349_s1 + $0x470] ss:$8 sps:$4 sm:$0xff]   ;;  %v10634_v23 = vld [vmem:[%s15349_s1 + $0x484] ss:$8 sps:$4 sm:$0xff]  }
   0x9   :  { %v10668_v24 = vld [vmem:[%s15349_s1 + $0x330] ss:$8 sps:$4 sm:$0xff]   ;;  %v11831_v25 = vld [vmem:[%s15350_s0 + $0x20] sm:$0xff]  ;;  %v11836_v26 = vld [vmem:[%s15350_s0 + $0x8] sm:$0xee]  ;;  %vm4046_vm4 = vcmask 1043456  }
   0xa   :  { %794 = vmatpush1.bf16.msra.mxu1 %v10656_v16  ;;  %v11841_v27 = vld [vmem:[%s15350_s0 + $0x38] sm:$0x77]  ;;  %v10670_v28 = vld [vmem:[%s15349_s1 + $0x344] ss:$8 sps:$4 sm:$0xff]   ;;  %v8565_v29 = vcombine.high %v11836_v26, %v11831_v25  ;;  %v10636_v31 = vld [vmem:[%s15349_s1 + $0x480] ss:$8 sps:$4 sm:$0xff]   ;;  %v8564_v60 = vcombine.low %v11836_v26, %v11831_v25 }
   0xb   :  { %847 = vmatpush1.bf16.msra.mxu0 %v10618_v5  ;;  %795 = vmatprep.subr.bf16.mxu1 %v10658_v17  ;;  %v8571_v30 = vcombine.high %v11841_v27, %v11841_v27  ;;  %v10637_v32 = vld [vmem:[%s15349_s1 + $0x494] ss:$8 sps:$4 sm:$0xff]   ;;  %v10677_v35 = vld [vmem:[%s15349_s1 + $0x340] ss:$8 sps:$4 sm:$0xff]   ;;  %v10639_v38 = vld [vmem:[%s15349_s1 + $0x490] ss:$8 sps:$4 sm:$0xff]   ;;  %v8570_v61 = vcombine.low %v11841_v27, %v11841_v27 }
   0xc   :  { %848 = vmatprep.subr.bf16.mxu0 %v10619_v6  ;;  %v290_v33 = vrot.slane %v8565_v29, 1  ;;  %v10680_v37 = vld [vmem:[%s15349_s1 + $0x354] ss:$8 sps:$4 sm:$0xff]   ;;  %v10640_v39 = vld [vmem:[%s15349_s1 + $0x4a4] ss:$8 sps:$4 sm:$0xff]   ;;  %v287_v2 = vrot.slane %v8564_v60, 1 }
   0xd   :  { %v11856_v34 = vrot.slane %v8571_v30, 1  ;;  %v10685_v40 = vld [vmem:[%s15349_s1 + $0x350] ss:$8 sps:$4 sm:$0xff]   ;;  %v10686_v41 = vld [vmem:[%s15349_s1 + $0x364] ss:$8 sps:$4 sm:$0xff]   ;;  %v288_v3 = vrot.slane %v8570_v61, 1 }
   0xe   :  { %796 = vmatpush1.bf16.msra.mxu1 %v10662_v20  ;;  %v10642_v42 = vld [vmem:[%s15349_s1 + $0x4a0] ss:$8 sps:$4 sm:$0xff]   ;;  %v10643_v43 = vld [vmem:[%s15349_s1 + $0x4b4] ss:$8 sps:$4 sm:$0xff]   ;;  %v10645_v46 = vld [vmem:[%s15349_s1 + $0x4b0] ss:$8 sps:$4 sm:$0xff]  }
   0xf   :  { %849 = vmatpush1.bf16.msra.mxu0 %v10621_v7  ;;  %797 = vmatprep.subr.bf16.mxu1 %v10664_v21  ;;  %v292_v36 = vsel %vm280_vm0, %v290_v33, %v11856_v34  ;;  %v10691_v44 = vld [vmem:[%s15349_s1 + $0x360] ss:$8 sps:$4 sm:$0xff]   ;;  %v10692_v45 = vld [vmem:[%s15349_s1 + $0x374] ss:$8 sps:$4 sm:$0xff]   ;;  %v10648_v47 = vld [vmem:[%s15349_s1 + $0x4c4] ss:$8 sps:$4 sm:$0xff]  }
  0x10   :  { %850 = vmatprep.subr.bf16.mxu0 %v10622_v8  ;;  %874 = vmatprep.mubr.bf16.mxu0 %v292_v36  ;;  %v10697_v48 = vld [vmem:[%s15349_s1 + $0x370] ss:$8 sps:$4 sm:$0xff]   ;;  %v10698_v49 = vld [vmem:[%s15349_s1 + $0x384] ss:$8 sps:$4 sm:$0xff]   ;;  %v10651_v50 = vld [vmem:[%s15349_s1 + $0x4c0] ss:$8 sps:$4 sm:$0xff]  }
  0x11   :  { %v10654_v51 = vld [vmem:[%s15349_s1 + $0x4d4] ss:$8 sps:$4 sm:$0xff]   ;;  %v10703_v52 = vld [vmem:[%s15349_s1 + $0x380] ss:$8 sps:$4 sm:$0xff]   ;;  %v10657_v54 = vld [vmem:[%s15349_s1 + $0x4d0] ss:$8 sps:$4 sm:$0xff]  }
  0x12   :  { %798 = vmatpush1.bf16.msra.mxu1 %v10668_v24  ;;  %v10704_v53 = vld [vmem:[%s15349_s1 + $0x394] ss:$8 sps:$4 sm:$0xff]   ;;  %v10660_v55 = vld [vmem:[%s15349_s1 + $0x4e4] ss:$8 sps:$4 sm:$0xff]   ;;  %v10709_v56 = vld [vmem:[%s15349_s1 + $0x390] ss:$8 sps:$4 sm:$0xff]  }
  0x13   :  { %851 = vmatpush1.bf16.msra.mxu0 %v10624_v9  ;;  %799 = vmatprep.subr.bf16.mxu1 %v10670_v28  ;;  %v10710_v57 = vld [vmem:[%s15349_s1 + $0x3a4] ss:$8 sps:$4 sm:$0xff]   ;;  %v10663_v58 = vld [vmem:[%s15349_s1 + $0x4e0] ss:$8 sps:$4 sm:$0xff]   ;;  %v10666_v59 = vld [vmem:[%s15349_s1 + $0x4f4] ss:$8 sps:$4 sm:$0xff]  }
  0x14   :  { %852 = vmatprep.subr.bf16.mxu0 %v10625_v10  ;;  %v10715_v62 = vld [vmem:[%s15349_s1 + $0x3a0] ss:$8 sps:$4 sm:$0xff]   ;;  %v10669_v63 = vld [vmem:[%s15349_s1 + $0x4f0] ss:$8 sps:$4 sm:$0xff]   ;;  %v10716_v0 = vld [vmem:[%s15349_s1 + $0x3b4] ss:$8 sps:$4 sm:$0xff]  }
  0x15   :  { %v10676_v1 = vld [vmem:[%s15349_s1 + $0x504] ss:$8 sps:$4 sm:$0xff]   ;;  %v10721_v4 = vld [vmem:[%s15349_s1 + $0x3b0] ss:$8 sps:$4 sm:$0xff]   ;;  %v10674_v10 = vld [vmem:[%s15349_s1 + $0x500] ss:$8 sps:$4 sm:$0xff]  }
  0x16   :  { %800 = vmatpush1.bf16.msra.mxu1 %v10677_v35  ;;  %v10722_v5 = vld [vmem:[%s15349_s1 + $0x3c4] ss:$8 sps:$4 sm:$0xff]   ;;  %v11957_v6 = vld [vmem:[%s15350_s0 + $0x18] sm:$0xff]  ;;  %v141_v8 = vld [vmem:[%s15350_s0 + $0x30] sm:$0x77]  ;;  %vm4059_vm5 = vcmask 388096  }
  0x17   :  { %853 = vmatpush1.bf16.msra.mxu0 %v10627_v12  ;;  %801 = vmatprep.subr.bf16.mxu1 %v10680_v37  ;;  %v138_v7 = vld [vmem:[%s15350_s0] sm:$0xee]  ;;  %v8569_v11 = vcombine.high %v141_v8, %v141_v8  ;;  %v289_v12 = vsel %vm280_vm0, %v287_v2, %v288_v3  ;;  %v10684_v13 = vld [vmem:[%s15349_s1 + $0x514] ss:$8 sps:$4 sm:$0xff]   ;;  %v11986_v20 = vld [vmem:[%s15350_s0 + $0x28] sm:$0xff]  ;;  %vm4290_vm6 = vcmask 1042432  }
  0x18   :  { %854 = vmatprep.subr.bf16.mxu0 %v10628_v15  ;;  %v8563_v9 = vcombine.high %v138_v7, %v11957_v6  ;;  %v10727_v15 = vld [vmem:[%s15349_s1 + $0x3c0] ss:$8 sps:$4 sm:$0xff]   ;;  %v10728_v17 = vld [vmem:[%s15349_s1 + $0x3d4] ss:$8 sps:$4 sm:$0xff]   ;;  %v10733_v24 = vld [vmem:[%s15349_s1 + $0x3d0] ss:$8 sps:$4 sm:$0xff]   ;;  %v8562_v33 = vcombine.low %v138_v7, %v11957_v6 }
  0x19   :  { %v285_v16 = vrot.slane %v8569_v11, 1  ;;  %v11991_v21 = vld [vmem:[%s15350_s0 + $0x10] sm:$0xee]  ;;  %v10734_v26 = vld [vmem:[%s15349_s1 + $0x3e4] ss:$8 sps:$4 sm:$0xff]   ;;  %vm11698_vm7 = vmmov 1  }
  0x1a   :  { %802 = vmatpush1.bf16.msra.mxu1 %v10685_v40  ;;  %v284_v14 = vrot.slane %v8563_v9, 1  ;;  %v8567_v25 = vcombine.high %v11991_v21, %v11986_v20  ;;  %v10688_v29 = vld [vmem:[%s15349_s1 + $0x520] ss:$8 sps:$4 sm:$0xff]   ;;  %v10696_v30 = vld [vmem:[%s15349_s1 + $0x534] ss:$8 sps:$4 sm:$0xff]   ;;  %v281_v40 = vrot.slane %v8562_v33, 1  ;;  %vm13780_vm8 = vmpackc.low %vm4290_vm6, %vm11698_vm7 }
  0x1b   :  { %855 = vmatpush1.bf16.msra.mxu0 %v10630_v18  ;;  %803 = vmatprep.subr.bf16.mxu1 %v10686_v41  ;;  %v10682_v18 = vld [vmem:[%s15349_s1 + $0x510] ss:$8 sps:$4 sm:$0xff]   ;;  %v10740_v35 = vld [vmem:[%s15349_s1 + $0x3f4] ss:$8 sps:$4 sm:$0xff]   ;;  %v10768_v7 = vld [vmem:[%s15349_s1 + $0x4] ss:$8 sps:$4 sm:$0xff]  }
  0x1c   :  { %856 = vmatprep.subr.bf16.mxu0 %v10631_v19  ;;  %v286_v19 = vsel %vm280_vm0, %v284_v14, %v285_v16  ;;  %v296_v28 = vrot.slane %v8567_v25, 1  ;;  %v10694_v37 = vld [vmem:[%s15349_s1 + $0x530] ss:$8 sps:$4 sm:$0xff]   ;;  %v10755_v60 = vld [vmem:[%s15349_s1 + $0x5d4] ss:$8 sps:$4 sm:$0xff]   ;;  %vm4286_vm9 = vcmask 89088  }
  0x1d   :  { %823 = vmatprep.mubr.bf16.mxu1 %v286_v19  ;;  %v10753_v61 = vld [vmem:[%s15349_s1 + $0x5d0] ss:$8 sps:$4 sm:$0xff]   ;;  %v10772_v14 = vld [vmem:[%s15349_s1 + $0x20] ss:$8 sps:$4 sm:$0xff]   ;;  %vm4512_vm10 = vcmask 390148   ;;  %vm4519_vm11 = vcmask 386048  }
  0x1e   :  { %804 = vmatpush1.bf16.msra.mxu1 %v10691_v44  ;;  %v10769_v11 = vld [vmem:[%s15349_s1 + $0x10] ss:$8 sps:$4 sm:$0xff]   ;;  %v10778_v19 = vld [vmem:[%s15349_s1 + $0x40] ss:$8 sps:$4 sm:$0xff]   ;;  %vm6512_vm12 = vcmask 785408   ;;  %vm11702_vm13 = vmmov 0  }
  0x1f   :  { %857 = vmatpush1.bf16.msra.mxu0 %v10633_v22  ;;  %805 = vmatprep.subr.bf16.mxu1 %v10692_v45  ;;  %v11996_v22 = vld [vmem:[%s15350_s0 + $0x40] sm:$0x77]  ;;  %v10706_v45 = vld [vmem:[%s15349_s1 + $0x550] ss:$8 sps:$4 sm:$0xff]   ;;  %vm7339_vm14 = vcmask 781312   ;;  %vm7356_vm15 = vcmask 1041408  }
  0x20   :  { %858 = vmatprep.subr.bf16.mxu0 %v10634_v23  ;;  %v10690_v23 = vld [vmem:[%s15349_s1 + $0x524] ss:$8 sps:$4 sm:$0xff]   ;;  %v8573_v27 = vcombine.high %v11996_v22, %v11996_v22  ;;  %v8572_v2 = vcombine.low %v11996_v22, %v11996_v22  ;;  %v10787_v25 = vld [vmem:[%s15349_s1 + $0x70] ss:$8 sps:$4 sm:$0xff]  }
  0x21   :  { %v10786_v22 = vld [vmem:[%s15349_s1 + $0x64] ss:$8 sps:$4 sm:$0xff]   ;;  %v10799_v33 = vld [vmem:[%s15349_s1 + $0xb0] ss:$8 sps:$4 sm:$0xff]  }
  0x22   :  { %806 = vmatpush1.bf16.msra.mxu1 %v10697_v48  ;;  %v10720_v48 = vld [vmem:[%s15349_s1 + $0x574] ss:$8 sps:$4 sm:$0xff]  }
  0x23   :  { %859 = vmatpush1.bf16.msra.mxu0 %v10636_v31  ;;  %807 = vmatprep.subr.bf16.mxu1 %v10698_v49  ;;  %v12018_v31 = vrot.slane %v8573_v27, 1  ;;  %v10718_v49 = vld [vmem:[%s15349_s1 + $0x570] ss:$8 sps:$4 sm:$0xff]   ;;  %v10790_v27 = vld [vmem:[%s15349_s1 + $0x80] ss:$8 sps:$4 sm:$0xff]  }
  0x24   :  { %860 = vmatprep.subr.bf16.mxu0 %v10637_v32  ;;  %v10739_v32 = vld [vmem:[%s15349_s1 + $0x3e0] ss:$8 sps:$4 sm:$0xff]  }
  0x25   :  { %v298_v36 = vsel %vm280_vm0, %v296_v28, %v12018_v31  ;;  %v10795_v28 = vld [vmem:[%s15349_s1 + $0x94] ss:$8 sps:$4 sm:$0xff]  }
  0x26   :  { %808 = vmatpush1.bf16.msra.mxu1 %v10703_v52  ;;  %v10732_v52 = vld [vmem:[%s15349_s1 + $0x594] ss:$8 sps:$4 sm:$0xff]  }
  0x27   :  { %861 = vmatpush1.bf16.msra.mxu0 %v10639_v38  ;;  %809 = vmatprep.subr.bf16.mxu1 %v10704_v53  ;;  %v10702_v38 = vld [vmem:[%s15349_s1 + $0x544] ss:$8 sps:$4 sm:$0xff]   ;;  %v10730_v53 = vld [vmem:[%s15349_s1 + $0x590] ss:$8 sps:$4 sm:$0xff]  }
  0x28   :  { %862 = vmatprep.subr.bf16.mxu0 %v10640_v39  ;;  %v10745_v39 = vld [vmem:[%s15349_s1 + $0x3f0] ss:$8 sps:$4 sm:$0xff]  }
  0x2a   :  { %810 = vmatpush1.bf16.msra.mxu1 %v10709_v56  ;;  %v10744_v56 = vld [vmem:[%s15349_s1 + $0x5b4] ss:$8 sps:$4 sm:$0xff]  }
  0x2b   :  { %863 = vmatpush1.bf16.msra.mxu0 %v10642_v42  ;;  %811 = vmatprep.subr.bf16.mxu1 %v10710_v57  ;;  %v10700_v42 = vld [vmem:[%s15349_s1 + $0x540] ss:$8 sps:$4 sm:$0xff]   ;;  %v10742_v57 = vld [vmem:[%s15349_s1 + $0x5b0] ss:$8 sps:$4 sm:$0xff]  }
  0x2c   :  { %864 = vmatprep.subr.bf16.mxu0 %v10643_v43  ;;  %v10708_v43 = vld [vmem:[%s15349_s1 + $0x554] ss:$8 sps:$4 sm:$0xff]  }
  0x2e   :  { %812 = vmatpush1.bf16.msra.mxu1 %v10715_v62  ;;  %v10758_v62 = vld [vmem:[%s15349_s1 + $0x5e4] ss:$8 sps:$4 sm:$0xff]  }
  0x2f   :  { %865 = vmatpush1.bf16.msra.mxu0 %v10645_v46  ;;  %813 = vmatprep.subr.bf16.mxu1 %v10716_v0  ;;  %v10714_v46 = vld [vmem:[%s15349_s1 + $0x564] ss:$8 sps:$4 sm:$0xff]   ;;  %v10761_v0 = vld [vmem:[%s15349_s1 + $0x5f4] ss:$8 sps:$4 sm:$0xff]  }
  0x30   :  { %866 = vmatprep.subr.bf16.mxu0 %v10648_v47  ;;  %v10712_v47 = vld [vmem:[%s15349_s1 + $0x560] ss:$8 sps:$4 sm:$0xff]  }
  0x32   :  { %814 = vmatpush1.bf16.msra.mxu1 %v10721_v4 }
  0x33   :  { %867 = vmatpush1.bf16.msra.mxu0 %v10651_v50  ;;  %815 = vmatprep.subr.bf16.mxu1 %v10722_v5  ;;  %v10726_v50 = vld [vmem:[%s15349_s1 + $0x584] ss:$8 sps:$4 sm:$0xff]   ;;  %v294_v5 = vrot.slane %v8572_v2, 1  ;;  %v10847_v2 = vld [vmem:[%s15349_s1 + $0x194] ss:$8 sps:$4 sm:$0xff]  }
  0x34   :  { %868 = vmatprep.subr.bf16.mxu0 %v10654_v51  ;;  %v10724_v51 = vld [vmem:[%s15349_s1 + $0x580] ss:$8 sps:$4 sm:$0xff]  }
  0x36   :  { %816 = vmatpush1.bf16.msra.mxu1 %v10727_v15 }
  0x37   :  { %869 = vmatpush1.bf16.msra.mxu0 %v10657_v54  ;;  %817 = vmatprep.subr.bf16.mxu1 %v10728_v17  ;;  %v10738_v54 = vld [vmem:[%s15349_s1 + $0x5a4] ss:$8 sps:$4 sm:$0xff]   ;;  %v10775_v17 = vld [vmem:[%s15349_s1 + $0x30] ss:$8 sps:$4 sm:$0xff]  }
  0x38   :  { %870 = vmatprep.subr.bf16.mxu0 %v10660_v55  ;;  %v10736_v55 = vld [vmem:[%s15349_s1 + $0x5a0] ss:$8 sps:$4 sm:$0xff]  }
  0x3a   :  { %818 = vmatpush1.bf16.msra.mxu1 %v10733_v24  ;;  %v10789_v24 = vld [vmem:[%s15349_s1 + $0x74] ss:$8 sps:$4 sm:$0xff]  }
  0x3b   :  { %871 = vmatpush1.bf16.msra.mxu0 %v10663_v58  ;;  %819 = vmatprep.subr.bf16.mxu1 %v10734_v26  ;;  %v10752_v58 = vld [vmem:[%s15349_s1 + $0x5c4] ss:$8 sps:$4 sm:$0xff]  }
  0x3c   :  { %872 = vmatprep.subr.bf16.mxu0 %v10666_v59  ;;  %v10750_v59 = vld [vmem:[%s15349_s1 + $0x5c0] ss:$8 sps:$4 sm:$0xff]   ;;  %v10792_v26 = vld [vmem:[%s15349_s1 + $0x84] ss:$8 sps:$4 sm:$0xff]  }
  0x3e   :  { %820 = vmatpush1.bf16.msra.mxu1 %v10739_v32  ;;  %v10801_v32 = vld [vmem:[%s15349_s1 + $0xb4] ss:$8 sps:$4 sm:$0xff]  }
  0x3f   :  { %873 = vmatpush1.bf16.msra.mxu0 %v10669_v63  ;;  %821 = vmatprep.subr.bf16.mxu1 %v10740_v35  ;;  %v10756_v63 = vld [vmem:[%s15349_s1 + $0x5e0] ss:$8 sps:$4 sm:$0xff]  }
  0x40   :  { %893 = vmatprep.subr.bf16.mxu0 %v10676_v1  ;;  %v8566_v1 = vcombine.low %v11991_v21, %v11986_v20  ;;  %v10783_v20 = vld [vmem:[%s15349_s1 + $0x54] ss:$8 sps:$4 sm:$0xff]   ;;  %v10781_v21 = vld [vmem:[%s15349_s1 + $0x50] ss:$8 sps:$4 sm:$0xff]   ;;  %v10802_v35 = vld [vmem:[%s15349_s1 + $0xc0] ss:$8 sps:$4 sm:$0xff]  }
  0x42   :  { %875 = vmatmul.mubr.bf16.vlgmr.msra.gmra.mrb[0].mxu0 %v289_v12  ;;  %822 = vmatpush1.bf16.msra.mxu1 %v10745_v39  ;;  %v293_v4 = vrot.slane %v8566_v1, 1  ;;  %v10774_v12 = vld [vmem:[%s15349_s1 + $0x24] ss:$8 sps:$4 sm:$0xff]   ;;  %v10808_v39 = vld [vmem:[%s15349_s1 + $0xe0] ss:$8 sps:$4 sm:$0xff]  }
  0x43   :  { %894 = vmatpush1.bf16.msra.mxu0 %v10674_v10  ;;  %884 = vmatprep.mubr.bf16.mxu0 %v11856_v34  ;;  %v8568_v34 = vcombine.low %v141_v8, %v141_v8  ;;  %v10766_v8 = vld [vmem:[%s15349_s1] ss:$8 sps:$4 sm:$0xff]   ;;  %v10771_v10 = vld [vmem:[%s15349_s1 + $0x14] ss:$8 sps:$4 sm:$0xff]  }
  0x44   :  { %895 = vmatprep.subr.bf16.mxu0 %v10684_v13  ;;  %v295_v9 = vsel %vm280_vm0, %v293_v4, %v294_v5  ;;  %v12132_v13 = vld [vmem:[%s15350_s0] sm:$0xff] }
  0x45   :  { %v282_v41 = vrot.slane %v8568_v34, 1  ;;  %v8671_v15 = vcombine.high %v12132_v13, %v11957_v6  ;;  %v10804_v34 = vld [vmem:[%s15349_s1 + $0xc4] ss:$8 sps:$4 sm:$0xff]   ;;  %v10842_v1 = vld [vmem:[%s15349_s1 + $0x180] ss:$8 sps:$4 sm:$0xff]  }
  0x46   :  { %v10850_v4 = vld [vmem:[%s15349_s1 + $0x1a4] ss:$8 sps:$4 sm:$0xff]  }
  0x47   :  { %896 = vmatpush1.bf16.msra.mxu0 %v10682_v18  ;;  %v283_v44 = vsel %vm280_vm0, %v281_v40, %v282_v41  ;;  %v10780_v18 = vld [vmem:[%s15349_s1 + $0x44] ss:$8 sps:$4 sm:$0xff]   ;;  %v10813_v40 = vld [vmem:[%s15349_s1 + $0xf4] ss:$8 sps:$4 sm:$0xff]  }
  0x48   :  { %897 = vmatprep.subr.bf16.mxu0 %v10690_v23  ;;  %824 = vmatmul.mubr.bf16.vlgmr.msra.gmra.mrb[0].mxu1 %v283_v44  ;;  %v10784_v23 = vld [vmem:[%s15349_s1 + $0x60] ss:$8 sps:$4 sm:$0xff]   ;;  %v8670_v44 = vcombine.low %v12132_v13, %v11957_v6  ;;  %v10826_v6 = vld [vmem:[%s15349_s1 + $0x124] ss:$8 sps:$4 sm:$0xff]  }
  0x49   :  { %833 = vmatprep.mubr.bf16.mxu1 %v285_v16  ;;  %v10777_v16 = vld [vmem:[%s15349_s1 + $0x34] ss:$8 sps:$4 sm:$0xff]   ;;  %v10862_v13 = vld [vmem:[%s15349_s1 + $0x1e4] ss:$8 sps:$4 sm:$0xff]  }
  0x4a   :  { %885 = vmatmul.mubr.bf16.gmra.mrb[4].mxu0 %v288_v3  ;;  %v10759_v3 = vld [vmem:[%s15349_s1 + $0x5f0] ss:$8 sps:$4 sm:$0xff]  }
  0x4b   :  { %898 = vmatpush1.bf16.msra.mxu0 %v10688_v29  ;;  %925 = vmatprep.mubr.bf16.mxu0 %v298_v36  ;;  %v10793_v29 = vld [vmem:[%s15349_s1 + $0x90] ss:$8 sps:$4 sm:$0xff]   ;;  %v10807_v36 = vld [vmem:[%s15349_s1 + $0xd4] ss:$8 sps:$4 sm:$0xff]  }
  0x4c   :  { %899 = vmatprep.subr.bf16.mxu0 %v10696_v30  ;;  %v10798_v30 = vld [vmem:[%s15349_s1 + $0xa4] ss:$8 sps:$4 sm:$0xff]  }
  0x4f   :  { %900 = vmatpush1.bf16.msra.mxu0 %v10694_v37  ;;  %v10805_v37 = vld [vmem:[%s15349_s1 + $0xd0] ss:$8 sps:$4 sm:$0xff]  }
  0x50   :  { %901 = vmatprep.subr.bf16.mxu0 %v10702_v38  ;;  %834 = vmatmul.mubr.bf16.gmra.mrb[4].mxu1 %v282_v41  ;;  %v10810_v38 = vld [vmem:[%s15349_s1 + $0xe4] ss:$8 sps:$4 sm:$0xff]   ;;  %v10811_v41 = vld [vmem:[%s15349_s1 + $0xf0] ss:$8 sps:$4 sm:$0xff]  }
  0x53   :  { %902 = vmatpush1.bf16.msra.mxu0 %v10700_v42  ;;  %v10818_v42 = vld [vmem:[%s15349_s1 + $0x104] ss:$8 sps:$4 sm:$0xff]  }
  0x54   :  { %903 = vmatprep.subr.bf16.mxu0 %v10708_v43  ;;  %v39_v43 = vld [vmem:[%s15350_s0 + $0x30] sm:$0x33] }
  0x57   :  { %904 = vmatpush1.bf16.msra.mxu0 %v10706_v45  ;;  %v10816_v45 = vld [vmem:[%s15349_s1 + $0x100] ss:$8 sps:$4 sm:$0xff]  }
  0x58   :  { %905 = vmatprep.subr.bf16.mxu0 %v10714_v46  ;;  %v8677_v46 = vcombine.high %v39_v43, %v39_v43 }
  0x5b   :  { %906 = vmatpush1.bf16.msra.mxu0 %v10712_v47  ;;  %v10821_v47 = vld [vmem:[%s15349_s1 + $0x114] ss:$8 sps:$4 sm:$0xff]  }
  0x5c   :  { %907 = vmatprep.subr.bf16.mxu0 %v10720_v48  ;;  %v10819_v48 = vld [vmem:[%s15349_s1 + $0x110] ss:$8 sps:$4 sm:$0xff]  }
  0x5f   :  { %908 = vmatpush1.bf16.msra.mxu0 %v10718_v49  ;;  %v12240_v49 = vld [vmem:[%s15350_s0 + $0x8] sm:$0xff] }
  0x60   :  { %909 = vmatprep.subr.bf16.mxu0 %v10726_v50  ;;  %v8676_v50 = vcombine.low %v39_v43, %v39_v43  ;;  %v10894_v43 = vld [vmem:[%s15349_s1 + $0x280] ss:$8 sps:$4 sm:$0xff]  }
  0x63   :  { %910 = vmatpush1.bf16.msra.mxu0 %v10724_v51  ;;  %v10824_v51 = vld [vmem:[%s15349_s1 + $0x120] ss:$8 sps:$4 sm:$0xff]  }
  0x64   :  { %911 = vmatprep.subr.bf16.mxu0 %v10732_v52  ;;  %v12248_v52 = vld [vmem:[%s15350_s0 + $0x20] sm:$0xff] }
  0x67   :  { %912 = vmatpush1.bf16.msra.mxu0 %v10730_v53  ;;  %v8673_v53 = vcombine.high %v12240_v49, %v12248_v52 }
  0x68   :  { %913 = vmatprep.subr.bf16.mxu0 %v10738_v54  ;;  %v10829_v54 = vld [vmem:[%s15349_s1 + $0x134] ss:$8 sps:$4 sm:$0xff]  }
  0x6b   :  { %914 = vmatpush1.bf16.msra.mxu0 %v10736_v55  ;;  %v10827_v55 = vld [vmem:[%s15349_s1 + $0x130] ss:$8 sps:$4 sm:$0xff]  }
  0x6c   :  { %915 = vmatprep.subr.bf16.mxu0 %v10744_v56  ;;  %v10832_v56 = vld [vmem:[%s15349_s1 + $0x144] ss:$8 sps:$4 sm:$0xff]  }
  0x6f   :  { %916 = vmatpush1.bf16.msra.mxu0 %v10742_v57  ;;  %v10830_v57 = vld [vmem:[%s15349_s1 + $0x140] ss:$8 sps:$4 sm:$0xff]  }
  0x70   :  { %917 = vmatprep.subr.bf16.mxu0 %v10752_v58  ;;  %v10835_v58 = vld [vmem:[%s15349_s1 + $0x154] ss:$8 sps:$4 sm:$0xff]  }
  0x73   :  { %918 = vmatpush1.bf16.msra.mxu0 %v10750_v59  ;;  %v10833_v59 = vld [vmem:[%s15349_s1 + $0x150] ss:$8 sps:$4 sm:$0xff]  }
  0x74   :  { %919 = vmatprep.subr.bf16.mxu0 %v10755_v60  ;;  %v10838_v60 = vld [vmem:[%s15349_s1 + $0x164] ss:$8 sps:$4 sm:$0xff]  }
  0x77   :  { %920 = vmatpush1.bf16.msra.mxu0 %v10753_v61  ;;  %v10836_v61 = vld [vmem:[%s15349_s1 + $0x160] ss:$8 sps:$4 sm:$0xff]  }
  0x78   :  { %921 = vmatprep.subr.bf16.mxu0 %v10758_v62  ;;  %v10841_v62 = vld [vmem:[%s15349_s1 + $0x174] ss:$8 sps:$4 sm:$0xff]  }
  0x7b   :  { %922 = vmatpush1.bf16.msra.mxu0 %v10756_v63  ;;  %v10839_v63 = vld [vmem:[%s15349_s1 + $0x170] ss:$8 sps:$4 sm:$0xff]  }
  0x7c   :  { %923 = vmatprep.subr.bf16.mxu0 %v10761_v0  ;;  %v10844_v0 = vld [vmem:[%s15349_s1 + $0x184] ss:$8 sps:$4 sm:$0xff]  }
  0x7f   :  { %924 = vmatpush1.bf16.msra.mxu0 %v10759_v3  ;;  %v10845_v3 = vld [vmem:[%s15349_s1 + $0x190] ss:$8 sps:$4 sm:$0xff]  }
  0x80   :  { %1466 = vmatprep.subr.bf16.mxu0 %v10768_v7  ;;  %v10853_v7 = vld [vmem:[%s15349_s1 + $0x1b4] ss:$8 sps:$4 sm:$0xff]  }
  0x82   :  { %926 = vmatmul.mubr.bf16.vlgmr.msra.gmra.mrb[0].mxu0 %v295_v9  ;;  %v10856_v9 = vld [vmem:[%s15349_s1 + $0x1c4] ss:$8 sps:$4 sm:$0xff]  }
  0x83   :  { %1467 = vmatpush1.bf16.msra.mxu0 %v10766_v8  ;;  %935 = vmatprep.mubr.bf16.mxu0 %v12018_v31  ;;  %v10796_v31 = vld [vmem:[%s15349_s1 + $0xa0] ss:$8 sps:$4 sm:$0xff]   ;;  %v10851_v8 = vld [vmem:[%s15349_s1 + $0x1b0] ss:$8 sps:$4 sm:$0xff]  }
  0x84   :  { %1468 = vmatprep.subr.bf16.mxu0 %v10771_v10  ;;  %v10854_v10 = vld [vmem:[%s15349_s1 + $0x1c0] ss:$8 sps:$4 sm:$0xff]  }
  0x87   :  { %1469 = vmatpush1.bf16.msra.mxu0 %v10769_v11  ;;  %v10859_v11 = vld [vmem:[%s15349_s1 + $0x1d4] ss:$8 sps:$4 sm:$0xff]  }
  0x88   :  { %1470 = vmatprep.subr.bf16.mxu0 %v10774_v12  ;;  %v10857_v12 = vld [vmem:[%s15349_s1 + $0x1d0] ss:$8 sps:$4 sm:$0xff]  }
  0x8a   :  { %936 = vmatmul.mubr.bf16.gmra.mrb[8].mxu0 %v294_v5  ;;  %v10848_v5 = vld [vmem:[%s15349_s1 + $0x1a0] ss:$8 sps:$4 sm:$0xff]  }
  0x8b   :  { %1471 = vmatpush1.bf16.msra.mxu0 %v10772_v14  ;;  %1498 = vmatprep.mubr.bf16.mxu0 %v8671_v15  ;;  %v10860_v14 = vld [vmem:[%s15349_s1 + $0x1e0] ss:$8 sps:$4 sm:$0xff]   ;;  %v10865_v15 = vld [vmem:[%s15349_s1 + $0x1f4] ss:$8 sps:$4 sm:$0xff]  }
  0x8c   :  { %1472 = vmatprep.subr.bf16.mxu0 %v10777_v16  ;;  %v10863_v16 = vld [vmem:[%s15349_s1 + $0x1f0] ss:$8 sps:$4 sm:$0xff]  }
  0x8f   :  { %1473 = vmatpush1.bf16.msra.mxu0 %v10775_v17  ;;  %v10870_v17 = vld [vmem:[%s15349_s1 + $0x204] ss:$8 sps:$4 sm:$0xff]  }
  0x90   :  { %1474 = vmatprep.subr.bf16.mxu0 %v10780_v18  ;;  %v40_v18 = vld [vmem:[%s15350_s0 + $0x38] sm:$0x33] }
  0x93   :  { %1475 = vmatpush1.bf16.msra.mxu0 %v10778_v19  ;;  %v8672_v19 = vcombine.low %v12240_v49, %v12248_v52  ;;  %v10900_v49 = vld [vmem:[%s15349_s1 + $0x2a0] ss:$8 sps:$4 sm:$0xff]  }
  0x94   :  { %1476 = vmatprep.subr.bf16.mxu0 %v10783_v20  ;;  %v10868_v20 = vld [vmem:[%s15349_s1 + $0x200] ss:$8 sps:$4 sm:$0xff]  }
  0x97   :  { %1477 = vmatpush1.bf16.msra.mxu0 %v10781_v21  ;;  %v8679_v21 = vcombine.high %v40_v18, %v40_v18 }
  0x98   :  { %1478 = vmatprep.subr.bf16.mxu0 %v10786_v22  ;;  %v10873_v22 = vld [vmem:[%s15349_s1 + $0x214] ss:$8 sps:$4 sm:$0xff]  }
  0x9b   :  { %1479 = vmatpush1.bf16.msra.mxu0 %v10784_v23  ;;  %v10871_v23 = vld [vmem:[%s15349_s1 + $0x210] ss:$8 sps:$4 sm:$0xff]  }
  0x9c   :  { %1480 = vmatprep.subr.bf16.mxu0 %v10789_v24  ;;  %v10878_v24 = vld [vmem:[%s15349_s1 + $0x224] ss:$8 sps:$4 sm:$0xff]  }
  0x9f   :  { %1481 = vmatpush1.bf16.msra.mxu0 %v10787_v25  ;;  %v12353_v25 = vld [vmem:[%s15350_s0 + $0x10] sm:$0xff] }
  0xa0   :  { %1482 = vmatprep.subr.bf16.mxu0 %v10792_v26  ;;  %v8678_v26 = vcombine.low %v40_v18, %v40_v18  ;;  %v10923_v18 = vld [vmem:[%s15349_s1 + $0x610] ss:$8 sps:$4 sm:$0xff]  }
  0xa3   :  { %1483 = vmatpush1.bf16.msra.mxu0 %v10790_v27  ;;  %v10876_v27 = vld [vmem:[%s15349_s1 + $0x220] ss:$8 sps:$4 sm:$0xff]  }
  0xa4   :  { %1484 = vmatprep.subr.bf16.mxu0 %v10795_v28  ;;  %v12361_v28 = vld [vmem:[%s15350_s0 + $0x28] sm:$0xff] }
  0xa7   :  { %1485 = vmatpush1.bf16.msra.mxu0 %v10793_v29  ;;  %v8675_v29 = vcombine.high %v12353_v25, %v12361_v28 }
  0xa8   :  { %1486 = vmatprep.subr.bf16.mxu0 %v10798_v30  ;;  %v10881_v30 = vld [vmem:[%s15349_s1 + $0x234] ss:$8 sps:$4 sm:$0xff]  }
  0xab   :  { %1487 = vmatpush1.bf16.msra.mxu0 %v10796_v31  ;;  %v10879_v31 = vld [vmem:[%s15349_s1 + $0x230] ss:$8 sps:$4 sm:$0xff]  }
  0xac   :  { %1488 = vmatprep.subr.bf16.mxu0 %v10801_v32  ;;  %v10884_v32 = vld [vmem:[%s15349_s1 + $0x244] ss:$8 sps:$4 sm:$0xff]  }
  0xaf   :  { %1489 = vmatpush1.bf16.msra.mxu0 %v10799_v33  ;;  %v10882_v33 = vld [vmem:[%s15349_s1 + $0x240] ss:$8 sps:$4 sm:$0xff]  }
  0xb0   :  { %1490 = vmatprep.subr.bf16.mxu0 %v10804_v34  ;;  %v10887_v34 = vld [vmem:[%s15349_s1 + $0x254] ss:$8 sps:$4 sm:$0xff]  }
  0xb3   :  { %1491 = vmatpush1.bf16.msra.mxu0 %v10802_v35  ;;  %v10885_v35 = vld [vmem:[%s15349_s1 + $0x250] ss:$8 sps:$4 sm:$0xff]  }
  0xb4   :  { %1492 = vmatprep.subr.bf16.mxu0 %v10807_v36  ;;  %v10890_v36 = vld [vmem:[%s15349_s1 + $0x264] ss:$8 sps:$4 sm:$0xff]  }
  0xb7   :  { %1493 = vmatpush1.bf16.msra.mxu0 %v10805_v37  ;;  %v10888_v37 = vld [vmem:[%s15349_s1 + $0x260] ss:$8 sps:$4 sm:$0xff]  }
  0xb8   :  { %1494 = vmatprep.subr.bf16.mxu0 %v10810_v38  ;;  %v10893_v38 = vld [vmem:[%s15349_s1 + $0x274] ss:$8 sps:$4 sm:$0xff]  }
  0xbb   :  { %1495 = vmatpush1.bf16.msra.mxu0 %v10808_v39  ;;  %v10891_v39 = vld [vmem:[%s15349_s1 + $0x270] ss:$8 sps:$4 sm:$0xff]  }
  0xbc   :  { %1496 = vmatprep.subr.bf16.mxu0 %v10813_v40  ;;  %v10896_v40 = vld [vmem:[%s15349_s1 + $0x284] ss:$8 sps:$4 sm:$0xff]  }
  0xbf   :  { %1497 = vmatpush1.bf16.msra.mxu0 %v10811_v41 }
  0xc0   :  { %1517 = vmatprep.subr.bf16.mxu0 %v10818_v42 }
  0xc2   :  { %1499 = vmatmul.mubr.bf16.vlgmr.msra.gmra.mrb[0].mxu0 %v8670_v44 }
  0xc3   :  { %1518 = vmatpush1.bf16.msra.mxu0 %v10816_v45  ;;  %1508 = vmatprep.mubr.bf16.mxu0 %v8677_v46  ;;  %v10899_v45 = vld [vmem:[%s15349_s1 + $0x294] ss:$8 sps:$4 sm:$0xff]  }
  0xc4   :  { %1519 = vmatprep.subr.bf16.mxu0 %v10821_v47  ;;  %v10897_v47 = vld [vmem:[%s15349_s1 + $0x290] ss:$8 sps:$4 sm:$0xff]  }
  0xc7   :  { %1520 = vmatpush1.bf16.msra.mxu0 %v10819_v48  ;;  %v10902_v48 = vld [vmem:[%s15349_s1 + $0x2a4] ss:$8 sps:$4 sm:$0xff]  }
  0xc8   :  { %1521 = vmatprep.subr.bf16.mxu0 %v10826_v6 }
  0xca   :  { %1509 = vmatmul.mubr.bf16.gmra.mrb[12].mxu0 %v8676_v50 }
  0xcb   :  { %1522 = vmatpush1.bf16.msra.mxu0 %v10824_v51  ;;  %1549 = vmatprep.mubr.bf16.mxu0 %v8673_v53  ;;  %v10905_v51 = vld [vmem:[%s15349_s1 + $0x2b4] ss:$8 sps:$4 sm:$0xff]  }
  0xcc   :  { %1523 = vmatprep.subr.bf16.mxu0 %v10829_v54 }
  0xcf   :  { %1524 = vmatpush1.bf16.msra.mxu0 %v10827_v55  ;;  %v10903_v55 = vld [vmem:[%s15349_s1 + $0x2b0] ss:$8 sps:$4 sm:$0xff]  }
  0xd0   :  { %1525 = vmatprep.subr.bf16.mxu0 %v10832_v56  ;;  %v10908_v56 = vld [vmem:[%s15349_s1 + $0x2c4] ss:$8 sps:$4 sm:$0xff]  }
  0xd3   :  { %1526 = vmatpush1.bf16.msra.mxu0 %v10830_v57 }
  0xd4   :  { %1527 = vmatprep.subr.bf16.mxu0 %v10835_v58  ;;  %v10906_v58 = vld [vmem:[%s15349_s1 + $0x2c0] ss:$8 sps:$4 sm:$0xff]  }
  0xd7   :  { %1528 = vmatpush1.bf16.msra.mxu0 %v10833_v59 }
  0xd8   :  { %1529 = vmatprep.subr.bf16.mxu0 %v10838_v60 }
  0xdb   :  { %1530 = vmatpush1.bf16.msra.mxu0 %v10836_v61  ;;  %v10911_v61 = vld [vmem:[%s15349_s1 + $0x2d4] ss:$8 sps:$4 sm:$0xff]  }
  0xdc   :  { %1531 = vmatprep.subr.bf16.mxu0 %v10841_v62 }
  0xdf   :  { %1532 = vmatpush1.bf16.msra.mxu0 %v10839_v63 }
  0xe0   :  { %1533 = vmatprep.subr.bf16.mxu0 %v10844_v0 }
  0xe3   :  { %1534 = vmatpush1.bf16.msra.mxu0 %v10842_v1  ;;  %v10909_v1 = vld [vmem:[%s15349_s1 + $0x2d0] ss:$8 sps:$4 sm:$0xff]  }
  0xe4   :  { %1535 = vmatprep.subr.bf16.mxu0 %v10847_v2  ;;  %v10914_v2 = vld [vmem:[%s15349_s1 + $0x2e4] ss:$8 sps:$4 sm:$0xff]  }
  0xe7   :  { %1536 = vmatpush1.bf16.msra.mxu0 %v10845_v3  ;;  %v10912_v3 = vld [vmem:[%s15349_s1 + $0x2e0] ss:$8 sps:$4 sm:$0xff]  }
  0xe8   :  { %1537 = vmatprep.subr.bf16.mxu0 %v10850_v4  ;;  %v10917_v4 = vld [vmem:[%s15349_s1 + $0x2f4] ss:$8 sps:$4 sm:$0xff]  }
  0xeb   :  { %1538 = vmatpush1.bf16.msra.mxu0 %v10848_v5  ;;  %v10915_v5 = vld [vmem:[%s15349_s1 + $0x2f0] ss:$8 sps:$4 sm:$0xff]  }
  0xec   :  { %1539 = vmatprep.subr.bf16.mxu0 %v10853_v7  ;;  %v10922_v7 = vld [vmem:[%s15349_s1 + $0x604] ss:$8 sps:$4 sm:$0xff]  }
  0xef   :  { %1540 = vmatpush1.bf16.msra.mxu0 %v10851_v8  ;;  %v41_v8 = vld [vmem:[%s15350_s0 + $0x40] sm:$0x33] }
  0xf0   :  { %1541 = vmatprep.subr.bf16.mxu0 %v10856_v9  ;;  %v12464_v9 = vld [vmem:[%s15350_s0] sm:$0xcc] }
  0xf3   :  { %1542 = vmatpush1.bf16.msra.mxu0 %v10854_v10  ;;  %v12469_v10 = vld [vmem:[%s15350_s0 + $0x30] sm:$0xff] }
  0xf4   :  { %1543 = vmatprep.subr.bf16.mxu0 %v10859_v11  ;;  %v8674_v11 = vcombine.low %v12353_v25, %v12361_v28 }
  0xf7   :  { %1544 = vmatpush1.bf16.msra.mxu0 %v10857_v12  ;;  %v10920_v12 = vld [vmem:[%s15349_s1 + $0x600] ss:$8 sps:$4 sm:$0xff]  }
  0xf8   :  { %1545 = vmatprep.subr.bf16.mxu0 %v10862_v13  ;;  %v8681_v13 = vcombine.high %v41_v8, %v41_v8 }
  0xfb   :  { %1546 = vmatpush1.bf16.msra.mxu0 %v10860_v14  ;;  %v10925_v14 = vld [vmem:[%s15349_s1 + $0x614] ss:$8 sps:$4 sm:$0xff]  }
  0xfc   :  { %1547 = vmatprep.subr.bf16.mxu0 %v10865_v15  ;;  %v12482_v15 = vld [vmem:[%s15350_s0 + $0x18] sm:$0xff] }
  0xff   :  { %1548 = vmatpush1.bf16.msra.mxu0 %v10863_v16  ;;  %v8875_v16 = vcombine.high %v12464_v9, %v12482_v15 }
 0x100   :  { %1568 = vmatprep.subr.bf16.mxu0 %v10870_v17  ;;  %v8881_v17 = vcombine.high %v12469_v10, %v12469_v10 }
 0x102   :  { %1550 = vmatmul.mubr.bf16.vlgmr.msra.gmra.mrb[0].mxu0 %v8672_v19  ;;  %v10930_v19 = vld [vmem:[%s15349_s1 + $0x624] ss:$8 sps:$4 sm:$0xff]  }
 0x103   :  { %1569 = vmatpush1.bf16.msra.mxu0 %v10868_v20  ;;  %1559 = vmatprep.mubr.bf16.mxu0 %v8679_v21  ;;  %v1756_v20 = vrot.slane %v8875_v16, 2  ;;  %v12494_v21 = vrot.slane %v8881_v17, 2  ;;  %v10980_v16 = vld [vmem:[%s15349_s1 + $0x720] ss:$8 sps:$4 sm:$0xff]   ;;  %v10985_v17 = vld [vmem:[%s15349_s1 + $0x734] ss:$8 sps:$4 sm:$0xff]  }
 0x104   :  { %1570 = vmatprep.subr.bf16.mxu0 %v10873_v22  ;;  %v8680_v22 = vcombine.low %v41_v8, %v41_v8  ;;  %v10979_v8 = vld [vmem:[%s15349_s1 + $0x714] ss:$8 sps:$4 sm:$0xff]  }
 0x105   :  { %v1758_v25 = vsel %vm1752_vm1, %v1756_v20, %v12494_v21  ;;  %v10988_v20 = vld [vmem:[%s15349_s1 + $0x744] ss:$8 sps:$4 sm:$0xff]  }
 0x107   :  { %1571 = vmatpush1.bf16.msra.mxu0 %v10871_v23  ;;  %v10928_v23 = vld [vmem:[%s15349_s1 + $0x620] ss:$8 sps:$4 sm:$0xff]  }
 0x108   :  { %1572 = vmatprep.subr.bf16.mxu0 %v10878_v24  ;;  %v10933_v24 = vld [vmem:[%s15349_s1 + $0x634] ss:$8 sps:$4 sm:$0xff]  }
 0x10a   :  { %1560 = vmatmul.mubr.bf16.gmra.mrb[16].mxu0 %v8678_v26  ;;  %v10931_v26 = vld [vmem:[%s15349_s1 + $0x630] ss:$8 sps:$4 sm:$0xff]  }
 0x10b   :  { %1573 = vmatpush1.bf16.msra.mxu0 %v10876_v27  ;;  %1600 = vmatprep.mubr.bf16.mxu0 %v8675_v29  ;;  %v10936_v27 = vld [vmem:[%s15349_s1 + $0x644] ss:$8 sps:$4 sm:$0xff]   ;;  %v10934_v29 = vld [vmem:[%s15349_s1 + $0x640] ss:$8 sps:$4 sm:$0xff]  }
 0x10c   :  { %1574 = vmatprep.subr.bf16.mxu0 %v10881_v30  ;;  %v10939_v30 = vld [vmem:[%s15349_s1 + $0x654] ss:$8 sps:$4 sm:$0xff]  }
 0x10f   :  { %1575 = vmatpush1.bf16.msra.mxu0 %v10879_v31  ;;  %v10937_v31 = vld [vmem:[%s15349_s1 + $0x650] ss:$8 sps:$4 sm:$0xff]  }
 0x110   :  { %1576 = vmatprep.subr.bf16.mxu0 %v10884_v32  ;;  %v10942_v32 = vld [vmem:[%s15349_s1 + $0x664] ss:$8 sps:$4 sm:$0xff]  }
 0x113   :  { %1577 = vmatpush1.bf16.msra.mxu0 %v10882_v33  ;;  %v10940_v33 = vld [vmem:[%s15349_s1 + $0x660] ss:$8 sps:$4 sm:$0xff]  }
 0x114   :  { %1578 = vmatprep.subr.bf16.mxu0 %v10887_v34  ;;  %v10945_v34 = vld [vmem:[%s15349_s1 + $0x674] ss:$8 sps:$4 sm:$0xff]  }
 0x117   :  { %1579 = vmatpush1.bf16.msra.mxu0 %v10885_v35  ;;  %v10943_v35 = vld [vmem:[%s15349_s1 + $0x670] ss:$8 sps:$4 sm:$0xff]  }
 0x118   :  { %1580 = vmatprep.subr.bf16.mxu0 %v10890_v36  ;;  %v10948_v36 = vld [vmem:[%s15349_s1 + $0x684] ss:$8 sps:$4 sm:$0xff]  }
 0x11b   :  { %1581 = vmatpush1.bf16.msra.mxu0 %v10888_v37  ;;  %v12410_v6 = vpop.f32.mrb[0].mxu1 }
 0x11c   :  { %1582 = vmatprep.subr.bf16.mxu0 %v10893_v38  ;;  %v12415_v50 = vpop.f32.mrb[1].mxu1 }
 0x11d   :  { %v886_v41 = vpop.f32.mrb[4].mxu0  ;;  %v12420_v53 = vpop.f32.mrb[2].mxu1 }
 0x11e   :  { %v888_v42 = vpop.f32.mrb[5].mxu0  ;;  %v12422_v54 = vpop.f32.mrb[3].mxu1 }
 0x11f   :  { %1583 = vmatpush1.bf16.msra.mxu0 %v10891_v39  ;;  %v890_v44 = vpop.f32.mrb[6].mxu0 }
 0x120   :  { %1584 = vmatprep.subr.bf16.mxu0 %v10896_v40  ;;  %v891_v46 = vpop.f32.mrb[7].mxu0 }
 0x121   :  { %v10954_v46 = vld [vmem:[%s15349_s1 + $0x6a4] ss:$8 sps:$4 sm:$0xff]  }
 0x123   :  { %1585 = vmatpush1.bf16.msra.mxu0 %v10894_v43  ;;  %v835_v57 = vpop.f32.mrb[4].mxu1  ;;  %v10951_v43 = vld [vmem:[%s15349_s1 + $0x694] ss:$8 sps:$4 sm:$0xff]  }
 0x124   :  { %1586 = vmatprep.subr.bf16.mxu0 %v10899_v45  ;;  %v12433_v59 = vadd.f32 %v886_v41, %v835_v57  ;;  %v837_v60 = vpop.f32.mrb[5].mxu1  ;;  %v10946_v41 = vld [vmem:[%s15349_s1 + $0x680] ss:$8 sps:$4 sm:$0xff]   ;;  %v10949_v45 = vld [vmem:[%s15349_s1 + $0x690] ss:$8 sps:$4 sm:$0xff]  }
 0x125   :  { %v12438_v62 = vadd.f32 %v888_v42, %v837_v60  ;;  %v839_v63 = vpop.f32.mrb[6].mxu1  ;;  %v10961_v57 = vld [vmem:[%s15349_s1 + $0x6d0] ss:$8 sps:$4 sm:$0xff]   ;;  %v8874_v60 = vcombine.low %v12464_v9, %v12482_v15 }
 0x126   :  { %v840_v0 = vpop.f32.mrb[7].mxu1  ;;  %v10967_v63 = vld [vmem:[%s15349_s1 + $0x6f0] ss:$8 sps:$4 sm:$0xff]  }
 0x127   :  { %1587 = vmatpush1.bf16.msra.mxu0 %v10897_v47  ;;  %v10952_v47 = vld [vmem:[%s15349_s1 + $0x6a0] ss:$8 sps:$4 sm:$0xff]   ;;  %v1753_v0 = vrot.slane %v8874_v60, 2 }
 0x128   :  { %1588 = vmatprep.subr.bf16.mxu0 %v10902_v48  ;;  %v10957_v48 = vld [vmem:[%s15349_s1 + $0x6b4] ss:$8 sps:$4 sm:$0xff]   ;;  %v12726_v60 = vld [vmem:[%s15350_s0 + $0x40] sm:$0xff] }
 0x12b   :  { %1589 = vmatpush1.bf16.msra.mxu0 %v10900_v49  ;;  %v10955_v49 = vld [vmem:[%s15349_s1 + $0x6b0] ss:$8 sps:$4 sm:$0xff]  }
 0x12c   :  { %1590 = vmatprep.subr.bf16.mxu0 %v10905_v51  ;;  %v10960_v51 = vld [vmem:[%s15349_s1 + $0x6c4] ss:$8 sps:$4 sm:$0xff]  }
 0x12f   :  { %1591 = vmatpush1.bf16.msra.mxu0 %v10903_v55  ;;  %v10958_v55 = vld [vmem:[%s15349_s1 + $0x6c0] ss:$8 sps:$4 sm:$0xff]  }
 0x130   :  { %1592 = vmatprep.subr.bf16.mxu0 %v10908_v56  ;;  %v10963_v56 = vld [vmem:[%s15349_s1 + $0x6d4] ss:$8 sps:$4 sm:$0xff]  }
 0x133   :  { %1593 = vmatpush1.bf16.msra.mxu0 %v10906_v58  ;;  %v10966_v58 = vld [vmem:[%s15349_s1 + $0x6e4] ss:$8 sps:$4 sm:$0xff]  }
 0x134   :  { %1594 = vmatprep.subr.bf16.mxu0 %v10911_v61  ;;  %v8880_v61 = vcombine.low %v12469_v10, %v12469_v10 }
 0x137   :  { %1595 = vmatpush1.bf16.msra.mxu0 %v10909_v1  ;;  %v1754_v1 = vrot.slane %v8880_v61, 2 }
 0x138   :  { %1596 = vmatprep.subr.bf16.mxu0 %v10914_v2  ;;  %v10976_v2 = vld [vmem:[%s15349_s1 + $0x704] ss:$8 sps:$4 sm:$0xff]  }
 0x13b   :  { %1597 = vmatpush1.bf16.msra.mxu0 %v10912_v3  ;;  %v12595_v3 = vld [vmem:[%s15350_s0 + $0x8] sm:$0xcc] }
 0x13c   :  { %1598 = vmatprep.subr.bf16.mxu0 %v10917_v4  ;;  %v12600_v4 = vld [vmem:[%s15350_s0 + $0x38] sm:$0xff]  ;;  %v8877_v9 = vcombine.high %v12595_v3, %v12248_v52 }
 0x13f   :  { %1599 = vmatpush1.bf16.msra.mxu0 %v10915_v5  ;;  %v10974_v5 = vld [vmem:[%s15349_s1 + $0x700] ss:$8 sps:$4 sm:$0xff]  }
 0x140   :  { %2263 = vmatprep.subr.bf16.mxu0 %v10922_v7  ;;  %v1755_v7 = vsel %vm1752_vm1, %v1753_v0, %v1754_v1 }
 0x142   :  { %1601 = vmatmul.mubr.bf16.vlgmr.msra.gmra.mrb[0].mxu0 %v8674_v11  ;;  %v8883_v11 = vcombine.high %v12600_v4, %v12600_v4 }
 0x143   :  { %2264 = vmatpush1.bf16.msra.mxu0 %v10920_v12  ;;  %1610 = vmatprep.mubr.bf16.mxu0 %v8681_v13  ;;  %v10977_v12 = vld [vmem:[%s15349_s1 + $0x710] ss:$8 sps:$4 sm:$0xff]   ;;  %v10982_v13 = vld [vmem:[%s15349_s1 + $0x724] ss:$8 sps:$4 sm:$0xff]  }
 0x144   :  { %2265 = vmatprep.subr.bf16.mxu0 %v10925_v14  ;;  %v1762_v14 = vrot.slane %v8877_v9, 2  ;;  %v12620_v15 = vrot.slane %v8883_v11, 2  ;;  %v11037_v9 = vld [vmem:[%s15349_s1 + $0x834] ss:$8 sps:$4 sm:$0xff]  }
 0x147   :  { %2266 = vmatpush1.bf16.msra.mxu0 %v10923_v18  ;;  %v1764_v18 = vsel %vm1752_vm1, %v1762_v14, %v12620_v15  ;;  %v11038_v14 = vld [vmem:[%s15349_s1 + $0x840] ss:$8 sps:$4 sm:$0xff]  }
 0x148   :  { %2267 = vmatprep.subr.bf16.mxu0 %v10930_v19  ;;  %v10983_v19 = vld [vmem:[%s15349_s1 + $0x730] ss:$8 sps:$4 sm:$0xff]  }
 0x14a   :  { %1611 = vmatmul.mubr.bf16.gmra.mrb[20].mxu0 %v8680_v22  ;;  %v10991_v22 = vld [vmem:[%s15349_s1 + $0x754] ss:$8 sps:$4 sm:$0xff]  }
 0x14b   :  { %2268 = vmatpush1.bf16.msra.mxu0 %v10928_v23  ;;  %2295 = vmatprep.mubr.bf16.mxu0 %v1758_v25  ;;  %v10989_v23 = vld [vmem:[%s15349_s1 + $0x750] ss:$8 sps:$4 sm:$0xff]   ;;  %v10992_v25 = vld [vmem:[%s15349_s1 + $0x760] ss:$8 sps:$4 sm:$0xff]  }
 0x14c   :  { %2269 = vmatprep.subr.bf16.mxu0 %v10933_v24  ;;  %v10994_v24 = vld [vmem:[%s15349_s1 + $0x764] ss:$8 sps:$4 sm:$0xff]  }
 0x14f   :  { %2270 = vmatpush1.bf16.msra.mxu0 %v10931_v26  ;;  %v10997_v26 = vld [vmem:[%s15349_s1 + $0x774] ss:$8 sps:$4 sm:$0xff]  }
 0x150   :  { %2271 = vmatprep.subr.bf16.mxu0 %v10936_v27  ;;  %v10995_v27 = vld [vmem:[%s15349_s1 + $0x770] ss:$8 sps:$4 sm:$0xff]  }
 0x153   :  { %2272 = vmatpush1.bf16.msra.mxu0 %v10934_v29  ;;  %v11000_v29 = vld [vmem:[%s15349_s1 + $0x784] ss:$8 sps:$4 sm:$0xff]  }
 0x154   :  { %2273 = vmatprep.subr.bf16.mxu0 %v10939_v30 }
 0x157   :  { %2274 = vmatpush1.bf16.msra.mxu0 %v10937_v31 }
 0x158   :  { %2275 = vmatprep.subr.bf16.mxu0 %v10942_v32 }
 0x15b   :  { %2276 = vmatpush1.bf16.msra.mxu0 %v10940_v33 }
 0x15c   :  { %2277 = vmatprep.subr.bf16.mxu0 %v10945_v34  ;;  %v10998_v34 = vld [vmem:[%s15349_s1 + $0x780] ss:$8 sps:$4 sm:$0xff]  }
 0x15d   :  { %v937_v37 = vpop.f32.mrb[8].mxu0 }
 0x15e   :  { %v12535_v38 = vadd.f32 %v937_v37, %v12433_v59  ;;  %v939_v39 = vpop.f32.mrb[9].mxu0  ;;  %v10964_v59 = vld [vmem:[%s15349_s1 + $0x6e0] ss:$8 sps:$4 sm:$0xff]  }
 0x15f   :  { %v12538_v40 = vadd.f32 %v939_v39, %v12438_v62  ;;  %2278 = vmatpush1.bf16.msra.mxu0 %v10943_v35  ;;  %v941_v42 = vpop.f32.mrb[10].mxu0  ;;  %v10969_v62 = vld [vmem:[%s15349_s1 + $0x6f4] ss:$8 sps:$4 sm:$0xff]   ;;  %v11006_v39 = vld [vmem:[%s15349_s1 + $0x7a4] ss:$8 sps:$4 sm:$0xff]  }
 0x160   :  { %2279 = vmatprep.subr.bf16.mxu0 %v10948_v36  ;;  %v942_v44 = vpop.f32.mrb[11].mxu0  ;;  %v11003_v36 = vld [vmem:[%s15349_s1 + $0x794] ss:$8 sps:$4 sm:$0xff]   ;;  %v11007_v42 = vld [vmem:[%s15349_s1 + $0x7b0] ss:$8 sps:$4 sm:$0xff]  }
 0x161   :  { %v11010_v44 = vld [vmem:[%s15349_s1 + $0x7c0] ss:$8 sps:$4 sm:$0xff]  }
 0x163   :  { %2280 = vmatpush1.bf16.msra.mxu0 %v10946_v41  ;;  %v11009_v41 = vld [vmem:[%s15349_s1 + $0x7b4] ss:$8 sps:$4 sm:$0xff]  }
 0x164   :  { %2281 = vmatprep.subr.bf16.mxu0 %v10951_v43  ;;  %v11012_v43 = vld [vmem:[%s15349_s1 + $0x7c4] ss:$8 sps:$4 sm:$0xff]  }
 0x167   :  { %2282 = vmatpush1.bf16.msra.mxu0 %v10949_v45  ;;  %v11015_v45 = vld [vmem:[%s15349_s1 + $0x7d4] ss:$8 sps:$4 sm:$0xff]  }
 0x168   :  { %2283 = vmatprep.subr.bf16.mxu0 %v10954_v46  ;;  %v11013_v46 = vld [vmem:[%s15349_s1 + $0x7d0] ss:$8 sps:$4 sm:$0xff]  }
 0x16b   :  { %2284 = vmatpush1.bf16.msra.mxu0 %v10952_v47  ;;  %v11018_v47 = vld [vmem:[%s15349_s1 + $0x7e4] ss:$8 sps:$4 sm:$0xff]  }
 0x16c   :  { %2285 = vmatprep.subr.bf16.mxu0 %v10957_v48  ;;  %v11016_v48 = vld [vmem:[%s15349_s1 + $0x7e0] ss:$8 sps:$4 sm:$0xff]  }
 0x16f   :  { %2286 = vmatpush1.bf16.msra.mxu0 %v10955_v49  ;;  %v8876_v49 = vcombine.low %v12595_v3, %v12248_v52  ;;  %v11028_v52 = vld [vmem:[%s15349_s1 + $0x804] ss:$8 sps:$4 sm:$0xff]  }
 0x170   :  { %2287 = vmatprep.subr.bf16.mxu0 %v10960_v51  ;;  %v8882_v51 = vcombine.low %v12600_v4, %v12600_v4  ;;  %v11034_v3 = vld [vmem:[%s15349_s1 + $0x824] ss:$8 sps:$4 sm:$0xff]  }
 0x173   :  { %2288 = vmatpush1.bf16.msra.mxu0 %v10958_v55  ;;  %v11021_v55 = vld [vmem:[%s15349_s1 + $0x7f4] ss:$8 sps:$4 sm:$0xff]  }
 0x174   :  { %2289 = vmatprep.subr.bf16.mxu0 %v10963_v56  ;;  %v11019_v56 = vld [vmem:[%s15349_s1 + $0x7f0] ss:$8 sps:$4 sm:$0xff]  }
 0x177   :  { %2290 = vmatpush1.bf16.msra.mxu0 %v10961_v57  ;;  %v1759_v57 = vrot.slane %v8876_v49, 2  ;;  %v12852_v49 = vld [vmem:[%s15350_s0 + $0x18] sm:$0xff] }
 0x178   :  { %2291 = vmatprep.subr.bf16.mxu0 %v10966_v58  ;;  %v1760_v58 = vrot.slane %v8882_v51, 2  ;;  %v12857_v51 = vld [vmem:[%s15350_s0 + $0x48] sm:$0x11] }
 0x17a   :  { %v1761_v61 = vsel %vm1752_vm1, %v1759_v57, %v1760_v58  ;;  %v11083_v57 = vld [vmem:[%s15349_s1 + $0x914] ss:$8 sps:$4 sm:$0xff]  }
 0x17b   :  { %2292 = vmatpush1.bf16.msra.mxu0 %v10964_v59  ;;  %v12721_v59 = vld [vmem:[%s15350_s0 + $0x10] sm:$0xcc] }
 0x17c   :  { %2293 = vmatprep.subr.bf16.mxu0 %v10969_v62  ;;  %v11026_v62 = vld [vmem:[%s15349_s1 + $0x800] ss:$8 sps:$4 sm:$0xff]   ;;  %v8879_v0 = vcombine.high %v12721_v59, %v12361_v28 }
 0x17f   :  { %2294 = vmatpush1.bf16.msra.mxu0 %v10967_v63  ;;  %v11031_v63 = vld [vmem:[%s15349_s1 + $0x814] ss:$8 sps:$4 sm:$0xff]  }
 0x180   :  { %2314 = vmatprep.subr.bf16.mxu0 %v10976_v2  ;;  %v11029_v2 = vld [vmem:[%s15349_s1 + $0x810] ss:$8 sps:$4 sm:$0xff]  }
 0x182   :  { %2296 = vmatmul.mubr.bf16.vlgmr.msra.gmra.mrb[0].mxu0 %v1755_v7 }
 0x183   :  { %2315 = vmatpush1.bf16.msra.mxu0 %v10974_v5  ;;  %2305 = vmatprep.mubr.bf16.mxu0 %v12494_v21  ;;  %v10986_v21 = vld [vmem:[%s15349_s1 + $0x740] ss:$8 sps:$4 sm:$0xff]   ;;  %v1768_v5 = vrot.slane %v8879_v0, 2 }
 0x184   :  { %2316 = vmatprep.subr.bf16.mxu0 %v10979_v8  ;;  %v11032_v8 = vld [vmem:[%s15349_s1 + $0x820] ss:$8 sps:$4 sm:$0xff]  }
 0x185   :  { %v11084_v0 = vld [vmem:[%s15349_s1 + $0x920] ss:$8 sps:$4 sm:$0xff]  }
 0x187   :  { %2317 = vmatpush1.bf16.msra.mxu0 %v10977_v12  ;;  %v11035_v12 = vld [vmem:[%s15349_s1 + $0x830] ss:$8 sps:$4 sm:$0xff]  }
 0x188   :  { %2318 = vmatprep.subr.bf16.mxu0 %v10982_v13  ;;  %v11040_v13 = vld [vmem:[%s15349_s1 + $0x844] ss:$8 sps:$4 sm:$0xff]  }
 0x18a   :  { %2306 = vmatmul.mubr.bf16.gmra.mrb[24].mxu0 %v1754_v1  ;;  %v8885_v1 = vcombine.high %v12726_v60, %v12726_v60 }
 0x18b   :  { %2319 = vmatpush1.bf16.msra.mxu0 %v10980_v16  ;;  %2346 = vmatprep.mubr.bf16.mxu0 %v1764_v18  ;;  %v11041_v16 = vld [vmem:[%s15349_s1 + $0x850] ss:$8 sps:$4 sm:$0xff]   ;;  %v11044_v18 = vld [vmem:[%s15349_s1 + $0x860] ss:$8 sps:$4 sm:$0xff]  }
 0x18c   :  { %2320 = vmatprep.subr.bf16.mxu0 %v10985_v17  ;;  %v12746_v7 = vrot.slane %v8885_v1, 2  ;;  %v11046_v17 = vld [vmem:[%s15349_s1 + $0x864] ss:$8 sps:$4 sm:$0xff]   ;;  %v11089_v1 = vld [vmem:[%s15349_s1 + $0x934] ss:$8 sps:$4 sm:$0xff]  }
 0x18e   :  { %v1770_v11 = vsel %vm1752_vm1, %v1768_v5, %v12746_v7  ;;  %v11092_v5 = vld [vmem:[%s15349_s1 + $0x944] ss:$8 sps:$4 sm:$0xff]  }
 0x18f   :  { %2321 = vmatpush1.bf16.msra.mxu0 %v10983_v19  ;;  %v11049_v19 = vld [vmem:[%s15349_s1 + $0x874] ss:$8 sps:$4 sm:$0xff]  }
 0x190   :  { %2322 = vmatprep.subr.bf16.mxu0 %v10988_v20  ;;  %v11047_v20 = vld [vmem:[%s15349_s1 + $0x870] ss:$8 sps:$4 sm:$0xff]  }
 0x193   :  { %2323 = vmatpush1.bf16.msra.mxu0 %v10986_v21  ;;  %v11052_v21 = vld [vmem:[%s15349_s1 + $0x884] ss:$8 sps:$4 sm:$0xff]  }
 0x194   :  { %2324 = vmatprep.subr.bf16.mxu0 %v10991_v22 }
 0x197   :  { %2325 = vmatpush1.bf16.msra.mxu0 %v10989_v23 }
 0x198   :  { %2326 = vmatprep.subr.bf16.mxu0 %v10994_v24 }
 0x19b   :  { %2327 = vmatpush1.bf16.msra.mxu0 %v10992_v25 }
 0x19c   :  { %2328 = vmatprep.subr.bf16.mxu0 %v10997_v26  ;;  %v11050_v26 = vld [vmem:[%s15349_s1 + $0x880] ss:$8 sps:$4 sm:$0xff]  }
 0x19d   :  { %v1510_v30 = vpop.f32.mrb[12].mxu0 }
 0x19e   :  { %v12661_v31 = vadd.f32 %v1510_v30, %v12535_v38  ;;  %v1512_v32 = vpop.f32.mrb[13].mxu0  ;;  %v11001_v38 = vld [vmem:[%s15349_s1 + $0x790] ss:$8 sps:$4 sm:$0xff]  }
 0x19f   :  { %v12664_v33 = vadd.f32 %v1512_v32, %v12538_v40  ;;  %2329 = vmatpush1.bf16.msra.mxu0 %v10995_v27  ;;  %v1514_v35 = vpop.f32.mrb[14].mxu0  ;;  %v11004_v40 = vld [vmem:[%s15349_s1 + $0x7a0] ss:$8 sps:$4 sm:$0xff]   ;;  %v11058_v32 = vld [vmem:[%s15349_s1 + $0x8a4] ss:$8 sps:$4 sm:$0xff]  }
 0x1a0   :  { %2330 = vmatprep.subr.bf16.mxu0 %v11000_v29  ;;  %v1515_v37 = vpop.f32.mrb[15].mxu0  ;;  %v11055_v29 = vld [vmem:[%s15349_s1 + $0x894] ss:$8 sps:$4 sm:$0xff]   ;;  %v11059_v35 = vld [vmem:[%s15349_s1 + $0x8b0] ss:$8 sps:$4 sm:$0xff]  }
 0x1a1   :  { %v11062_v37 = vld [vmem:[%s15349_s1 + $0x8c0] ss:$8 sps:$4 sm:$0xff]  }
 0x1a3   :  { %2331 = vmatpush1.bf16.msra.mxu0 %v10998_v34  ;;  %v11061_v34 = vld [vmem:[%s15349_s1 + $0x8b4] ss:$8 sps:$4 sm:$0xff]  }
 0x1a4   :  { %2332 = vmatprep.subr.bf16.mxu0 %v11003_v36  ;;  %v11064_v36 = vld [vmem:[%s15349_s1 + $0x8c4] ss:$8 sps:$4 sm:$0xff]  }
 0x1a7   :  { %2333 = vmatpush1.bf16.msra.mxu0 %v11001_v38  ;;  %v11067_v38 = vld [vmem:[%s15349_s1 + $0x8d4] ss:$8 sps:$4 sm:$0xff]  }
 0x1a8   :  { %2334 = vmatprep.subr.bf16.mxu0 %v11006_v39  ;;  %v11065_v39 = vld [vmem:[%s15349_s1 + $0x8d0] ss:$8 sps:$4 sm:$0xff]  }
 0x1ab   :  { %2335 = vmatpush1.bf16.msra.mxu0 %v11004_v40  ;;  %v11070_v40 = vld [vmem:[%s15349_s1 + $0x8e4] ss:$8 sps:$4 sm:$0xff]  }
 0x1ac   :  { %2336 = vmatprep.subr.bf16.mxu0 %v11009_v41  ;;  %v11068_v41 = vld [vmem:[%s15349_s1 + $0x8e0] ss:$8 sps:$4 sm:$0xff]  }
 0x1af   :  { %2337 = vmatpush1.bf16.msra.mxu0 %v11007_v42  ;;  %v8878_v42 = vcombine.low %v12721_v59, %v12361_v28  ;;  %v11080_v28 = vld [vmem:[%s15349_s1 + $0x904] ss:$8 sps:$4 sm:$0xff]   ;;  %v11081_v59 = vld [vmem:[%s15349_s1 + $0x910] ss:$8 sps:$4 sm:$0xff]  }
 0x1b0   :  { %2338 = vmatprep.subr.bf16.mxu0 %v11012_v43  ;;  %v8884_v43 = vcombine.low %v12726_v60, %v12726_v60 }
 0x1b3   :  { %2339 = vmatpush1.bf16.msra.mxu0 %v11010_v44  ;;  %v11073_v44 = vld [vmem:[%s15349_s1 + $0x8f4] ss:$8 sps:$4 sm:$0xff]  }
 0x1b4   :  { %2340 = vmatprep.subr.bf16.mxu0 %v11015_v45  ;;  %v11071_v45 = vld [vmem:[%s15349_s1 + $0x8f0] ss:$8 sps:$4 sm:$0xff]  }
 0x1b7   :  { %2341 = vmatpush1.bf16.msra.mxu0 %v11013_v46  ;;  %v1765_v46 = vrot.slane %v8878_v42, 2  ;;  %v11132_v42 = vld [vmem:[%s15349_s1 + $0xa04] ss:$8 sps:$4 sm:$0xff]  }
 0x1b8   :  { %2342 = vmatprep.subr.bf16.mxu0 %v11018_v47  ;;  %v1766_v47 = vrot.slane %v8884_v43, 2  ;;  %v12983_v43 = vld [vmem:[%s15350_s0 + $0x20] sm:$0xff] }
 0x1bb   :  { %2343 = vmatpush1.bf16.msra.mxu0 %v11016_v48  ;;  %v12847_v48 = vld [vmem:[%s15350_s0] sm:$0x88] }
 0x1bc   :  { %2344 = vmatprep.subr.bf16.mxu0 %v11021_v55  ;;  %v1767_v55 = vsel %vm1752_vm1, %v1765_v46, %v1766_v47 }
 0x1bf   :  { %2345 = vmatpush1.bf16.msra.mxu0 %v11019_v56  ;;  %v11078_v56 = vld [vmem:[%s15349_s1 + $0x900] ss:$8 sps:$4 sm:$0xff]  }
 0x1c0   :  { %2365 = vmatprep.subr.bf16.mxu0 %v11028_v52  ;;  %v9085_v52 = vcombine.high %v12469_v10, %v12857_v51 }
 0x1c2   :  { %2347 = vmatmul.mubr.bf16.vlgmr.msra.gmra.mrb[0].mxu0 %v1761_v61  ;;  %v11086_v61 = vld [vmem:[%s15349_s1 + $0x924] ss:$8 sps:$4 sm:$0xff]  }
 0x1c3   :  { %2366 = vmatpush1.bf16.msra.mxu0 %v11026_v62  ;;  %2356 = vmatprep.mubr.bf16.mxu0 %v12620_v15  ;;  %v11043_v15 = vld [vmem:[%s15349_s1 + $0x854] ss:$8 sps:$4 sm:$0xff]  }
 0x1c4   :  { %2367 = vmatprep.subr.bf16.mxu0 %v11031_v63  ;;  %v12877_v63 = vrot.slane %v9085_v52, 3  ;;  %v11141_v52 = vld [vmem:[%s15349_s1 + $0xa34] ss:$8 sps:$4 sm:$0xff]  }
 0x1c7   :  { %2368 = vmatpush1.bf16.msra.mxu0 %v11029_v2 }
 0x1c8   :  { %2369 = vmatprep.subr.bf16.mxu0 %v11034_v3  ;;  %v11087_v3 = vld [vmem:[%s15349_s1 + $0x930] ss:$8 sps:$4 sm:$0xff]  }
 0x1ca   :  { %2357 = vmatmul.mubr.bf16.gmra.mrb[28].mxu0 %v1760_v58  ;;  %v9079_v58 = vcombine.high %v12847_v48, %v12852_v49 }
 0x1cb   :  { %2370 = vmatpush1.bf16.msra.mxu0 %v11032_v8  ;;  %2397 = vmatprep.mubr.bf16.mxu0 %v1770_v11  ;;  %v11095_v8 = vld [vmem:[%s15349_s1 + $0x954] ss:$8 sps:$4 sm:$0xff]   ;;  %v11098_v11 = vld [vmem:[%s15349_s1 + $0x964] ss:$8 sps:$4 sm:$0xff]  }
 0x1cc   :  { %2371 = vmatprep.subr.bf16.mxu0 %v11037_v9  ;;  %v2583_v62 = vrot.slane %v9079_v58, 3  ;;  %v11093_v9 = vld [vmem:[%s15349_s1 + $0x950] ss:$8 sps:$4 sm:$0xff]   ;;  %v11136_v58 = vld [vmem:[%s15349_s1 + $0xa20] ss:$8 sps:$4 sm:$0xff]  }
 0x1ce   :  { %v2585_v2 = vsel %vm2579_vm2, %v2583_v62, %v12877_v63  ;;  %v11144_v62 = vld [vmem:[%s15349_s1 + $0xa44] ss:$8 sps:$4 sm:$0xff]  }
 0x1cf   :  { %2372 = vmatpush1.bf16.msra.mxu0 %v11035_v12  ;;  %v11096_v12 = vld [vmem:[%s15349_s1 + $0x960] ss:$8 sps:$4 sm:$0xff]  }
 0x1d0   :  { %2373 = vmatprep.subr.bf16.mxu0 %v11040_v13  ;;  %v11101_v13 = vld [vmem:[%s15349_s1 + $0x974] ss:$8 sps:$4 sm:$0xff]  }
 0x1d3   :  { %2374 = vmatpush1.bf16.msra.mxu0 %v11038_v14  ;;  %v11099_v14 = vld [vmem:[%s15349_s1 + $0x970] ss:$8 sps:$4 sm:$0xff]  }
 0x1d4   :  { %2375 = vmatprep.subr.bf16.mxu0 %v11043_v15  ;;  %v11104_v15 = vld [vmem:[%s15349_s1 + $0x984] ss:$8 sps:$4 sm:$0xff]  }
 0x1d7   :  { %2376 = vmatpush1.bf16.msra.mxu0 %v11041_v16 }
 0x1d8   :  { %2377 = vmatprep.subr.bf16.mxu0 %v11046_v17 }
 0x1db   :  { %2378 = vmatpush1.bf16.msra.mxu0 %v11044_v18 }
 0x1dc   :  { %2379 = vmatprep.subr.bf16.mxu0 %v11049_v19 }
 0x1dd   :  { %v1561_v22 = vpop.f32.mrb[16].mxu0 }
 0x1de   :  { %v12787_v23 = vadd.f32 %v1561_v22, %v12661_v31  ;;  %v1563_v24 = vpop.f32.mrb[17].mxu0  ;;  %v11053_v31 = vld [vmem:[%s15349_s1 + $0x890] ss:$8 sps:$4 sm:$0xff]   ;;  %v11107_v22 = vld [vmem:[%s15349_s1 + $0x994] ss:$8 sps:$4 sm:$0xff]  }
 0x1df   :  { %v12790_v25 = vadd.f32 %v1563_v24, %v12664_v33  ;;  %2380 = vmatpush1.bf16.msra.mxu0 %v11047_v20  ;;  %v1565_v27 = vpop.f32.mrb[18].mxu0  ;;  %v11056_v33 = vld [vmem:[%s15349_s1 + $0x8a0] ss:$8 sps:$4 sm:$0xff]  }
 0x1e0   :  { %2381 = vmatprep.subr.bf16.mxu0 %v11052_v21  ;;  %v1566_v30 = vpop.f32.mrb[19].mxu0  ;;  %v11102_v20 = vld [vmem:[%s15349_s1 + $0x980] ss:$8 sps:$4 sm:$0xff]   ;;  %v11113_v27 = vld [vmem:[%s15349_s1 + $0x9b4] ss:$8 sps:$4 sm:$0xff]  }
 0x1e1   :  { %v11116_v30 = vld [vmem:[%s15349_s1 + $0x9c4] ss:$8 sps:$4 sm:$0xff]  }
 0x1e3   :  { %2382 = vmatpush1.bf16.msra.mxu0 %v11050_v26  ;;  %v11108_v26 = vld [vmem:[%s15349_s1 + $0x9a0] ss:$8 sps:$4 sm:$0xff]  }
 0x1e4   :  { %2383 = vmatprep.subr.bf16.mxu0 %v11055_v29  ;;  %v11111_v29 = vld [vmem:[%s15349_s1 + $0x9b0] ss:$8 sps:$4 sm:$0xff]  }
 0x1e7   :  { %2384 = vmatpush1.bf16.msra.mxu0 %v11053_v31  ;;  %v11114_v31 = vld [vmem:[%s15349_s1 + $0x9c0] ss:$8 sps:$4 sm:$0xff]  }
 0x1e8   :  { %2385 = vmatprep.subr.bf16.mxu0 %v11058_v32  ;;  %v11119_v32 = vld [vmem:[%s15349_s1 + $0x9d4] ss:$8 sps:$4 sm:$0xff]  }
 0x1eb   :  { %2386 = vmatpush1.bf16.msra.mxu0 %v11056_v33  ;;  %v11117_v33 = vld [vmem:[%s15349_s1 + $0x9d0] ss:$8 sps:$4 sm:$0xff]  }
 0x1ec   :  { %2387 = vmatprep.subr.bf16.mxu0 %v11061_v34  ;;  %v11122_v34 = vld [vmem:[%s15349_s1 + $0x9e4] ss:$8 sps:$4 sm:$0xff]  }
 0x1ef   :  { %2388 = vmatpush1.bf16.msra.mxu0 %v11059_v35  ;;  %v11120_v35 = vld [vmem:[%s15349_s1 + $0x9e0] ss:$8 sps:$4 sm:$0xff]  }
 0x1f0   :  { %2389 = vmatprep.subr.bf16.mxu0 %v11064_v36  ;;  %v9078_v36 = vcombine.low %v12847_v48, %v12852_v49 }
 0x1f3   :  { %2390 = vmatpush1.bf16.msra.mxu0 %v11062_v37  ;;  %v9084_v37 = vcombine.low %v12469_v10, %v12857_v51  ;;  %v12978_v10 = vld [vmem:[%s15350_s0 + $0x8] sm:$0x88]  ;;  %v11133_v51 = vld [vmem:[%s15349_s1 + $0xa10] ss:$8 sps:$4 sm:$0xff]  }
 0x1f4   :  { %2391 = vmatprep.subr.bf16.mxu0 %v11067_v38  ;;  %v11125_v38 = vld [vmem:[%s15349_s1 + $0x9f4] ss:$8 sps:$4 sm:$0xff]  }
 0x1f7   :  { %2392 = vmatpush1.bf16.msra.mxu0 %v11065_v39  ;;  %v11123_v39 = vld [vmem:[%s15349_s1 + $0x9f0] ss:$8 sps:$4 sm:$0xff]  }
 0x1f8   :  { %2393 = vmatprep.subr.bf16.mxu0 %v11070_v40  ;;  %v2580_v40 = vrot.slane %v9078_v36, 3  ;;  %v11184_v36 = vld [vmem:[%s15349_s1 + $0xb04] ss:$8 sps:$4 sm:$0xff]  }
 0x1fb   :  { %2394 = vmatpush1.bf16.msra.mxu0 %v11068_v41  ;;  %v2581_v41 = vrot.slane %v9084_v37, 3  ;;  %v13112_v37 = vld [vmem:[%s15350_s0 + $0x28] sm:$0xff] }
 0x1fc   :  { %2395 = vmatprep.subr.bf16.mxu0 %v11073_v44  ;;  %v12988_v44 = vld [vmem:[%s15350_s0 + $0x50] sm:$0x11] }
 0x1fd   :  { %v2582_v46 = vsel %vm2579_vm2, %v2580_v40, %v2581_v41  ;;  %v9087_v48 = vcombine.high %v12600_v4, %v12988_v44  ;;  %v11182_v40 = vld [vmem:[%s15349_s1 + $0xb00] ss:$8 sps:$4 sm:$0xff]  }
 0x1ff   :  { %2396 = vmatpush1.bf16.msra.mxu0 %v11071_v45  ;;  %v11130_v45 = vld [vmem:[%s15349_s1 + $0xa00] ss:$8 sps:$4 sm:$0xff]  }
 0x200   :  { %3090 = vmatprep.subr.bf16.mxu0 %v11080_v28  ;;  %v9081_v28 = vcombine.high %v12978_v10, %v12983_v43 }
 0x202   :  { %2398 = vmatmul.mubr.bf16.vlgmr.msra.gmra.mrb[0].mxu0 %v1767_v55  ;;  %v11138_v55 = vld [vmem:[%s15349_s1 + $0xa24] ss:$8 sps:$4 sm:$0xff]  }
 0x203   :  { %3091 = vmatpush1.bf16.msra.mxu0 %v11078_v56  ;;  %2407 = vmatprep.mubr.bf16.mxu0 %v12746_v7  ;;  %v11090_v7 = vld [vmem:[%s15349_s1 + $0x940] ss:$8 sps:$4 sm:$0xff]   ;;  %v2589_v56 = vrot.slane %v9081_v28, 3 }
 0x204   :  { %3092 = vmatprep.subr.bf16.mxu0 %v11083_v57  ;;  %v13008_v57 = vrot.slane %v9087_v48, 3  ;;  %v11188_v28 = vld [vmem:[%s15349_s1 + $0xb20] ss:$8 sps:$4 sm:$0xff]   ;;  %v11193_v48 = vld [vmem:[%s15349_s1 + $0xb34] ss:$8 sps:$4 sm:$0xff]  }
 0x207   :  { %3093 = vmatpush1.bf16.msra.mxu0 %v11081_v59  ;;  %v2591_v59 = vsel %vm2579_vm2, %v2589_v56, %v13008_v57  ;;  %v11196_v56 = vld [vmem:[%s15349_s1 + $0xb44] ss:$8 sps:$4 sm:$0xff]  }
 0x208   :  { %3094 = vmatprep.subr.bf16.mxu0 %v11086_v61  ;;  %v11139_v61 = vld [vmem:[%s15349_s1 + $0xa30] ss:$8 sps:$4 sm:$0xff]  }
 0x20a   :  { %2408 = vmatmul.mubr.bf16.gmra.mrb[32].mxu0 %v1766_v47  ;;  %v11135_v47 = vld [vmem:[%s15349_s1 + $0xa14] ss:$8 sps:$4 sm:$0xff]  }
 0x20b   :  { %3095 = vmatpush1.bf16.msra.mxu0 %v11084_v0  ;;  %3122 = vmatprep.mubr.bf16.mxu0 %v2585_v2  ;;  %v11147_v0 = vld [vmem:[%s15349_s1 + $0xa54] ss:$8 sps:$4 sm:$0xff]   ;;  %v11150_v2 = vld [vmem:[%s15349_s1 + $0xa64] ss:$8 sps:$4 sm:$0xff]  }
 0x20c   :  { %3096 = vmatprep.subr.bf16.mxu0 %v11089_v1  ;;  %v11145_v1 = vld [vmem:[%s15349_s1 + $0xa50] ss:$8 sps:$4 sm:$0xff]  }
 0x20f   :  { %3097 = vmatpush1.bf16.msra.mxu0 %v11087_v3  ;;  %v11148_v3 = vld [vmem:[%s15349_s1 + $0xa60] ss:$8 sps:$4 sm:$0xff]  }
 0x210   :  { %3098 = vmatprep.subr.bf16.mxu0 %v11092_v5  ;;  %v11153_v5 = vld [vmem:[%s15349_s1 + $0xa74] ss:$8 sps:$4 sm:$0xff]  }
 0x213   :  { %3099 = vmatpush1.bf16.msra.mxu0 %v11090_v7  ;;  %v11151_v7 = vld [vmem:[%s15349_s1 + $0xa70] ss:$8 sps:$4 sm:$0xff]  }
 0x214   :  { %3100 = vmatprep.subr.bf16.mxu0 %v11095_v8  ;;  %v11156_v8 = vld [vmem:[%s15349_s1 + $0xa84] ss:$8 sps:$4 sm:$0xff]  }
 0x217   :  { %3101 = vmatpush1.bf16.msra.mxu0 %v11093_v9 }
 0x218   :  { %3102 = vmatprep.subr.bf16.mxu0 %v11098_v11 }
 0x21b   :  { %3103 = vmatpush1.bf16.msra.mxu0 %v11096_v12  ;;  %v11154_v12 = vld [vmem:[%s15349_s1 + $0xa80] ss:$8 sps:$4 sm:$0xff]  }
 0x21c   :  { %3104 = vmatprep.subr.bf16.mxu0 %v11101_v13 }
 0x21d   :  { %v1612_v16 = vpop.f32.mrb[20].mxu0 }
 0x21e   :  { %v12918_v17 = vadd.f32 %v1612_v16, %v12787_v23  ;;  %v1614_v18 = vpop.f32.mrb[21].mxu0  ;;  %v11105_v23 = vld [vmem:[%s15349_s1 + $0x990] ss:$8 sps:$4 sm:$0xff]  }
 0x21f   :  { %v12921_v19 = vadd.f32 %v1614_v18, %v12790_v25  ;;  %3105 = vmatpush1.bf16.msra.mxu0 %v11099_v14  ;;  %v1616_v21 = vpop.f32.mrb[22].mxu0  ;;  %v11110_v25 = vld [vmem:[%s15349_s1 + $0x9a4] ss:$8 sps:$4 sm:$0xff]   ;;  %v11159_v14 = vld [vmem:[%s15349_s1 + $0xa94] ss:$8 sps:$4 sm:$0xff]  }
 0x220   :  { %3106 = vmatprep.subr.bf16.mxu0 %v11104_v15  ;;  %v1617_v24 = vpop.f32.mrb[23].mxu0  ;;  %v11157_v16 = vld [vmem:[%s15349_s1 + $0xa90] ss:$8 sps:$4 sm:$0xff]   ;;  %v11162_v18 = vld [vmem:[%s15349_s1 + $0xaa4] ss:$8 sps:$4 sm:$0xff]  }
 0x221   :  { %v11165_v21 = vld [vmem:[%s15349_s1 + $0xab4] ss:$8 sps:$4 sm:$0xff]   ;;  %v11168_v24 = vld [vmem:[%s15349_s1 + $0xac4] ss:$8 sps:$4 sm:$0xff]  }
 0x223   :  { %3107 = vmatpush1.bf16.msra.mxu0 %v11102_v20  ;;  %v11160_v20 = vld [vmem:[%s15349_s1 + $0xaa0] ss:$8 sps:$4 sm:$0xff]  }
 0x224   :  { %3108 = vmatprep.subr.bf16.mxu0 %v11107_v22  ;;  %v11163_v22 = vld [vmem:[%s15349_s1 + $0xab0] ss:$8 sps:$4 sm:$0xff]  }
 0x227   :  { %3109 = vmatpush1.bf16.msra.mxu0 %v11105_v23  ;;  %v11166_v23 = vld [vmem:[%s15349_s1 + $0xac0] ss:$8 sps:$4 sm:$0xff]  }
 0x228   :  { %3110 = vmatprep.subr.bf16.mxu0 %v11110_v25  ;;  %v11171_v25 = vld [vmem:[%s15349_s1 + $0xad4] ss:$8 sps:$4 sm:$0xff]  }
 0x22b   :  { %3111 = vmatpush1.bf16.msra.mxu0 %v11108_v26  ;;  %v11169_v26 = vld [vmem:[%s15349_s1 + $0xad0] ss:$8 sps:$4 sm:$0xff]  }
 0x22c   :  { %3112 = vmatprep.subr.bf16.mxu0 %v11113_v27  ;;  %v11174_v27 = vld [vmem:[%s15349_s1 + $0xae4] ss:$8 sps:$4 sm:$0xff]  }
 0x22f   :  { %3113 = vmatpush1.bf16.msra.mxu0 %v11111_v29  ;;  %v11172_v29 = vld [vmem:[%s15349_s1 + $0xae0] ss:$8 sps:$4 sm:$0xff]  }
 0x230   :  { %3114 = vmatprep.subr.bf16.mxu0 %v11116_v30  ;;  %v9080_v30 = vcombine.low %v12978_v10, %v12983_v43 }
 0x233   :  { %3115 = vmatpush1.bf16.msra.mxu0 %v11114_v31  ;;  %v9086_v31 = vcombine.low %v12600_v4, %v12988_v44  ;;  %v13107_v4 = vld [vmem:[%s15350_s0 + $0x10] sm:$0x88] }
 0x234   :  { %3116 = vmatprep.subr.bf16.mxu0 %v11119_v32  ;;  %v11177_v32 = vld [vmem:[%s15349_s1 + $0xaf4] ss:$8 sps:$4 sm:$0xff]   ;;  %v11185_v44 = vld [vmem:[%s15349_s1 + $0xb10] ss:$8 sps:$4 sm:$0xff]  }
 0x237   :  { %3117 = vmatpush1.bf16.msra.mxu0 %v11117_v33  ;;  %v11175_v33 = vld [vmem:[%s15349_s1 + $0xaf0] ss:$8 sps:$4 sm:$0xff]  }
 0x238   :  { %3118 = vmatprep.subr.bf16.mxu0 %v11122_v34  ;;  %v2586_v34 = vrot.slane %v9080_v30, 3 }
 0x23b   :  { %3119 = vmatpush1.bf16.msra.mxu0 %v11120_v35  ;;  %v2587_v35 = vrot.slane %v9086_v31, 3 }
 0x23c   :  { %3120 = vmatprep.subr.bf16.mxu0 %v11125_v38  ;;  %v13117_v38 = vld [vmem:[%s15350_s0 + $0x58] sm:$0x11] }
 0x23d   :  { %v9089_v10 = vcombine.high %v12726_v60, %v13117_v38 }
 0x23f   :  { %3121 = vmatpush1.bf16.msra.mxu0 %v11123_v39  ;;  %v2588_v39 = vsel %vm2579_vm2, %v2586_v34, %v2587_v35  ;;  %v11239_v34 = vld [vmem:[%s15349_s1 + $0xc14] ss:$8 sps:$4 sm:$0xff]  }
 0x240   :  { %3141 = vmatprep.subr.bf16.mxu0 %v11132_v42  ;;  %v9083_v42 = vcombine.high %v13107_v4, %v13112_v37 }
 0x242   :  { %3123 = vmatmul.mubr.bf16.vlgmr.msra.gmra.mrb[0].mxu0 %v2582_v46  ;;  %v2595_v46 = vrot.slane %v9083_v42, 3  ;;  %v11248_v42 = vld [vmem:[%s15349_s1 + $0xc44] ss:$8 sps:$4 sm:$0xff]  }
 0x243   :  { %3142 = vmatpush1.bf16.msra.mxu0 %v11130_v45  ;;  %3132 = vmatprep.mubr.bf16.mxu0 %v12877_v63  ;;  %v11142_v63 = vld [vmem:[%s15349_s1 + $0xa40] ss:$8 sps:$4 sm:$0xff]   ;;  %v11190_v45 = vld [vmem:[%s15349_s1 + $0xb24] ss:$8 sps:$4 sm:$0xff]  }
 0x244   :  { %3143 = vmatprep.subr.bf16.mxu0 %v11135_v47  ;;  %v13137_v47 = vrot.slane %v9089_v10, 3  ;;  %v11246_v10 = vld [vmem:[%s15349_s1 + $0xc40] ss:$8 sps:$4 sm:$0xff]  }
 0x247   :  { %3144 = vmatpush1.bf16.msra.mxu0 %v11133_v51  ;;  %v2597_v51 = vsel %vm2579_vm2, %v2595_v46, %v13137_v47  ;;  %v11254_v46 = vld [vmem:[%s15349_s1 + $0xc64] ss:$8 sps:$4 sm:$0xff]  }
 0x248   :  { %3145 = vmatprep.subr.bf16.mxu0 %v11138_v55  ;;  %v11191_v55 = vld [vmem:[%s15349_s1 + $0xb30] ss:$8 sps:$4 sm:$0xff]  }
 0x24a   :  { %3133 = vmatmul.mubr.bf16.gmra.mrb[36].mxu0 %v2581_v41  ;;  %v11187_v41 = vld [vmem:[%s15349_s1 + $0xb14] ss:$8 sps:$4 sm:$0xff]  }
 0x24b   :  { %3146 = vmatpush1.bf16.msra.mxu0 %v11136_v58  ;;  %3173 = vmatprep.mubr.bf16.mxu0 %v2591_v59  ;;  %v11199_v58 = vld [vmem:[%s15349_s1 + $0xb54] ss:$8 sps:$4 sm:$0xff]   ;;  %v11202_v59 = vld [vmem:[%s15349_s1 + $0xb64] ss:$8 sps:$4 sm:$0xff]  }
 0x24c   :  { %3147 = vmatprep.subr.bf16.mxu0 %v11141_v52  ;;  %v11197_v52 = vld [vmem:[%s15349_s1 + $0xb50] ss:$8 sps:$4 sm:$0xff]  }
 0x24f   :  { %3148 = vmatpush1.bf16.msra.mxu0 %v11139_v61  ;;  %v11200_v61 = vld [vmem:[%s15349_s1 + $0xb60] ss:$8 sps:$4 sm:$0xff]  }
 0x250   :  { %3149 = vmatprep.subr.bf16.mxu0 %v11144_v62  ;;  %v11205_v62 = vld [vmem:[%s15349_s1 + $0xb74] ss:$8 sps:$4 sm:$0xff]  }
 0x253   :  { %3150 = vmatpush1.bf16.msra.mxu0 %v11142_v63  ;;  %v11203_v63 = vld [vmem:[%s15349_s1 + $0xb70] ss:$8 sps:$4 sm:$0xff]  }
 0x254   :  { %3151 = vmatprep.subr.bf16.mxu0 %v11147_v0  ;;  %v11208_v0 = vld [vmem:[%s15349_s1 + $0xb84] ss:$8 sps:$4 sm:$0xff]  }
 0x257   :  { %3152 = vmatpush1.bf16.msra.mxu0 %v11145_v1 }
 0x258   :  { %3153 = vmatprep.subr.bf16.mxu0 %v11150_v2 }
 0x25b   :  { %3154 = vmatpush1.bf16.msra.mxu0 %v11148_v3 }
 0x25c   :  { %3155 = vmatprep.subr.bf16.mxu0 %v11153_v5 }
 0x25d   :  { %v13048_v9 = vpop.f32.mrb[24].mxu0 }
 0x25e   :  { %v13050_v11 = vpop.f32.mrb[25].mxu0 }
 0x25f   :  { %3156 = vmatpush1.bf16.msra.mxu0 %v11151_v7  ;;  %v2311_v13 = vpop.f32.mrb[26].mxu0  ;;  %v11206_v7 = vld [vmem:[%s15349_s1 + $0xb80] ss:$8 sps:$4 sm:$0xff]  }
 0x260   :  { %3157 = vmatprep.subr.bf16.mxu0 %v11156_v8  ;;  %v2312_v15 = vpop.f32.mrb[27].mxu0 }
 0x261   :  { %v11217_v15 = vld [vmem:[%s15349_s1 + $0xbb4] ss:$8 sps:$4 sm:$0xff]  }
 0x263   :  { %3158 = vmatpush1.bf16.msra.mxu0 %v11154_v12  ;;  %v11211_v12 = vld [vmem:[%s15349_s1 + $0xb94] ss:$8 sps:$4 sm:$0xff]  }
 0x264   :  { %3159 = vmatprep.subr.bf16.mxu0 %v11159_v14  ;;  %v11212_v14 = vld [vmem:[%s15349_s1 + $0xba0] ss:$8 sps:$4 sm:$0xff]  }
 0x267   :  { %3160 = vmatpush1.bf16.msra.mxu0 %v11157_v16  ;;  %v11215_v16 = vld [vmem:[%s15349_s1 + $0xbb0] ss:$8 sps:$4 sm:$0xff]  }
 0x268   :  { %3161 = vmatprep.subr.bf16.mxu0 %v11162_v18  ;;  %v11220_v18 = vld [vmem:[%s15349_s1 + $0xbc4] ss:$8 sps:$4 sm:$0xff]  }
 0x26b   :  { %3162 = vmatpush1.bf16.msra.mxu0 %v11160_v20  ;;  %v11218_v20 = vld [vmem:[%s15349_s1 + $0xbc0] ss:$8 sps:$4 sm:$0xff]  }
 0x26c   :  { %3163 = vmatprep.subr.bf16.mxu0 %v11165_v21  ;;  %v11223_v21 = vld [vmem:[%s15349_s1 + $0xbd4] ss:$8 sps:$4 sm:$0xff]  }
 0x26f   :  { %3164 = vmatpush1.bf16.msra.mxu0 %v11163_v22  ;;  %v11221_v22 = vld [vmem:[%s15349_s1 + $0xbd0] ss:$8 sps:$4 sm:$0xff]  }
 0x270   :  { %3165 = vmatprep.subr.bf16.mxu0 %v11168_v24  ;;  %v11226_v24 = vld [vmem:[%s15349_s1 + $0xbe4] ss:$8 sps:$4 sm:$0xff]  }
 0x273   :  { %3166 = vmatpush1.bf16.msra.mxu0 %v11166_v23  ;;  %v11224_v23 = vld [vmem:[%s15349_s1 + $0xbe0] ss:$8 sps:$4 sm:$0xff]  }
 0x274   :  { %3167 = vmatprep.subr.bf16.mxu0 %v11171_v25  ;;  %v9082_v25 = vcombine.low %v13107_v4, %v13112_v37  ;;  %v11240_v4 = vld [vmem:[%s15349_s1 + $0xc20] ss:$8 sps:$4 sm:$0xff]  }
 0x276   :  { %v2592_v30 = vrot.slane %v9082_v25, 3  ;;  %v11290_v25 = vld [vmem:[%s15349_s1 + $0xd20] ss:$8 sps:$4 sm:$0xff]  }
 0x277   :  { %3168 = vmatpush1.bf16.msra.mxu0 %v11169_v26  ;;  %v9088_v26 = vcombine.low %v12726_v60, %v13117_v38  ;;  %v13255_v38 = vld [vmem:[%s15350_s0 + $0x30] sm:$0xff] }
 0x278   :  { %3169 = vmatprep.subr.bf16.mxu0 %v11174_v27  ;;  %v11229_v27 = vld [vmem:[%s15349_s1 + $0xbf4] ss:$8 sps:$4 sm:$0xff]  }
 0x279   :  { %v2593_v31 = vrot.slane %v9088_v26, 3  ;;  %v13371_v26 = vld [vmem:[%s15350_s0 + $0x38] sm:$0xff] }
 0x27b   :  { %3170 = vmatpush1.bf16.msra.mxu0 %v11172_v29  ;;  %v11227_v29 = vld [vmem:[%s15349_s1 + $0xbf0] ss:$8 sps:$4 sm:$0xff]   ;;  %v2594_v60 = vsel %vm2579_vm2, %v2592_v30, %v2593_v31 }
 0x27c   :  { %3171 = vmatprep.subr.bf16.mxu0 %v11177_v32  ;;  %v11236_v32 = vld [vmem:[%s15349_s1 + $0xc04] ss:$8 sps:$4 sm:$0xff]   ;;  %v11293_v30 = vld [vmem:[%s15349_s1 + $0xd30] ss:$8 sps:$4 sm:$0xff]  }
 0x27f   :  { %3172 = vmatpush1.bf16.msra.mxu0 %v11175_v33  ;;  %v11234_v33 = vld [vmem:[%s15349_s1 + $0xc00] ss:$8 sps:$4 sm:$0xff]  }
 0x280   :  { %3192 = vmatprep.subr.bf16.mxu0 %v11184_v36  ;;  %v11242_v36 = vld [vmem:[%s15349_s1 + $0xc24] ss:$8 sps:$4 sm:$0xff]  }
 0x282   :  { %3174 = vmatmul.mubr.bf16.vlgmr.msra.gmra.mrb[0].mxu0 %v2588_v39  ;;  %v9283_v39 = vcombine.high %v12852_v49, %v13255_v38 }
 0x283   :  { %3193 = vmatpush1.bf16.msra.mxu0 %v11182_v40  ;;  %3183 = vmatprep.mubr.bf16.mxu0 %v13008_v57  ;;  %v11194_v57 = vld [vmem:[%s15349_s1 + $0xb40] ss:$8 sps:$4 sm:$0xff]   ;;  %v11245_v40 = vld [vmem:[%s15349_s1 + $0xc34] ss:$8 sps:$4 sm:$0xff]  }
 0x284   :  { %3194 = vmatprep.subr.bf16.mxu0 %v11187_v41  ;;  %v11243_v41 = vld [vmem:[%s15349_s1 + $0xc30] ss:$8 sps:$4 sm:$0xff]  }
 0x287   :  { %3195 = vmatpush1.bf16.msra.mxu0 %v11185_v44  ;;  %v11251_v44 = vld [vmem:[%s15349_s1 + $0xc54] ss:$8 sps:$4 sm:$0xff]  }
 0x288   :  { %3196 = vmatprep.subr.bf16.mxu0 %v11190_v45  ;;  %v11249_v45 = vld [vmem:[%s15349_s1 + $0xc50] ss:$8 sps:$4 sm:$0xff]  }
 0x28a   :  { %3184 = vmatmul.mubr.bf16.gmra.mrb[40].mxu0 %v2587_v35  ;;  %v11237_v35 = vld [vmem:[%s15349_s1 + $0xc10] ss:$8 sps:$4 sm:$0xff]  }
 0x28b   :  { %3197 = vmatpush1.bf16.msra.mxu0 %v11188_v28  ;;  %3224 = vmatprep.mubr.bf16.mxu0 %v2597_v51  ;;  %v11257_v28 = vld [vmem:[%s15349_s1 + $0xc74] ss:$8 sps:$4 sm:$0xff]   ;;  %v11260_v51 = vld [vmem:[%s15349_s1 + $0xc84] ss:$8 sps:$4 sm:$0xff]  }
 0x28c   :  { %3198 = vmatprep.subr.bf16.mxu0 %v11193_v48  ;;  %v11255_v48 = vld [vmem:[%s15349_s1 + $0xc70] ss:$8 sps:$4 sm:$0xff]  }
 0x28f   :  { %3199 = vmatpush1.bf16.msra.mxu0 %v11191_v55 }
 0x290   :  { %3200 = vmatprep.subr.bf16.mxu0 %v11196_v56 }
 0x293   :  { %3201 = vmatpush1.bf16.msra.mxu0 %v11194_v57 }
 0x294   :  { %3202 = vmatprep.subr.bf16.mxu0 %v11199_v58 }
 0x297   :  { %3203 = vmatpush1.bf16.msra.mxu0 %v11197_v52  ;;  %v11258_v52 = vld [vmem:[%s15349_s1 + $0xc80] ss:$8 sps:$4 sm:$0xff]  }
 0x298   :  { %3204 = vmatprep.subr.bf16.mxu0 %v11202_v59 }
 0x29b   :  { %3205 = vmatpush1.bf16.msra.mxu0 %v11200_v61 }
 0x29c   :  { %3206 = vmatprep.subr.bf16.mxu0 %v11205_v62  ;;  %v11263_v62 = vld [vmem:[%s15349_s1 + $0xc94] ss:$8 sps:$4 sm:$0xff]  }
 0x29d   :  { %v2358_v1 = vpop.f32.mrb[28].mxu0 }
 0x29e   :  { %v13178_v2 = vadd.f32 %v2358_v1, %v13048_v9  ;;  %v2360_v3 = vpop.f32.mrb[29].mxu0  ;;  %v11209_v9 = vld [vmem:[%s15349_s1 + $0xb90] ss:$8 sps:$4 sm:$0xff]  }
 0x29f   :  { %v13181_v5 = vadd.f32 %v2360_v3, %v13050_v11  ;;  %3207 = vmatpush1.bf16.msra.mxu0 %v11203_v63  ;;  %v2362_v8 = vpop.f32.mrb[30].mxu0  ;;  %v11214_v11 = vld [vmem:[%s15349_s1 + $0xba4] ss:$8 sps:$4 sm:$0xff]   ;;  %v11261_v1 = vld [vmem:[%s15349_s1 + $0xc90] ss:$8 sps:$4 sm:$0xff]  }
 0x2a0   :  { %3208 = vmatprep.subr.bf16.mxu0 %v11208_v0  ;;  %v2363_v13 = vpop.f32.mrb[31].mxu0  ;;  %v11267_v3 = vld [vmem:[%s15349_s1 + $0xcb0] ss:$8 sps:$4 sm:$0xff]   ;;  %v11275_v8 = vld [vmem:[%s15349_s1 + $0xcd4] ss:$8 sps:$4 sm:$0xff]  }
 0x2a1   :  { %v11278_v13 = vld [vmem:[%s15349_s1 + $0xce4] ss:$8 sps:$4 sm:$0xff]  }
 0x2a3   :  { %3209 = vmatpush1.bf16.msra.mxu0 %v11206_v7  ;;  %v11270_v7 = vld [vmem:[%s15349_s1 + $0xcc0] ss:$8 sps:$4 sm:$0xff]  }
 0x2a4   :  { %3210 = vmatprep.subr.bf16.mxu0 %v11211_v12  ;;  %v11273_v12 = vld [vmem:[%s15349_s1 + $0xcd0] ss:$8 sps:$4 sm:$0xff]  }
 0x2a7   :  { %3211 = vmatpush1.bf16.msra.mxu0 %v11209_v9  ;;  %v11276_v9 = vld [vmem:[%s15349_s1 + $0xce0] ss:$8 sps:$4 sm:$0xff]  }
 0x2a8   :  { %3212 = vmatprep.subr.bf16.mxu0 %v11214_v11  ;;  %v11281_v11 = vld [vmem:[%s15349_s1 + $0xcf4] ss:$8 sps:$4 sm:$0xff]  }
 0x2ab   :  { %3213 = vmatpush1.bf16.msra.mxu0 %v11212_v14  ;;  %v11279_v14 = vld [vmem:[%s15349_s1 + $0xcf0] ss:$8 sps:$4 sm:$0xff]  }
 0x2ac   :  { %3214 = vmatprep.subr.bf16.mxu0 %v11217_v15  ;;  %v11285_v15 = vld [vmem:[%s15349_s1 + $0xd04] ss:$8 sps:$4 sm:$0xff]  }
 0x2af   :  { %3215 = vmatpush1.bf16.msra.mxu0 %v11215_v16  ;;  %v3249_v16 = vld [vmem:[%s15350_s0 + $0x48] sm:$0x33] }
 0x2b0   :  { %3216 = vmatprep.subr.bf16.mxu0 %v11220_v18  ;;  %v9282_v18 = vcombine.low %v12852_v49, %v13255_v38  ;;  %v11292_v49 = vld [vmem:[%s15349_s1 + $0xd24] ss:$8 sps:$4 sm:$0xff]  }
 0x2b1   :  { %v11310_v38 = vld [vmem:[%s15349_s1 + $0xd84] ss:$8 sps:$4 sm:$0xff]  }
 0x2b3   :  { %3217 = vmatpush1.bf16.msra.mxu0 %v11218_v20  ;;  %v11283_v20 = vld [vmem:[%s15349_s1 + $0xd00] ss:$8 sps:$4 sm:$0xff]  }
 0x2b4   :  { %3218 = vmatprep.subr.bf16.mxu0 %v11223_v21  ;;  %v9289_v21 = vcombine.high %v3249_v16, %v3249_v16 }
 0x2b7   :  { %3219 = vmatpush1.bf16.msra.mxu0 %v11221_v22  ;;  %v11289_v22 = vld [vmem:[%s15349_s1 + $0xd14] ss:$8 sps:$4 sm:$0xff]  }
 0x2b8   :  { %3220 = vmatprep.subr.bf16.mxu0 %v11226_v24  ;;  %v11287_v24 = vld [vmem:[%s15349_s1 + $0xd10] ss:$8 sps:$4 sm:$0xff]  }
 0x2bb   :  { %3221 = vmatpush1.bf16.msra.mxu0 %v11224_v23  ;;  %v9288_v23 = vcombine.low %v3249_v16, %v3249_v16  ;;  %v11355_v16 = vld [vmem:[%s15349_s1 + $0xe54] ss:$8 sps:$4 sm:$0xff]  }
 0x2bc   :  { %3222 = vmatprep.subr.bf16.mxu0 %v11229_v27  ;;  %v9285_v27 = vcombine.high %v12983_v43, %v13371_v26 }
 0x2bf   :  { %3223 = vmatpush1.bf16.msra.mxu0 %v11227_v29  ;;  %v11295_v29 = vld [vmem:[%s15349_s1 + $0xd34] ss:$8 sps:$4 sm:$0xff]  }
 0x2c0   :  { %3862 = vmatprep.subr.bf16.mxu0 %v11236_v32  ;;  %v11296_v32 = vld [vmem:[%s15349_s1 + $0xd40] ss:$8 sps:$4 sm:$0xff]  }
 0x2c2   :  { %3225 = vmatmul.mubr.bf16.vlgmr.msra.gmra.mrb[0].mxu0 %v2594_v60  ;;  %v11301_v60 = vld [vmem:[%s15349_s1 + $0xd54] ss:$8 sps:$4 sm:$0xff]  }
 0x2c3   :  { %3863 = vmatpush1.bf16.msra.mxu0 %v11234_v33  ;;  %3234 = vmatprep.mubr.bf16.mxu0 %v13137_v47  ;;  %v11252_v47 = vld [vmem:[%s15349_s1 + $0xc60] ss:$8 sps:$4 sm:$0xff]   ;;  %v11299_v33 = vld [vmem:[%s15349_s1 + $0xd50] ss:$8 sps:$4 sm:$0xff]  }
 0x2c4   :  { %3864 = vmatprep.subr.bf16.mxu0 %v11239_v34  ;;  %v11304_v34 = vld [vmem:[%s15349_s1 + $0xd64] ss:$8 sps:$4 sm:$0xff]  }
 0x2c7   :  { %3865 = vmatpush1.bf16.msra.mxu0 %v11237_v35  ;;  %v11302_v35 = vld [vmem:[%s15349_s1 + $0xd60] ss:$8 sps:$4 sm:$0xff]  }
 0x2c8   :  { %3866 = vmatprep.subr.bf16.mxu0 %v11242_v36  ;;  %v11307_v36 = vld [vmem:[%s15349_s1 + $0xd74] ss:$8 sps:$4 sm:$0xff]  }
 0x2ca   :  { %3235 = vmatmul.mubr.bf16.gmra.mrb[44].mxu0 %v2593_v31  ;;  %v11298_v31 = vld [vmem:[%s15349_s1 + $0xd44] ss:$8 sps:$4 sm:$0xff]  }
 0x2cb   :  { %3867 = vmatpush1.bf16.msra.mxu0 %v11240_v4  ;;  %3894 = vmatprep.mubr.bf16.mxu0 %v9283_v39  ;;  %v11305_v4 = vld [vmem:[%s15349_s1 + $0xd70] ss:$8 sps:$4 sm:$0xff]  }
 0x2cc   :  { %3868 = vmatprep.subr.bf16.mxu0 %v11245_v40 }
 0x2cf   :  { %3869 = vmatpush1.bf16.msra.mxu0 %v11243_v41  ;;  %v11308_v41 = vld [vmem:[%s15349_s1 + $0xd80] ss:$8 sps:$4 sm:$0xff]  }
 0x2d0   :  { %3870 = vmatprep.subr.bf16.mxu0 %v11248_v42 }
 0x2d3   :  { %3871 = vmatpush1.bf16.msra.mxu0 %v11246_v10  ;;  %v11313_v10 = vld [vmem:[%s15349_s1 + $0xd94] ss:$8 sps:$4 sm:$0xff]  }
 0x2d4   :  { %3872 = vmatprep.subr.bf16.mxu0 %v11251_v44 }
 0x2d7   :  { %3873 = vmatpush1.bf16.msra.mxu0 %v11249_v45  ;;  %v11311_v45 = vld [vmem:[%s15349_s1 + $0xd90] ss:$8 sps:$4 sm:$0xff]  }
 0x2d8   :  { %3874 = vmatprep.subr.bf16.mxu0 %v11254_v46  ;;  %v11316_v46 = vld [vmem:[%s15349_s1 + $0xda4] ss:$8 sps:$4 sm:$0xff]  }
 0x2db   :  { %3875 = vmatpush1.bf16.msra.mxu0 %v11252_v47  ;;  %v11314_v47 = vld [vmem:[%s15349_s1 + $0xda0] ss:$8 sps:$4 sm:$0xff]  }
 0x2dc   :  { %3876 = vmatprep.subr.bf16.mxu0 %v11257_v28  ;;  %v11319_v28 = vld [vmem:[%s15349_s1 + $0xdb4] ss:$8 sps:$4 sm:$0xff]  }
 0x2dd   :  { %v2409_v55 = vpop.f32.mrb[32].mxu0 }
 0x2de   :  { %v2410_v56 = vadd.f32 %v2409_v55, %v13178_v2  ;;  %v2411_v57 = vpop.f32.mrb[33].mxu0  ;;  %v11264_v2 = vld [vmem:[%s15349_s1 + $0xca0] ss:$8 sps:$4 sm:$0xff]  }
 0x2df   :  { %v2412_v58 = vadd.f32 %v2411_v57, %v13181_v5  ;;  %3877 = vmatpush1.bf16.msra.mxu0 %v11255_v48  ;;  %v2413_v59 = vpop.f32.mrb[34].mxu0  ;;  %v11272_v5 = vld [vmem:[%s15349_s1 + $0xcc4] ss:$8 sps:$4 sm:$0xff]   ;;  %v11317_v48 = vld [vmem:[%s15349_s1 + $0xdb0] ss:$8 sps:$4 sm:$0xff]  }
 0x2e0   :  { %v13298_v61 = vadd.f32 %v2410_v56, %v12918_v17  ;;  %3878 = vmatprep.subr.bf16.mxu0 %v11260_v51  ;;  %v2414_v63 = vpop.f32.mrb[35].mxu0  ;;  %v11266_v17 = vld [vmem:[%s15349_s1 + $0xca4] ss:$8 sps:$4 sm:$0xff]   ;;  %v11320_v55 = vld [vmem:[%s15349_s1 + $0xdc0] ss:$8 sps:$4 sm:$0xff]  }
 0x2e1   :  { %v13304_v0 = vadd.f32 %v2412_v58, %v12921_v19  ;;  %v11269_v19 = vld [vmem:[%s15349_s1 + $0xcb4] ss:$8 sps:$4 sm:$0xff]   ;;  %v11322_v51 = vld [vmem:[%s15349_s1 + $0xdc4] ss:$8 sps:$4 sm:$0xff]   ;;  %v11323_v57 = vld [vmem:[%s15349_s1 + $0xdd0] ss:$8 sps:$4 sm:$0xff]  }
 0x2e2   :  { %v11325_v56 = vld [vmem:[%s15349_s1 + $0xdd4] ss:$8 sps:$4 sm:$0xff]   ;;  %v11330_v58 = vld [vmem:[%s15349_s1 + $0xde4] ss:$8 sps:$4 sm:$0xff]  }
 0x2e3   :  { %3879 = vmatpush1.bf16.msra.mxu0 %v11258_v52  ;;  %v11328_v52 = vld [vmem:[%s15349_s1 + $0xde0] ss:$8 sps:$4 sm:$0xff]   ;;  %v11333_v59 = vld [vmem:[%s15349_s1 + $0xdf4] ss:$8 sps:$4 sm:$0xff]   ;;  %v11338_v63 = vld [vmem:[%s15349_s1 + $0xe04] ss:$8 sps:$4 sm:$0xff]  }
 0x2e4   :  { %3880 = vmatprep.subr.bf16.mxu0 %v11263_v62  ;;  %v11331_v62 = vld [vmem:[%s15349_s1 + $0xdf0] ss:$8 sps:$4 sm:$0xff]  }
 0x2e7   :  { %3881 = vmatpush1.bf16.msra.mxu0 %v11261_v1  ;;  %v3250_v1 = vld [vmem:[%s15350_s0 + $0x50] sm:$0x33] }
 0x2e8   :  { %3882 = vmatprep.subr.bf16.mxu0 %v11266_v17  ;;  %v9284_v17 = vcombine.low %v12983_v43, %v13371_v26  ;;  %v11346_v43 = vld [vmem:[%s15349_s1 + $0xe24] ss:$8 sps:$4 sm:$0xff]  }
 0x2eb   :  { %3883 = vmatpush1.bf16.msra.mxu0 %v11264_v2  ;;  %v11336_v2 = vld [vmem:[%s15349_s1 + $0xe00] ss:$8 sps:$4 sm:$0xff]  }
 0x2ec   :  { %3884 = vmatprep.subr.bf16.mxu0 %v11269_v19  ;;  %v9291_v19 = vcombine.high %v3250_v1, %v3250_v1 }
 0x2ef   :  { %3885 = vmatpush1.bf16.msra.mxu0 %v11267_v3  ;;  %v11341_v3 = vld [vmem:[%s15349_s1 + $0xe14] ss:$8 sps:$4 sm:$0xff]  }
 0x2f0   :  { %3886 = vmatprep.subr.bf16.mxu0 %v11272_v5  ;;  %v11339_v5 = vld [vmem:[%s15349_s1 + $0xe10] ss:$8 sps:$4 sm:$0xff]  }
 0x2f3   :  { %3887 = vmatpush1.bf16.msra.mxu0 %v11270_v7  ;;  %v9290_v7 = vcombine.low %v3250_v1, %v3250_v1 }
 0x2f4   :  { %3888 = vmatprep.subr.bf16.mxu0 %v11275_v8  ;;  %v11344_v8 = vld [vmem:[%s15349_s1 + $0xe20] ss:$8 sps:$4 sm:$0xff]  }
 0x2f7   :  { %3889 = vmatpush1.bf16.msra.mxu0 %v11273_v12  ;;  %v13483_v12 = vld [vmem:[%s15350_s0 + $0x40] sm:$0xff] }
 0x2f8   :  { %3890 = vmatprep.subr.bf16.mxu0 %v11278_v13  ;;  %v9287_v13 = vcombine.high %v13112_v37, %v13483_v12 }
 0x2fb   :  { %3891 = vmatpush1.bf16.msra.mxu0 %v11276_v9  ;;  %v11349_v9 = vld [vmem:[%s15349_s1 + $0xe34] ss:$8 sps:$4 sm:$0xff]  }
 0x2fc   :  { %3892 = vmatprep.subr.bf16.mxu0 %v11281_v11  ;;  %v11347_v11 = vld [vmem:[%s15349_s1 + $0xe30] ss:$8 sps:$4 sm:$0xff]  }
 0x2ff   :  { %3893 = vmatpush1.bf16.msra.mxu0 %v11279_v14  ;;  %v11352_v14 = vld [vmem:[%s15349_s1 + $0xe44] ss:$8 sps:$4 sm:$0xff]  }
 0x300   :  { %3913 = vmatprep.subr.bf16.mxu0 %v11285_v15  ;;  %v11350_v15 = vld [vmem:[%s15349_s1 + $0xe40] ss:$8 sps:$4 sm:$0xff]  }
 0x302   :  { %3895 = vmatmul.mubr.bf16.vlgmr.msra.gmra.mrb[0].mxu0 %v9282_v18  ;;  %v11353_v18 = vld [vmem:[%s15349_s1 + $0xe50] ss:$8 sps:$4 sm:$0xff]  }
 0x303   :  { %3914 = vmatpush1.bf16.msra.mxu0 %v11283_v20  ;;  %3904 = vmatprep.mubr.bf16.mxu0 %v9289_v21  ;;  %v11358_v20 = vld [vmem:[%s15349_s1 + $0xe64] ss:$8 sps:$4 sm:$0xff]   ;;  %v11356_v21 = vld [vmem:[%s15349_s1 + $0xe60] ss:$8 sps:$4 sm:$0xff]  }
 0x304   :  { %3915 = vmatprep.subr.bf16.mxu0 %v11289_v22  ;;  %v11361_v22 = vld [vmem:[%s15349_s1 + $0xe74] ss:$8 sps:$4 sm:$0xff]  }
 0x307   :  { %3916 = vmatpush1.bf16.msra.mxu0 %v11287_v24  ;;  %v11359_v24 = vld [vmem:[%s15349_s1 + $0xe70] ss:$8 sps:$4 sm:$0xff]  }
 0x308   :  { %3917 = vmatprep.subr.bf16.mxu0 %v11292_v49  ;;  %v11364_v49 = vld [vmem:[%s15349_s1 + $0xe84] ss:$8 sps:$4 sm:$0xff]  }
 0x30a   :  { %3905 = vmatmul.mubr.bf16.gmra.mrb[48].mxu0 %v9288_v23 }
 0x30b   :  { %3918 = vmatpush1.bf16.msra.mxu0 %v11290_v25  ;;  %3945 = vmatprep.mubr.bf16.mxu0 %v9285_v27 }
 0x30c   :  { %3919 = vmatprep.subr.bf16.mxu0 %v11295_v29  ;;  %v11362_v29 = vld [vmem:[%s15349_s1 + $0xe80] ss:$8 sps:$4 sm:$0xff]  }
 0x30f   :  { %3920 = vmatpush1.bf16.msra.mxu0 %v11293_v30 }
 0x310   :  { %3921 = vmatprep.subr.bf16.mxu0 %v11298_v31  ;;  %v11367_v31 = vld [vmem:[%s15349_s1 + $0xe94] ss:$8 sps:$4 sm:$0xff]  }
 0x313   :  { %3922 = vmatpush1.bf16.msra.mxu0 %v11296_v32 }
 0x314   :  { %3923 = vmatprep.subr.bf16.mxu0 %v11301_v60  ;;  %v11365_v60 = vld [vmem:[%s15349_s1 + $0xe90] ss:$8 sps:$4 sm:$0xff]  }
 0x317   :  { %3924 = vmatpush1.bf16.msra.mxu0 %v11299_v33  ;;  %v11370_v33 = vld [vmem:[%s15349_s1 + $0xea4] ss:$8 sps:$4 sm:$0xff]  }
 0x318   :  { %3925 = vmatprep.subr.bf16.mxu0 %v11304_v34  ;;  %v11368_v34 = vld [vmem:[%s15349_s1 + $0xea0] ss:$8 sps:$4 sm:$0xff]  }
 0x31b   :  { %3926 = vmatpush1.bf16.msra.mxu0 %v11302_v35  ;;  %v11373_v35 = vld [vmem:[%s15349_s1 + $0xeb4] ss:$8 sps:$4 sm:$0xff]  }
 0x31c   :  { %3927 = vmatprep.subr.bf16.mxu0 %v11307_v36  ;;  %v11371_v36 = vld [vmem:[%s15349_s1 + $0xeb0] ss:$8 sps:$4 sm:$0xff]  }
 0x31d   :  { %v13408_v39 = vpop.f32.mrb[36].mxu0 }
 0x31e   :  { %v13410_v40 = vpop.f32.mrb[37].mxu0 }
 0x31f   :  { %3928 = vmatpush1.bf16.msra.mxu0 %v11305_v4  ;;  %v3138_v42 = vpop.f32.mrb[38].mxu0  ;;  %v11376_v4 = vld [vmem:[%s15349_s1 + $0xec4] ss:$8 sps:$4 sm:$0xff]  }
 0x320   :  { %3929 = vmatprep.subr.bf16.mxu0 %v11310_v38  ;;  %v3139_v44 = vpop.f32.mrb[39].mxu0  ;;  %v11374_v38 = vld [vmem:[%s15349_s1 + $0xec0] ss:$8 sps:$4 sm:$0xff]  }
 0x321   :  { %v11380_v42 = vld [vmem:[%s15349_s1 + $0xee0] ss:$8 sps:$4 sm:$0xff]   ;;  %v11383_v44 = vld [vmem:[%s15349_s1 + $0xef0] ss:$8 sps:$4 sm:$0xff]  }
 0x323   :  { %3930 = vmatpush1.bf16.msra.mxu0 %v11308_v41  ;;  %v11382_v41 = vld [vmem:[%s15349_s1 + $0xee4] ss:$8 sps:$4 sm:$0xff]  }
 0x324   :  { %3931 = vmatprep.subr.bf16.mxu0 %v11313_v10  ;;  %v11385_v10 = vld [vmem:[%s15349_s1 + $0xef4] ss:$8 sps:$4 sm:$0xff]  }
 0x327   :  { %3932 = vmatpush1.bf16.msra.mxu0 %v11311_v45  ;;  %v3251_v45 = vld [vmem:[%s15350_s0 + $0x58] sm:$0x33] }
 0x328   :  { %3933 = vmatprep.subr.bf16.mxu0 %v11316_v46  ;;  %v9286_v46 = vcombine.low %v13112_v37, %v13483_v12  ;;  %v4094_v37 = vld [vmem:[%s15351_s2] sm:$0xff]  ;;  %v4103_v12 = vld [vmem:[%s15351_s2 + $0x48] sm:$0xff] }
 0x32b   :  { %3934 = vmatpush1.bf16.msra.mxu0 %v11314_v47  ;;  %v9293_v47 = vcombine.high %v3251_v45, %v3251_v45 }
 0x32c   :  { %3935 = vmatprep.subr.bf16.mxu0 %v11319_v28  ;;  %v9292_v28 = vcombine.low %v3251_v45, %v3251_v45 }
 0x32f   :  { %3936 = vmatpush1.bf16.msra.mxu0 %v11317_v48 }
 0x330   :  { %3937 = vmatprep.subr.bf16.mxu0 %v11322_v51 }
 0x333   :  { %3938 = vmatpush1.bf16.msra.mxu0 %v11320_v55 }
 0x334   :  { %3939 = vmatprep.subr.bf16.mxu0 %v11325_v56 }
 0x337   :  { %3940 = vmatpush1.bf16.msra.mxu0 %v11323_v57 }
 0x338   :  { %3941 = vmatprep.subr.bf16.mxu0 %v11330_v58 }
 0x33b   :  { %3942 = vmatpush1.bf16.msra.mxu0 %v11328_v52 }
 0x33c   :  { %3943 = vmatprep.subr.bf16.mxu0 %v11333_v59  ;;  %v11697_v59 = vmov 0.0|0.0  }
 0x33d   :  { %10318 = vmatprep.subr.bf16.mxu1 %v11697_v59 }
 0x33f   :  { %3944 = vmatpush1.bf16.msra.mxu0 %v11331_v62  ;;  %v4095_v62 = vld [vmem:[%s15351_s2 + $0x8] sm:$0xff] }
 0x340   :  { %3964 = vmatprep.subr.bf16.mxu0 %v11338_v63  ;;  %v4096_v63 = vld [vmem:[%s15351_s2 + $0x10] sm:$0xff] }
 0x342   :  { %3946 = vmatmul.mubr.bf16.vlgmr.msra.gmra.mrb[0].mxu0 %v9284_v17  ;;  %v4097_v17 = vld [vmem:[%s15351_s2 + $0x18] sm:$0xff] }
 0x343   :  { %3965 = vmatpush1.bf16.msra.mxu0 %v11336_v2  ;;  %3955 = vmatprep.mubr.bf16.mxu0 %v9291_v19  ;;  %v13594_v2 = vpack.c.bf16 %v4097_v17, %v4096_v63  ;;  %v4098_v19 = vld [vmem:[%s15351_s2 + $0x20] sm:$0xff] }
 0x344   :  { %3966 = vmatprep.subr.bf16.mxu0 %v11341_v3 }
 0x347   :  { %3967 = vmatpush1.bf16.msra.mxu0 %v11339_v5  ;;  %v4100_v5 = vld [vmem:[%s15351_s2 + $0x30] sm:$0xff] }
 0x348   :  { %3968 = vmatprep.subr.bf16.mxu0 %v11346_v43  ;;  %v4101_v43 = vld [vmem:[%s15351_s2 + $0x38] sm:$0xff] }
 0x34a   :  { %3956 = vmatmul.mubr.bf16.gmra.mrb[52].mxu0 %v9290_v7  ;;  %v13615_v7 = vpack.c.bf16 %v4101_v43, %v4100_v5 }
 0x34b   :  { %3969 = vmatpush1.bf16.msra.mxu0 %v11344_v8  ;;  %3996 = vmatprep.mubr.bf16.mxu0 %v9287_v13  ;;  %v4102_v8 = vld [vmem:[%s15351_s2 + $0x40] sm:$0xff] }
 0x34c   :  { %3970 = vmatprep.subr.bf16.mxu0 %v11349_v9  ;;  %v13625_v13 = vpack.c.bf16 %v4103_v12, %v4102_v8  ;;  %v4104_v9 = vld [vmem:[%s15351_s2 + $0x50] sm:$0xff] }
 0x34f   :  { %3971 = vmatpush1.bf16.msra.mxu0 %v11347_v11  ;;  %v4105_v11 = vld [vmem:[%s15351_s2 + $0x58] sm:$0xff] }
 0x350   :  { %3972 = vmatprep.subr.bf16.mxu0 %v11352_v14 }
 0x353   :  { %3973 = vmatpush1.bf16.msra.mxu0 %v11350_v15  ;;  %v13635_v15 = vpack.c.bf16 %v4105_v11, %v4104_v9 }
 0x354   :  { %3974 = vmatprep.subr.bf16.mxu0 %v11355_v16 }
 0x357   :  { %3975 = vmatpush1.bf16.msra.mxu0 %v11353_v18 }
 0x358   :  { %3976 = vmatprep.subr.bf16.mxu0 %v11358_v20 }
 0x35b   :  { %3977 = vmatpush1.bf16.msra.mxu0 %v11356_v21  ;;  %v4106_v21 = vld [vmem:[%s15351_s2 + $0x60] sm:$0xff] }
 0x35c   :  { %3978 = vmatprep.subr.bf16.mxu0 %v11361_v22  ;;  %v4107_v22 = vld [vmem:[%s15351_s2 + $0x68] sm:$0xff] }
 0x35d   :  { %v3185_v23 = vpop.f32.mrb[40].mxu0 }
 0x35e   :  { %v3186_v25 = vadd.f32 %v3185_v23, %v13408_v39  ;;  %v3187_v26 = vpop.f32.mrb[41].mxu0  ;;  %v11379_v39 = vld [vmem:[%s15349_s1 + $0xed4] ss:$8 sps:$4 sm:$0xff]  }
 0x35f   :  { %v3188_v27 = vadd.f32 %v3187_v26, %v13410_v40  ;;  %3979 = vmatpush1.bf16.msra.mxu0 %v11359_v24  ;;  %v3189_v30 = vpop.f32.mrb[42].mxu0  ;;  %v11377_v40 = vld [vmem:[%s15349_s1 + $0xed0] ss:$8 sps:$4 sm:$0xff]   ;;  %v13645_v24 = vpack.c.bf16 %v4107_v22, %v4106_v21  ;;  %v4110_v26 = vld [vmem:[%s15351_s2 + $0x80] sm:$0xff] }
 0x360   :  { %3980 = vmatprep.subr.bf16.mxu0 %v11364_v49  ;;  %v3190_v32 = vpop.f32.mrb[43].mxu0  ;;  %v4108_v49 = vld [vmem:[%s15351_s2 + $0x70] sm:$0xff]  ;;  %v4109_v23 = vld [vmem:[%s15351_s2 + $0x78] sm:$0xff] }
 0x361   :  { %v4112_v30 = vld [vmem:[%s15351_s2 + $0x90] sm:$0xff] }
 0x363   :  { %3981 = vmatpush1.bf16.msra.mxu0 %v11362_v29 }
 0x364   :  { %3982 = vmatprep.subr.bf16.mxu0 %v11367_v31  ;;  %v4113_v31 = vld [vmem:[%s15351_s2 + $0x98] sm:$0xff] }
 0x365   :  { %v13675_v32 = vpack.c.bf16 %v4113_v31, %v4112_v30 }
 0x367   :  { %3983 = vmatpush1.bf16.msra.mxu0 %v11365_v60  ;;  %v4114_v60 = vld [vmem:[%s15351_s2 + $0xa0] sm:$0xff] }
 0x368   :  { %3984 = vmatprep.subr.bf16.mxu0 %v11370_v33  ;;  %v4115_v33 = vld [vmem:[%s15351_s2 + $0xa8] sm:$0xff] }
 0x36b   :  { %3985 = vmatpush1.bf16.msra.mxu0 %v11368_v34  ;;  %v13684_v34 = vpack.c.bf16 %v4115_v33, %v4114_v60 }
 0x36c   :  { %3986 = vmatprep.subr.bf16.mxu0 %v11373_v35 }
 0x36f   :  { %3987 = vmatpush1.bf16.msra.mxu0 %v11371_v36 }
 0x370   :  { %3988 = vmatprep.subr.bf16.mxu0 %v11376_v4 }
 0x373   :  { %3989 = vmatpush1.bf16.msra.mxu0 %v11374_v38 }
 0x374   :  { %3990 = vmatprep.subr.bf16.mxu0 %v11379_v39 }
 0x377   :  { %3991 = vmatpush1.bf16.msra.mxu0 %v11377_v40 }
 0x378   :  { %3992 = vmatprep.subr.bf16.mxu0 %v11382_v41  ;;  %v4023_v41 = vlaneseq }
 0x37b   :  { %3993 = vmatpush1.bf16.msra.mxu0 %v11380_v42  ;;  %v13689_v42 = vshrl.u32 %v4023_v41, 7 }
 0x37c   :  { %3994 = vmatprep.subr.bf16.mxu0 %v11385_v10 }
 0x37d   :  { %v13692_v10 = vsub.s32 1, %v13689_v42 }
 0x37f   :  { %3995 = vmatpush1.bf16.msra.mxu0 %v11383_v44  ;;  %v4021_v44 = vld [vmem:[%s15352_s3] ss:$8 sm:$0x3] }
 0x382   :  { %3997 = vmatmul.mubr.bf16.vlgmr.msra.gmra.mrb[0].mxu0 %v9286_v46 }
 0x383   :  { %4006 = vmatprep.mubr.bf16.mxu0 %v9293_v47 }
 0x38a   :  { %4007 = vmatmul.mubr.bf16.gmra.mrb[56].mxu0 %v9292_v28  ;;  %v13699_v28 = vsub.s32 0, %v13689_v42 }
 0x39d   :  { %v3236_v48 = vpop.f32.mrb[44].mxu0 }
 0x39e   :  { %v3237_v51 = vadd.f32 %v3236_v48, %v3186_v25  ;;  %v3238_v55 = vpop.f32.mrb[45].mxu0  ;;  %v13655_v25 = vpack.c.bf16 %v4109_v23, %v4108_v49 }
 0x39f   :  { %v3239_v56 = vadd.f32 %v3238_v55, %v3188_v27  ;;  %v3240_v57 = vpop.f32.mrb[46].mxu0  ;;  %v4111_v27 = vld [vmem:[%s15351_s2 + $0x88] sm:$0xff] }
 0x3a0   :  { %v13573_v58 = vadd.f32 %v3237_v51, %v13298_v61  ;;  %v3241_v52 = vpop.f32.mrb[47].mxu0  ;;  %v13588_v61 = vpack.c.bf16 %v4095_v62, %v4094_v37  ;;  %v13665_v29 = vpack.c.bf16 %v4111_v27, %v4110_v26  ;;  %v4030_v51 = vrot.slane %v4021_v44, %v13692_v10 }
 0x3a1   :  { %v13586_v1 = vadd.f32 %v3239_v56, %v13304_v0  ;;  %v4099_v0 = vld [vmem:[%s15351_s2 + $0x28] sm:$0xff]  ;;  %v4026_v37 = vrot.slane %v4021_v44, %v13699_v28 }
 0x3a2   :  { %10320 = vmatpush1.bf16.msra.mxu1 %v13588_v61  ;;  %v13604_v3 = vpack.c.bf16 %v4099_v0, %v4098_v19 }
 0x3a3   :  { %10321 = vmatprep.subr.bf16.mxu1 %v11697_v59 }
 0x3a6   :  { %10323 = vmatpush1.bf16.msra.mxu1 %v13594_v2 }
 0x3a7   :  { %10324 = vmatprep.subr.bf16.mxu1 %v11697_v59 }
 0x3aa   :  { %10326 = vmatpush1.bf16.msra.mxu1 %v13604_v3 }
 0x3ab   :  { %10327 = vmatprep.subr.bf16.mxu1 %v11697_v59 }
 0x3ae   :  { %10329 = vmatpush1.bf16.msra.mxu1 %v13615_v7 }
 0x3af   :  { %10330 = vmatprep.subr.bf16.mxu1 %v11697_v59 }
 0x3b2   :  { %10332 = vmatpush1.bf16.msra.mxu1 %v13625_v13 }
 0x3b3   :  { %10333 = vmatprep.subr.bf16.mxu1 %v11697_v59 }
 0x3b6   :  { %10335 = vmatpush1.bf16.msra.mxu1 %v13635_v15 }
 0x3b7   :  { %10336 = vmatprep.subr.bf16.mxu1 %v11697_v59 }
 0x3ba   :  { %10338 = vmatpush1.bf16.msra.mxu1 %v13645_v24 }
 0x3bb   :  { %10339 = vmatprep.subr.bf16.mxu1 %v11697_v59 }
 0x3be   :  { %10341 = vmatpush1.bf16.msra.mxu1 %v13655_v25 }
 0x3bf   :  { %10342 = vmatprep.subr.bf16.mxu1 %v11697_v59 }
 0x3c2   :  { %10344 = vmatpush1.bf16.msra.mxu1 %v13665_v29 }
 0x3c3   :  { %10345 = vmatprep.subr.bf16.mxu1 %v11697_v59 }
 0x3c6   :  { %10347 = vmatpush1.bf16.msra.mxu1 %v13675_v32 }
 0x3c7   :  { %10348 = vmatprep.subr.bf16.mxu1 %v11697_v59 }
 0x3ca   :  { %10350 = vmatpush1.bf16.msra.mxu1 %v13684_v34 }
 0x3cb   :  { %10351 = vmatprep.subr.bf16.mxu1 %v11697_v59 }
 0x3dd   :  { %v3906_v14 = vpop.f32.mrb[48].mxu0 }
 0x3de   :  { %v3908_v16 = vpop.f32.mrb[49].mxu0 }
 0x3df   :  { %v3910_v18 = vpop.f32.mrb[50].mxu0 }
 0x3e0   :  { %v3911_v20 = vpop.f32.mrb[51].mxu0 }
 0x41d   :  { %v3957_v35 = vpop.f32.mrb[52].mxu0 }
 0x41e   :  { %v3958_v36 = vadd.f32 %v3957_v35, %v3906_v14  ;;  %v3959_v4 = vpop.f32.mrb[53].mxu0 }
 0x41f   :  { %v3960_v38 = vadd.f32 %v3959_v4, %v3908_v16  ;;  %v3961_v39 = vpop.f32.mrb[54].mxu0 }
 0x420   :  { %v3962_v40 = vpop.f32.mrb[55].mxu0 }
 0x455   :  { %v3998_v45 = vpop.f32.mrb[0].mxu0 }
 0x456   :  { %v10516_v46 = vadd.f32 %v3998_v45, %v12410_v6  ;;  %v4000_v47 = vpop.f32.mrb[1].mxu0 }
 0x457   :  { %v10517_v48 = vadd.f32 %v4000_v47, %v12415_v50  ;;  %v4002_v55 = vpop.f32.mrb[2].mxu0 }
 0x458   :  { %v10518_v56 = vadd.f32 %v4002_v55, %v12420_v53  ;;  %v4004_v57 = vpop.f32.mrb[3].mxu0  ;;  %v4033_v43 = vadd.f32 %v10516_v46, %v4026_v37 }
 0x459   :  { %v10519_v52 = vadd.f32 %v4004_v57, %v12422_v54  ;;  %v4034_v62 = vadd.f32 %v10517_v48, %v4030_v51 }
 0x45a   :  { %v4035_v17 = vadd.f32 %v10518_v56, %v4026_v37  ;;  %v13716_v18 = vmax.f32 %v4033_v43, 0.0 }
 0x45b   :  { %v4036_v63 = vadd.f32 %v10519_v52, %v4030_v51  ;;  %v13708_v50 = vmax.f32 %v4034_v62, 0.0 }
 0x45c   :  { %v13711_v11 = vmax.f32 %v4035_v17, 0.0 }
 0x45d   :  { %v13706_v6 = vmax.f32 %v4036_v63, 0.0  ;;  %v4008_v19 = vpop.f32.mrb[56].mxu0  ;;  %v4069_v20 = vmul.f32 %v13708_v50, %v13708_v50  ;;  %v4056_v49 = vsel %vm4055_vm3, %v13708_v50, 0.0 }
 0x45e   :  { %v4009_v0 = vadd.f32 %v4008_v19, %v3958_v36  ;;  %v4010_v5 = vpop.f32.mrb[57].mxu0  ;;  %v4070_v43 = vmul.f32 %v13711_v11, %v13711_v11 }
 0x45f   :  { %v4011_v8 = vadd.f32 %v4010_v5, %v3960_v38  ;;  %v4012_v12 = vpop.f32.mrb[58].mxu0  ;;  %v4071_v54 = vmul.f32 %v13706_v6, %v13706_v6  ;;  %v4057_v21 = vsel %vm4055_vm3, %v13706_v6, 0.0  ;;  %v4083_v31 = vsel %vm4055_vm3, %v4069_v20, 0.0 }
 0x460   :  { %v4019_v53 = vadd.f32 %v4009_v0, %v13573_v58  ;;  %v4013_v9 = vpop.f32.mrb[59].mxu0  ;;  %v4058_v27 = vadd.f32 %v4057_v21, %v4056_v49  ;;  %v11613_v21 = vld [vmem:[%s15356_s7 + $0xb8] sm:$0xff]  }
 0x461   :  { %v4020_v14 = vadd.f32 %v4011_v8, %v13586_v1  ;;  %v4045_v1 = vadd.f32 %v13711_v11, %v13716_v18  ;;  %v4084_v23 = vsel %vm4055_vm3, %v4071_v54, 0.0 }
 0x462   :  { %v4037_v16 = vadd.f32 %v4026_v37, %v4019_v53  ;;  %v4085_v36 = vadd.f32 %v4084_v23, %v4083_v31 }
 0x463   :  { %v4038_v58 = vadd.f32 %v4030_v51, %v4020_v14 }
 0x464   :  { %v13722_v22 = vmax.f32 %v4037_v16, 0.0 }
 0x465   :  { %v13729_v26 = vmax.f32 %v4038_v58, 0.0  ;;  %v11699_v58 = vmov 0.0  }
 0x466   :  { %v4047_v30 = vsel %vm4046_vm4, %v13722_v22, 0.0  ;;  %v4072_v5 = vmul.f32 %v13722_v22, %v13722_v22  ;;  %4359 = vmatprep.mubr.f32.mxu0 %v11699_v58  ;;  %4493 = vst [vmem:[#allocation2] sm:$0xff] %v11699_v58  ;;  %4494 = vst.msk [vmem:[#allocation2 + $0x8] sm:$0xff] %vm4055_vm3, %v11699_v58 }
 0x467   :  { %v4048_v60 = vadd.f32 %v4047_v30, %v4045_v1  ;;  %v4060_v33 = vsel %vm4059_vm5, %v13729_v26, 0.0  ;;  %v4073_v35 = vmul.f32 %v13729_v26, %v13729_v26  ;;  %4495 = vst [vmem:[#allocation2 + $0x10] sm:$0xff] %v11699_v58  ;;  %4496 = vst.msk [vmem:[#allocation2 + $0x18] sm:$0xff] %vm4055_vm3, %v11699_v58 }
 0x468   :  { %v4061_v4 = vadd.f32 %v4060_v33, %v4058_v27  ;;  %4497 = vst [vmem:[#allocation2 + $0x20] sm:$0xff] %v11699_v58  ;;  %4498 = vst.msk [vmem:[#allocation2 + $0x28] sm:$0xff] %vm4055_vm3, %v11699_v58  ;;  %v11392_v27 = vld [vmem:[%s15353_s4 + $0x10c] ss:$12 sps:$4 sm:$0xff]  }
 0x469   :  { %v4049_v38 = vrot.slane %v4048_v60, 4  ;;  %v4086_v39 = vsel %vm4059_vm5, %v4073_v35, 0.0  ;;  %4499 = vst [vmem:[#allocation2 + $0x30] sm:$0xff] %v11699_v58  ;;  %4500 = vst.msk [vmem:[#allocation2 + $0x38] sm:$0xff] %vm4055_vm3, %v11699_v58 }
 0x46a   :  { %v4062_v40 = vrot.slane %v4061_v4, 4  ;;  %v4087_v41 = vadd.f32 %v4086_v39, %v4085_v36  ;;  %4501 = vst [vmem:[#allocation2 + $0x40] sm:$0xff] %v11699_v58  ;;  %4502 = vst.msk [vmem:[#allocation2 + $0x48] sm:$0xff] %vm4055_vm3, %v11699_v58 }
 0x46b   :  { %v4050_v44 = vadd.f32 %v4049_v38, %v4048_v60  ;;  %4503 = vst [vmem:[#allocation2 + $0x50] sm:$0xff] %v11699_v58  ;;  %4504 = vst.msk [vmem:[#allocation2 + $0x58] sm:$0xff] %vm4055_vm3, %v11699_v58 }
 0x46c   :  { %v4063_v45 = vadd.f32 %v4062_v40, %v4061_v4  ;;  %v4088_v46 = vrot.slane %v4087_v41, 4  ;;  %7322 = vst [vmem:[#allocation3] sm:$0xff] %v11699_v58  ;;  %7323 = vst [vmem:[#allocation3 + $0x8] sm:$0xff] %v11699_v58 }
 0x46d   :  { %v4051_v47 = vrot.slane %v4050_v44, 2  ;;  %7337 = vst [vmem:[#allocation3 + $0x78] sm:$0xf] %v11699_v58  ;;  %7338 = vst [vmem:[#allocation3 + $0x80] sm:$0xf] %v11699_v58 }
 0x46e   :  { %v4064_v48 = vrot.slane %v4063_v45, 2  ;;  %v4089_v51 = vadd.f32 %v4088_v46, %v4087_v41  ;;  %v11395_v46 = vld [vmem:[%s15353_s4 + $0x124] ss:$12 sps:$4 sm:$0xff]  }
 0x46f   :  { %v4052_v55 = vadd.f32 %v4051_v47, %v4050_v44  ;;  %v11390_v44 = vld [vmem:[%s15353_s4 + $0x108] ss:$12 sps:$4 sm:$0xff]   ;;  %v11393_v47 = vld [vmem:[%s15353_s4 + $0x120] ss:$12 sps:$4 sm:$0xff]  }
 0x470   :  { %v4065_v56 = vadd.f32 %v4064_v48, %v4063_v45  ;;  %v4090_v57 = vrot.slane %v4089_v51, 2  ;;  %v11398_v48 = vld [vmem:[%s15353_s4 + $0x13c] ss:$12 sps:$4 sm:$0xff]  }
 0x471   :  { %v4053_v52 = vrot.slane %v4052_v55, 1 }
 0x472   :  { %v4066_v37 = vrot.slane %v4065_v56, 1  ;;  %v4091_v62 = vadd.f32 %v4090_v57, %v4089_v51  ;;  %v11396_v51 = vld [vmem:[%s15353_s4 + $0x138] ss:$12 sps:$4 sm:$0xff]  }
 0x473   :  { %v4054_v19 = vadd.f32 %v4053_v52, %v4052_v55  ;;  %v11401_v55 = vld [vmem:[%s15353_s4 + $0x154] ss:$12 sps:$4 sm:$0xff]   ;;  %v11404_v57 = vld [vmem:[%s15353_s4 + $0x16c] ss:$12 sps:$4 sm:$0xff]  }
 0x474   :  { %v4067_v63 = vadd.f32 %v4066_v37, %v4065_v56  ;;  %v4092_v17 = vrot.slane %v4091_v62, 1  ;;  %v11399_v56 = vld [vmem:[%s15353_s4 + $0x150] ss:$12 sps:$4 sm:$0xff]   ;;  %v11402_v52 = vld [vmem:[%s15353_s4 + $0x168] ss:$12 sps:$4 sm:$0xff]  }
 0x475   :  { %v11407_v37 = vld [vmem:[%s15353_s4 + $0x184] ss:$12 sps:$4 sm:$0xff]  }
 0x476   :  { %9390 = vmatprep.mubr.msk.f32.mxu1 %vm4055_vm3, %v4067_v63  ;;  %v4093_v0 = vadd.f32 %v4092_v17, %v4091_v62  ;;  %v11405_v62 = vld [vmem:[%s15353_s4 + $0x180] ss:$12 sps:$4 sm:$0xff]   ;;  %v11410_v63 = vld [vmem:[%s15353_s4 + $0x19c] ss:$12 sps:$4 sm:$0xff]   ;;  %v11408_v17 = vld [vmem:[%s15353_s4 + $0x198] ss:$12 sps:$4 sm:$0xff]  }
 0x477   :  { %4184 = vmatmul.mubr.f32.vlgmr.msra.gmra.mrb[8].mxu1 %v4054_v19  ;;  %v11413_v19 = vld [vmem:[%s15353_s4 + $0x1b4] ss:$12 sps:$4 sm:$0xff]  }
 0x478   :  { %10353 = vmatpush1.bf16.msra.mxu1 %v13588_v61  ;;  %9391 = vmatprep.mubr.msk.f32.mxu1 %vm4055_vm3, %v4093_v0  ;;  %v4068_v61 = vmul.f32 %v13716_v18, %v13716_v18  ;;  %v11411_v0 = vld [vmem:[%s15353_s4 + $0x1b0] ss:$12 sps:$4 sm:$0xff]  }
 0x479   :  { %10354 = vmatprep.subr.bf16.mxu1 %v11697_v59 }
 0x47a   :  { %v4074_v8 = vadd.f32 %v4070_v43, %v4068_v61  ;;  %v11414_v43 = vld [vmem:[%s15353_s4 + $0x1c8] ss:$12 sps:$4 sm:$0xff]   ;;  %v11419_v61 = vld [vmem:[%s15353_s4 + $0x1e4] ss:$12 sps:$4 sm:$0xff]  }
 0x47c   :  { %10356 = vmatpush1.bf16.msra.mxu1 %v13594_v2  ;;  %v4075_v2 = vsel %vm4046_vm4, %v4072_v5, 0.0  ;;  %v11416_v5 = vld [vmem:[%s15353_s4 + $0x1cc] ss:$12 sps:$4 sm:$0xff]  }
 0x47d   :  { %10357 = vmatprep.subr.bf16.mxu1 %v11697_v59 }
 0x480   :  { %10359 = vmatpush1.bf16.msra.mxu1 %v13604_v3  ;;  %v4076_v3 = vadd.f32 %v4075_v2, %v4074_v8  ;;  %v11417_v2 = vld [vmem:[%s15353_s4 + $0x1e0] ss:$12 sps:$4 sm:$0xff]   ;;  %v11422_v8 = vld [vmem:[%s15353_s4 + $0x1fc] ss:$12 sps:$4 sm:$0xff]  }
 0x481   :  { %10360 = vmatprep.subr.bf16.mxu1 %v11697_v59 }
 0x482   :  { %v4077_v12 = vrot.slane %v4076_v3, 4 }
 0x484   :  { %10362 = vmatpush1.bf16.msra.mxu1 %v13615_v7  ;;  %v4078_v7 = vadd.f32 %v4077_v12, %v4076_v3  ;;  %v11420_v3 = vld [vmem:[%s15353_s4 + $0x1f8] ss:$12 sps:$4 sm:$0xff]   ;;  %v11700_v12 = vmov 0  }
 0x485   :  { %10363 = vmatprep.subr.bf16.mxu1 %v11697_v59 }
 0x486   :  { %v4079_v53 = vrot.slane %v4078_v7, 2 }
 0x488   :  { %10365 = vmatpush1.bf16.msra.mxu1 %v13625_v13  ;;  %v4080_v13 = vadd.f32 %v4079_v53, %v4078_v7  ;;  %v11701_v7 = vmov 1966171168  }
 0x489   :  { %10366 = vmatprep.subr.bf16.mxu1 %v11697_v59  ;;  %v4447_v53 = vunpack.c.l.s4 %v11701_v7 }
 0x48c   :  { %10368 = vmatpush1.bf16.msra.mxu1 %v13635_v15  ;;  %v4081_v15 = vrot.slane %v4080_v13, 1 }
 0x48d   :  { %10369 = vmatprep.subr.bf16.mxu1 %v11697_v59 }
 0x490   :  { %10371 = vmatpush1.bf16.msra.mxu1 %v13645_v24  ;;  %v4082_v24 = vadd.f32 %v4081_v15, %v4080_v13  ;;  %v4448_v13 = vunpack.c.0.s8 %v4447_v53 }
 0x491   :  { %10372 = vmatprep.subr.bf16.mxu1 %v11697_v59 }
 0x494   :  { %10374 = vmatpush1.bf16.msra.mxu1 %v13655_v25  ;;  %v4270_v25 = vld [vmem:[%s15352_s3 + $0x8] sm:$0xfc] }
 0x495   :  { %10375 = vmatprep.subr.bf16.mxu1 %v11697_v59  ;;  %v4281_v9 = vrot.slane %v4270_v25, 2 }
 0x498   :  { %10377 = vmatpush1.bf16.msra.mxu1 %v13665_v29  ;;  %v4272_v29 = vld [vmem:[%s15352_s3 + $0x18] sm:$0x1f] }
 0x499   :  { %10378 = vmatprep.subr.bf16.mxu1 %v11697_v59  ;;  %v4282_v54 = vrot.slane %v4272_v29, 2  ;;  %v13869_v29 = vsub.s32 %v4448_v13, %v13689_v42 }
 0x49b   :  { %v4283_v20 = vsel %vm1752_vm1, %v4281_v9, %v4282_v54 }
 0x49c   :  { %10380 = vmatpush1.bf16.msra.mxu1 %v13675_v32  ;;  %v4269_v32 = vld [vmem:[%s15352_s3] sm:$0xfc]  ;;  %v10384_v49 = vpack.c.bf16 %v4282_v54, %v4283_v20 }
 0x49d   :  { %10381 = vmatprep.subr.bf16.mxu1 %v11697_v59  ;;  %v4278_v14 = vrot.slane %v4269_v32, 2 }
 0x49e   :  { %10386 = vmatprep.subr.msk.bf16.mxu0 %vm13780_vm8, %v10384_v49 }
 0x4a0   :  { %10383 = vmatpush1.bf16.msra.mxu1 %v13684_v34  ;;  %v4271_v34 = vld [vmem:[%s15352_s3 + $0x10] sm:$0x1f] }
 0x4a1   :  { %v4279_v16 = vrot.slane %v4271_v34, 2  ;;  %10392 = vmatprep.subr.msk.bf16.mxu1 %vm13780_vm8, %v10384_v49 }
 0x4a3   :  { %4258 = vmatmul.mubr.f32.vlgmr.msra.gmra.mrb[10].mxu1 %v4082_v24  ;;  %v4280_v1 = vsel %vm1752_vm1, %v4278_v14, %v4279_v16  ;;  %v9395_v14 = vld [vmem:[%s15352_s3 + $0x1] ss:$8 sm:$0x3] }
 0x4a4   :  { %4436 = vmatprep.mubr.f32.mxu1 %v11699_v58  ;;  %v10387_v23 = vpack.c.bf16 %v4279_v16, %v4280_v1 }
 0x4a6   :  { %10389 = vmatpush1.bf16.msk.msra.mxu0 %vm13780_vm8, %v10387_v23  ;;  %10395 = vmatpush1.bf16.msk.msra.mxu1 %vm13780_vm8, %v10387_v23 }
 0x4a7   :  { %4882 = vmatprep.subr.bf16.mxu1 %v11392_v27 }
 0x54a   :  { %v4185_v30 = vpop.f32.mrb[8].mxu1 }
 0x54b   :  { %v4187_v31 = vpop.f32.mrb[9].mxu1  ;;  %v4189_v60 = vmul.f32 0.003125, %v4185_v30 }
 0x54d   :  { %v4264_v35 = vmul.f32 %v4189_v60, %v4189_v60 }
 0x576   :  { %v4259_v33 = vpop.f32.mrb[10].mxu1 }
 0x577   :  { %v4263_v36 = vmul.f32 0.003125, %v4259_v33  ;;  %v4261_v4 = vpop.f32.mrb[11].mxu1 }
 0x579   :  { %v4265_v38 = vsub.f32 %v4263_v36, %v4264_v35 }
 0x57b   :  { %v4266_v39 = vmax.f32 %v4265_v38, 0.0 }
 0x57d   :  { %v4267_v40 = vadd.f32 1e-05, %v4266_v39 }
 0x57f   :  { %11676 = vrsqrt.f32 %v4267_v40 }
 0x589   :  { %v11677_v41 = vpop.eup %11676 }
 0x58a   :  { %9394 = vmatmul.mubr.msk.f32.vlgmr.msra.gmra.mrb[60].mxu0 %vm4286_vm9, %v11677_v41  ;;  %v4368_v45 = vmul.f32 %v11677_v41, %v4189_v60 }
 0x58c   :  { %9398 = vmatmul.mubr.msk.f32.vlgmr.msra.gmra.mrb[12].mxu1 %vm4286_vm9, %v4368_v45 }
 0x58d   :  { %4883 = vmatpush1.bf16.msra.mxu1 %v11390_v44 }
 0x58e   :  { %4884 = vmatprep.subr.bf16.mxu1 %v11395_v46 }
 0x591   :  { %4885 = vmatpush1.bf16.msra.mxu1 %v11393_v47 }
 0x592   :  { %4886 = vmatprep.subr.bf16.mxu1 %v11398_v48 }
 0x595   :  { %4887 = vmatpush1.bf16.msra.mxu1 %v11396_v51 }
 0x596   :  { %4888 = vmatprep.subr.bf16.mxu1 %v11401_v55 }
 0x599   :  { %4889 = vmatpush1.bf16.msra.mxu1 %v11399_v56 }
 0x59a   :  { %4890 = vmatprep.subr.bf16.mxu1 %v11404_v57 }
 0x59d   :  { %4891 = vmatpush1.bf16.msra.mxu1 %v11402_v52 }
 0x59e   :  { %4892 = vmatprep.subr.bf16.mxu1 %v11407_v37 }
 0x5a1   :  { %4893 = vmatpush1.bf16.msra.mxu1 %v11405_v62 }
 0x5a2   :  { %4894 = vmatprep.subr.bf16.mxu1 %v11410_v63 }
 0x5a5   :  { %4895 = vmatpush1.bf16.msra.mxu1 %v11408_v17 }
 0x5a6   :  { %4896 = vmatprep.subr.bf16.mxu1 %v11413_v19 }
 0x5a9   :  { %4897 = vmatpush1.bf16.msra.mxu1 %v11411_v0 }
 0x5aa   :  { %4898 = vmatprep.subr.bf16.mxu1 %v11416_v5 }
 0x5ad   :  { %4899 = vmatpush1.bf16.msra.mxu1 %v11414_v43 }
 0x5ae   :  { %4900 = vmatprep.subr.bf16.mxu1 %v11419_v61 }
 0x5b1   :  { %4901 = vmatpush1.bf16.msra.mxu1 %v11417_v2 }
 0x5b2   :  { %4902 = vmatprep.subr.bf16.mxu1 %v11422_v8 }
 0x5b5   :  { %4903 = vmatpush1.bf16.msra.mxu1 %v11420_v3 }
 0x5b6   :  { %4943 = vmatprep.subr.bf16.mxu1 %v11700_v12 }
 0x65d   :  { %v4361_v15 = vpop.f32.mrb[60].mxu0 }
 0x65e   :  { %v4363_v24 = vpop.f32.mrb[61].mxu0  ;;  %v4465_v34 = vrot.slane %v4361_v15, %v13699_v28 }
 0x65f   :  { %v4438_v25 = vpop.f32.mrb[12].mxu1  ;;  %v4469_v16 = vrot.slane %v4363_v24, %v13699_v28 }
 0x660   :  { %v4440_v9 = vpop.f32.mrb[13].mxu1  ;;  %v4470_v49 = vmul.f32 %v4465_v34, %v13716_v18  ;;  %v4472_v1 = vmul.f32 %v4465_v34, %v13711_v11  ;;  %v4474_v60 = vmul.f32 %v4465_v34, %v13722_v22 }
 0x661   :  { %v4445_v54 = vcombine.low %v4438_v25, %v4440_v9  ;;  %v4471_v23 = vmul.f32 %v4469_v16, %v13708_v50  ;;  %v4473_v27 = vmul.f32 %v4469_v16, %v13706_v6  ;;  %v4475_v33 = vmul.f32 %v4469_v16, %v13729_v26 }
 0x663   :  { %v4452_v32 = vrot.slane %v4445_v54, %v13869_v29 }
 0x665   :  { %v4459_v20 = vrot.slane %v4452_v32, %v13869_v29 }
 0x667   :  { %v4461_v58 = vsub.f32 %v9395_v14, %v4459_v20  ;;  %v11423_v14 = vld [vmem:[%s15353_s4 + $0x110] ss:$12 sps:$4 sm:$0xff]  }
 0x669   :  { %v4480_v30 = vrot.slane %v4461_v58, %v13699_v28  ;;  %v4484_v31 = vrot.slane %v4461_v58, %v13692_v10 }
 0x66b   :  { %v4487_v35 = vadd.f32 %v4480_v30, %v4470_v49  ;;  %v4488_v36 = vadd.f32 %v4484_v31, %v4471_v23  ;;  %v4489_v4 = vadd.f32 %v4480_v30, %v4472_v1  ;;  %v4490_v38 = vadd.f32 %v4484_v31, %v4473_v27  ;;  %v11424_v23 = vld [vmem:[%s15353_s4 + $0x128] ss:$12 sps:$4 sm:$0xff]  }
 0x66c   :  { %v4491_v18 = vadd.f32 %v4480_v30, %v4474_v60  ;;  %v4492_v39 = vadd.f32 %v4484_v31, %v4475_v33  ;;  %v11425_v60 = vld [vmem:[%s15353_s4 + $0x140] ss:$12 sps:$4 sm:$0xff]  }
 0x66d   :  { %v4507_v11 = vrot.slane %v4487_v35, 4  ;;  %v4508_v50 = vrot.slane %v4488_v36, 4  ;;  %v4514_v40 = vrot.slane %v4487_v35, 2  ;;  %v4515_v6 = vrot.slane %v4488_v36, 2  ;;  %4521 = vst [vmem:[#allocation2 + $0x10] sm:$0x30] %v4487_v35 }
 0x66e   :  { %4522 = vst.msk [vmem:[#allocation2 + $0x18] sm:$0x30] %vm4512_vm10, %v4488_v36  ;;  %4543 = vst [vmem:[#allocation2 + $0x30] sm:$0x30] %v4489_v4  ;;  %v4523_v22 = vrot.slane %v4487_v35, 6  ;;  %v4524_v26 = vrot.slane %v4488_v36, 6 }
 0x66f   :  { %4544 = vst.msk [vmem:[#allocation2 + $0x38] sm:$0x30] %vm4512_vm10, %v4490_v38  ;;  %v4531_v41 = vrot.slane %v4489_v4, 4  ;;  %v4532_v44 = vrot.slane %v4490_v38, 4  ;;  %4511 = vst [vmem:[#allocation2] sm:$0x30] %v4507_v11 }
 0x670   :  { %4513 = vst.msk [vmem:[#allocation2 + $0x8] sm:$0x30] %vm4512_vm10, %v4508_v50  ;;  %4518 = vst [vmem:[#allocation2 + $0x10] sm:$0x3] %v4514_v40  ;;  %v4537_v45 = vrot.slane %v4489_v4, 2  ;;  %v4538_v46 = vrot.slane %v4490_v38, 2 }
 0x671   :  { %4520 = vst.msk [vmem:[#allocation2 + $0x18] sm:$0x3] %vm4519_vm11, %v4515_v6  ;;  %v4545_v47 = vrot.slane %v4489_v4, 6  ;;  %v4546_v48 = vrot.slane %v4490_v38, 6  ;;  %4527 = vst [vmem:[#allocation2 + $0x20] sm:$0x3] %v4523_v22 }
 0x672   :  { %4528 = vst.msk [vmem:[#allocation2 + $0x28] sm:$0x3] %vm4519_vm11, %v4524_v26  ;;  %4535 = vst [vmem:[#allocation2 + $0x20] sm:$0x30] %v4531_v41  ;;  %v4553_v51 = vrot.slane %v4491_v18, 4  ;;  %v4554_v55 = vrot.slane %v4492_v39, 4 }
 0x673   :  { %4536 = vst.msk [vmem:[#allocation2 + $0x28] sm:$0x30] %vm4512_vm10, %v4532_v44  ;;  %v4559_v56 = vrot.slane %v4491_v18, 2  ;;  %v4560_v57 = vrot.slane %v4492_v39, 2  ;;  %4541 = vst [vmem:[#allocation2 + $0x30] sm:$0x3] %v4537_v45 }
 0x674   :  { %4542 = vst.msk [vmem:[#allocation2 + $0x38] sm:$0x3] %vm4519_vm11, %v4538_v46  ;;  %4549 = vst [vmem:[#allocation2 + $0x40] sm:$0x3] %v4545_v47  ;;  %v11426_v35 = vld [vmem:[%s15353_s4 + $0x158] ss:$12 sps:$4 sm:$0xff]  }
 0x675   :  { %4550 = vst.msk [vmem:[#allocation2 + $0x48] sm:$0x3] %vm4519_vm11, %v4546_v48  ;;  %4557 = vst [vmem:[#allocation2 + $0x40] sm:$0x30] %v4553_v51  ;;  %v11427_v36 = vld [vmem:[%s15353_s4 + $0x170] ss:$12 sps:$4 sm:$0xff]  }
 0x676   :  { %4558 = vst.msk [vmem:[#allocation2 + $0x48] sm:$0x30] %vm4512_vm10, %v4554_v55  ;;  %4563 = vst [vmem:[#allocation2 + $0x50] sm:$0x3] %v4559_v56  ;;  %v4625_v0 = vld [vmem:[#allocation2] sm:$0xfc] }
 0x677   :  { %4564 = vst.msk [vmem:[#allocation2 + $0x58] sm:$0x3] %vm4519_vm11, %v4560_v57  ;;  %v4626_v37 = vld [vmem:[#allocation2 + $0x8] sm:$0xfc]  ;;  %v13898_v62 = vld [vmem:[#allocation2 + $0x10] sm:$0xff] }
 0x678   :  { %v13896_v52 = vld [vmem:[#allocation2 + $0x18] sm:$0xff]  ;;  %v4629_v61 = vpack.c.bf16 %v13898_v62, %v4625_v0  ;;  %v11428_v4 = vld [vmem:[%s15353_s4 + $0x188] ss:$12 sps:$4 sm:$0xff]   ;;  %v11429_v38 = vld [vmem:[%s15353_s4 + $0x1a0] ss:$12 sps:$4 sm:$0xff]  }
 0x679   :  { %v4630_v17 = vpack.c.bf16 %v13896_v52, %v4626_v37  ;;  %v4569_v19 = vld [vmem:[#allocation2 + $0x20] sm:$0xff]  ;;  %v11431_v39 = vld [vmem:[%s15353_s4 + $0x1d0] ss:$12 sps:$4 sm:$0xff]   ;;  %v11432_v11 = vld [vmem:[%s15353_s4 + $0x1e8] ss:$12 sps:$4 sm:$0xff]  }
 0x67a   :  { %v4570_v63 = vld [vmem:[#allocation2 + $0x28] sm:$0xff]  ;;  %v4571_v43 = vld [vmem:[#allocation2 + $0x30] sm:$0xff]  ;;  %v13906_v8 = vpack.c.bf16 %v4569_v19, %v13898_v62  ;;  %v4684_v24 = vrot.slane %v4629_v61, 1  ;;  %v11430_v18 = vld [vmem:[%s15353_s4 + $0x1b8] ss:$12 sps:$4 sm:$0xff]  }
 0x67b   :  { %v4572_v5 = vld [vmem:[#allocation2 + $0x38] sm:$0xff]  ;;  %v13903_v2 = vpack.c.bf16 %v4570_v63, %v13896_v52  ;;  %v4687_v7 = vrot.slane %v4630_v17, 1  ;;  %v13910_v53 = vpack.c.bf16 %v4571_v43, %v4569_v19  ;;  %v11433_v50 = vld [vmem:[%s15353_s4 + $0x200] ss:$12 sps:$4 sm:$0xff]   ;;  %v11436_v40 = vld [vmem:[%s15353_s4 + $0x4] ss:$12 sps:$4 sm:$0xff]  }
 0x67c   :  { %v13908_v3 = vpack.c.bf16 %v4572_v5, %v4570_v63  ;;  %v13917_v32 = vld [vmem:[#allocation2 + $0x40] sm:$0xff]  ;;  %v11439_v22 = vld [vmem:[%s15353_s4 + $0x1c] ss:$12 sps:$4 sm:$0xff]   ;;  %v11445_v45 = vld [vmem:[%s15353_s4 + $0x4c] ss:$12 sps:$4 sm:$0xff]  }
 0x67d   :  { %v13912_v13 = vld [vmem:[#allocation2 + $0x48] sm:$0xff]  ;;  %v4685_v54 = vrot.slane %v13910_v53, 1  ;;  %v4627_v34 = vld [vmem:[#allocation2 + $0x50] sm:$0x3]  ;;  %v13936_v31 = vpack.c.bf16 %v13917_v32, %v4571_v43  ;;  %v11437_v26 = vld [vmem:[%s15353_s4 + $0x18] ss:$12 sps:$4 sm:$0xff]  }
 0x67e   :  { %v4628_v15 = vld [vmem:[#allocation2 + $0x58] sm:$0x3]  ;;  %v4688_v9 = vrot.slane %v13908_v3, 1  ;;  %v4631_v49 = vpack.c.bf16 %v4627_v34, %v13917_v32  ;;  %v13933_v30 = vpack.c.bf16 %v13912_v13, %v4572_v5  ;;  %v11434_v6 = vld [vmem:[%s15353_s4] ss:$12 sps:$4 sm:$0xff]  }
 0x67f   :  { %v4632_v25 = vpack.c.bf16 %v4628_v15, %v13912_v13  ;;  %v4686_v58 = vsel %vm280_vm0, %v4684_v24, %v4685_v54  ;;  %v11442_v41 = vld [vmem:[%s15353_s4 + $0x34] ss:$12 sps:$4 sm:$0xff]   ;;  %v11440_v44 = vld [vmem:[%s15353_s4 + $0x30] ss:$12 sps:$4 sm:$0xff]   ;;  %v4566_v48 = vld [vmem:[#allocation2 + $0x8] sm:$0xff] }
 0x680   :  { %v4689_v20 = vsel %vm280_vm0, %v4687_v7, %v4688_v9  ;;  %v4690_v27 = vrot.slane %v4631_v49, 1  ;;  %v11443_v46 = vld [vmem:[%s15353_s4 + $0x48] ss:$12 sps:$4 sm:$0xff]   ;;  %v11448_v47 = vld [vmem:[%s15353_s4 + $0x64] ss:$12 sps:$4 sm:$0xff]   ;;  %v4576_v56 = vpack.c.bf16 %v13896_v52, %v4566_v48 }
 0x681   :  { %v4692_v16 = vrot.slane %v4632_v25, 1  ;;  %9476 = vmatprep.mubr.msk.bf16.mxu1 %vm4055_vm3, %v4689_v20  ;;  %v11446_v51 = vld [vmem:[%s15353_s4 + $0x60] ss:$12 sps:$4 sm:$0xff]   ;;  %v11451_v55 = vld [vmem:[%s15353_s4 + $0x7c] ss:$12 sps:$4 sm:$0xff]  }
 0x682   :  { %4915 = vmatmul.mubr.bf16.vlgmr.msra.gmra.mrb[16].mxu1 %v4686_v58  ;;  %v4691_v33 = vsel %vm280_vm0, %v4685_v54, %v4690_v27  ;;  %v11449_v57 = vld [vmem:[%s15353_s4 + $0x78] ss:$12 sps:$4 sm:$0xff]   ;;  %v11454_v37 = vld [vmem:[%s15353_s4 + $0x94] ss:$12 sps:$4 sm:$0xff]   ;;  %v11452_v63 = vld [vmem:[%s15353_s4 + $0x90] ss:$12 sps:$4 sm:$0xff]  }
 0x683   :  { %v4693_v1 = vsel %vm280_vm0, %v4688_v9, %v4692_v16  ;;  %4944 = vmatpush1.bf16.msra.mxu1 %v11423_v14  ;;  %v11457_v17 = vld [vmem:[%s15353_s4 + $0xac] ss:$12 sps:$4 sm:$0xff]   ;;  %v11455_v19 = vld [vmem:[%s15353_s4 + $0xa8] ss:$12 sps:$4 sm:$0xff]   ;;  %v11460_v0 = vld [vmem:[%s15353_s4 + $0xc4] ss:$12 sps:$4 sm:$0xff]   ;;  %v4580_v14 = vpack.c.bf16 %v13912_v13, %v13912_v13 }
 0x684   :  { %9477 = vmatprep.mubr.msk.bf16.mxu1 %vm4055_vm3, %v4693_v1  ;;  %4945 = vmatprep.subr.bf16.mxu1 %v11700_v12  ;;  %v11458_v5 = vld [vmem:[%s15353_s4 + $0xc0] ss:$12 sps:$4 sm:$0xff]   ;;  %v11463_v43 = vld [vmem:[%s15353_s4 + $0xdc] ss:$12 sps:$4 sm:$0xff]   ;;  %v11461_v61 = vld [vmem:[%s15353_s4 + $0xd8] ss:$12 sps:$4 sm:$0xff]  }
 0x685   :  { %v11466_v7 = vld [vmem:[%s15353_s4 + $0xf4] ss:$12 sps:$4 sm:$0xff]   ;;  %v11464_v15 = vld [vmem:[%s15353_s4 + $0xf0] ss:$12 sps:$4 sm:$0xff]   ;;  %v11469_v34 = vld [vmem:[%s15353_s4 + $0x38] ss:$12 sps:$4 sm:$0xff]  }
 0x686   :  { %v4565_v24 = vld [vmem:[#allocation2] sm:$0xff]  ;;  %v11467_v25 = vld [vmem:[%s15353_s4 + $0x8] ss:$12 sps:$4 sm:$0xff]  }
 0x687   :  { %4946 = vmatpush1.bf16.msra.mxu1 %v11424_v23  ;;  %v4575_v9 = vpack.c.bf16 %v13898_v62, %v4565_v24  ;;  %v11468_v54 = vld [vmem:[%s15353_s4 + $0x20] ss:$12 sps:$4 sm:$0xff]   ;;  %v11474_v23 = vld [vmem:[%s15353_s4 + $0xb0] ss:$12 sps:$4 sm:$0xff]   ;;  %v5359_v24 = vrot.slane %v13910_v53, 2 }
 0x688   :  { %4947 = vmatprep.subr.bf16.mxu1 %v11700_v12  ;;  %v11472_v49 = vld [vmem:[%s15353_s4 + $0x80] ss:$12 sps:$4 sm:$0xff]   ;;  %v11498_v48 = vld [vmem:[%s15353_s4 + $0x2a4] ss:$12 sps:$4 sm:$0xff]  }
 0x68a   :  { %4925 = vmatmul.mubr.bf16.gmra.mrb[20].mxu1 %v4691_v33 }
 0x68b   :  { %4948 = vmatpush1.bf16.msra.mxu1 %v11425_v60  ;;  %9478 = vmatprep.mubr.msk.bf16.mxu1 %vm4055_vm3, %v4692_v16  ;;  %v11476_v60 = vld [vmem:[%s15353_s4 + $0xe0] ss:$12 sps:$4 sm:$0xff]  }
 0x68c   :  { %4949 = vmatprep.subr.bf16.mxu1 %v11700_v12 }
 0x68f   :  { %4950 = vmatpush1.bf16.msra.mxu1 %v11426_v35  ;;  %v11480_v35 = vld [vmem:[%s15353_s4 + $0x214] ss:$12 sps:$4 sm:$0xff]  }
 0x690   :  { %4951 = vmatprep.subr.bf16.mxu1 %v11700_v12 }
 0x692   :  { %4935 = vmatmul.mubr.bf16.gmra.mrb[24].mxu1 %v4690_v27 }
 0x693   :  { %4952 = vmatpush1.bf16.msra.mxu1 %v11427_v36  ;;  %9479 = vmatprep.mubr.msk.bf16.mxu1 %vm4055_vm3, %v4689_v20  ;;  %v11471_v20 = vld [vmem:[%s15353_s4 + $0x68] ss:$12 sps:$4 sm:$0xff]   ;;  %v11478_v36 = vld [vmem:[%s15353_s4 + $0x210] ss:$12 sps:$4 sm:$0xff]  }
 0x694   :  { %4953 = vmatprep.subr.bf16.mxu1 %v11700_v12 }
 0x697   :  { %4954 = vmatpush1.bf16.msra.mxu1 %v11428_v4  ;;  %v11483_v4 = vld [vmem:[%s15353_s4 + $0x22c] ss:$12 sps:$4 sm:$0xff]  }
 0x698   :  { %4955 = vmatprep.subr.bf16.mxu1 %v11700_v12 }
 0x69b   :  { %4956 = vmatpush1.bf16.msra.mxu1 %v11429_v38  ;;  %v11481_v38 = vld [vmem:[%s15353_s4 + $0x228] ss:$12 sps:$4 sm:$0xff]  }
 0x69c   :  { %4957 = vmatprep.subr.bf16.mxu1 %v11700_v12 }
 0x69f   :  { %4958 = vmatpush1.bf16.msra.mxu1 %v11430_v18  ;;  %v11486_v18 = vld [vmem:[%s15353_s4 + $0x244] ss:$12 sps:$4 sm:$0xff]  }
 0x6a0   :  { %4959 = vmatprep.subr.bf16.mxu1 %v11700_v12 }
 0x6a3   :  { %4960 = vmatpush1.bf16.msra.mxu1 %v11431_v39  ;;  %v11484_v39 = vld [vmem:[%s15353_s4 + $0x240] ss:$12 sps:$4 sm:$0xff]  }
 0x6a4   :  { %4961 = vmatprep.subr.bf16.mxu1 %v11700_v12 }
 0x6a7   :  { %4962 = vmatpush1.bf16.msra.mxu1 %v11432_v11  ;;  %v5302_v11 = vld [vmem:[#allocation2 + $0x8] sm:$0xf0] }
 0x6a8   :  { %4963 = vmatprep.subr.bf16.mxu1 %v11700_v12 }
 0x6ab   :  { %4964 = vmatpush1.bf16.msra.mxu1 %v11433_v50  ;;  %v11489_v50 = vld [vmem:[%s15353_s4 + $0x25c] ss:$12 sps:$4 sm:$0xff]  }
 0x6ac   :  { %5184 = vmatprep.subr.bf16.mxu1 %v11436_v40  ;;  %v5306_v40 = vpack.c.bf16 %v13896_v52, %v5302_v11  ;;  %v11527_v11 = vld [vmem:[%s15353_s4 + $0x334] ss:$12 sps:$4 sm:$0xff]  }
 0x6ae   :  { %4976 = vmatmul.mubr.bf16.vlgmr.msra.gmra.mrb[28].mxu1 %v4686_v58  ;;  %v4579_v58 = vpack.c.bf16 %v13917_v32, %v13917_v32 }
 0x6af   :  { %9480 = vmatprep.mubr.msk.bf16.mxu1 %vm4055_vm3, %v4693_v1  ;;  %5185 = vmatpush1.bf16.msra.mxu1 %v11434_v6  ;;  %v11473_v1 = vld [vmem:[%s15353_s4 + $0x98] ss:$12 sps:$4 sm:$0xff]  }
 0x6b0   :  { %5186 = vmatprep.subr.bf16.mxu1 %v11439_v22  ;;  %v11487_v6 = vld [vmem:[%s15353_s4 + $0x258] ss:$12 sps:$4 sm:$0xff]   ;;  %v11492_v22 = vld [vmem:[%s15353_s4 + $0x274] ss:$12 sps:$4 sm:$0xff]  }
 0x6b3   :  { %5187 = vmatpush1.bf16.msra.mxu1 %v11437_v26  ;;  %v5361_v26 = vrot.slane %v5306_v40, 2  ;;  %v11530_v40 = vld [vmem:[%s15353_s4 + $0x34c] ss:$12 sps:$4 sm:$0xff]  }
 0x6b4   :  { %5188 = vmatprep.subr.bf16.mxu1 %v11442_v41  ;;  %v5362_v41 = vrot.slane %v13908_v3, 2 }
 0x6b6   :  { %4984 = vmatmul.mubr.bf16.gmra.mrb[32].mxu1 %v4691_v33  ;;  %v11477_v33 = vld [vmem:[%s15353_s4 + $0xf8] ss:$12 sps:$4 sm:$0xff]  }
 0x6b7   :  { %9481 = vmatprep.mubr.msk.bf16.mxu1 %vm4055_vm3, %v4692_v16  ;;  %5189 = vmatpush1.bf16.msra.mxu1 %v11440_v44  ;;  %v11470_v16 = vld [vmem:[%s15353_s4 + $0x50] ss:$12 sps:$4 sm:$0xff]  }
 0x6b8   :  { %5190 = vmatprep.subr.bf16.mxu1 %v11445_v45  ;;  %v11490_v44 = vld [vmem:[%s15353_s4 + $0x270] ss:$12 sps:$4 sm:$0xff]   ;;  %v11495_v45 = vld [vmem:[%s15353_s4 + $0x28c] ss:$12 sps:$4 sm:$0xff]  }
 0x6bb   :  { %5191 = vmatpush1.bf16.msra.mxu1 %v11443_v46  ;;  %v5363_v46 = vsel %vm1752_vm1, %v5361_v26, %v5362_v41  ;;  %v11533_v26 = vld [vmem:[%s15353_s4 + $0x364] ss:$12 sps:$4 sm:$0xff]  }
 0x6bc   :  { %5192 = vmatprep.subr.bf16.mxu1 %v11448_v47  ;;  %v11493_v47 = vld [vmem:[%s15353_s4 + $0x288] ss:$12 sps:$4 sm:$0xff]  }
 0x6be   :  { %4992 = vmatmul.mubr.bf16.gmra.mrb[36].mxu1 %v4690_v27  ;;  %v11475_v27 = vld [vmem:[%s15353_s4 + $0xc8] ss:$12 sps:$4 sm:$0xff]  }
 0x6bf   :  { %5193 = vmatpush1.bf16.msra.mxu1 %v11446_v51  ;;  %9515 = vmatprep.mubr.msk.bf16.mxu1 %vm4055_vm3, %v4576_v56  ;;  %v11496_v51 = vld [vmem:[%s15353_s4 + $0x2a0] ss:$12 sps:$4 sm:$0xff]  }
 0x6c0   :  { %5194 = vmatprep.subr.bf16.mxu1 %v11451_v55  ;;  %v11501_v55 = vld [vmem:[%s15353_s4 + $0x2bc] ss:$12 sps:$4 sm:$0xff]  }
 0x6c3   :  { %5195 = vmatpush1.bf16.msra.mxu1 %v11449_v57  ;;  %v11504_v57 = vld [vmem:[%s15353_s4 + $0x2d4] ss:$12 sps:$4 sm:$0xff]  }
 0x6c4   :  { %5196 = vmatprep.subr.bf16.mxu1 %v11454_v37  ;;  %v11502_v37 = vld [vmem:[%s15353_s4 + $0x2d0] ss:$12 sps:$4 sm:$0xff]  }
 0x6c7   :  { %5197 = vmatpush1.bf16.msra.mxu1 %v11452_v63  ;;  %v11507_v63 = vld [vmem:[%s15353_s4 + $0x2ec] ss:$12 sps:$4 sm:$0xff]  }
 0x6c8   :  { %5198 = vmatprep.subr.bf16.mxu1 %v11457_v17  ;;  %v5301_v17 = vld [vmem:[#allocation2] sm:$0xf0] }
 0x6cb   :  { %5199 = vmatpush1.bf16.msra.mxu1 %v11455_v19  ;;  %v11505_v19 = vld [vmem:[%s15353_s4 + $0x2e8] ss:$12 sps:$4 sm:$0xff]  }
 0x6cc   :  { %5200 = vmatprep.subr.bf16.mxu1 %v11460_v0  ;;  %v5304_v0 = vld [vmem:[#allocation2 + $0x58] sm:$0xf] }
 0x6cf   :  { %5201 = vmatpush1.bf16.msra.mxu1 %v11458_v5  ;;  %v11510_v5 = vld [vmem:[%s15353_s4 + $0x304] ss:$12 sps:$4 sm:$0xff]  }
 0x6d0   :  { %5202 = vmatprep.subr.bf16.mxu1 %v11463_v43  ;;  %v5305_v43 = vpack.c.bf16 %v13898_v62, %v5301_v17  ;;  %v11540_v17 = vld [vmem:[%s15353_s4 + $0x3a8] ss:$12 sps:$4 sm:$0xff]  }
 0x6d3   :  { %5203 = vmatpush1.bf16.msra.mxu1 %v11461_v61  ;;  %v5308_v61 = vpack.c.bf16 %v5304_v0, %v13912_v13  ;;  %v11543_v0 = vld [vmem:[%s15353_s4 + $0x3c0] ss:$12 sps:$4 sm:$0xff]  }
 0x6d4   :  { %5204 = vmatprep.subr.bf16.mxu1 %v11466_v7  ;;  %v11508_v7 = vld [vmem:[%s15353_s4 + $0x300] ss:$12 sps:$4 sm:$0xff]  }
 0x6d7   :  { %5205 = vmatpush1.bf16.msra.mxu1 %v11464_v15  ;;  %v5358_v15 = vrot.slane %v5305_v43, 2  ;;  %v11546_v43 = vld [vmem:[%s15353_s4 + $0x3d8] ss:$12 sps:$4 sm:$0xff]  }
 0x6d8   :  { %5245 = vmatprep.subr.bf16.mxu1 %v11700_v12 }
 0x6da   :  { %5217 = vmatmul.mubr.bf16.vlgmr.msra.gmra.mrb[16].mxu1 %v4575_v9 }
 0x6db   :  { %9516 = vmatprep.mubr.msk.bf16.mxu1 %vm4055_vm3, %v13908_v3  ;;  %5246 = vmatpush1.bf16.msra.mxu1 %v11467_v25  ;;  %v14178_v25 = vrot.slane %v5308_v61, 2  ;;  %v11551_v61 = vld [vmem:[%s15353_s4 + $0x3f4] ss:$12 sps:$4 sm:$0xff]  }
 0x6dc   :  { %5247 = vmatprep.subr.bf16.mxu1 %v11700_v12 }
 0x6df   :  { %5248 = vmatpush1.bf16.msra.mxu1 %v11468_v54  ;;  %v11511_v54 = vld [vmem:[%s15353_s4 + $0x218] ss:$12 sps:$4 sm:$0xff]  }
 0x6e0   :  { %5249 = vmatprep.subr.bf16.mxu1 %v11700_v12 }
 0x6e2   :  { %5227 = vmatmul.mubr.bf16.gmra.mrb[20].mxu1 %v13910_v53 }
 0x6e3   :  { %9517 = vmatprep.mubr.msk.bf16.mxu1 %vm4055_vm3, %v4580_v14  ;;  %5250 = vmatpush1.bf16.msra.mxu1 %v11469_v34  ;;  %v5360_v34 = vsel %vm1752_vm1, %v5358_v15, %v5359_v24  ;;  %v11549_v15 = vld [vmem:[%s15353_s4 + $0x3f0] ss:$12 sps:$4 sm:$0xff]  }
 0x6e4   :  { %5251 = vmatprep.subr.bf16.mxu1 %v11700_v12 }
 0x6e7   :  { %5252 = vmatpush1.bf16.msra.mxu1 %v11470_v16  ;;  %v5367_v16 = vsel %vm1752_vm1, %v5362_v41, %v14178_v25 }
 0x6e8   :  { %5253 = vmatprep.subr.bf16.mxu1 %v11700_v12 }
 0x6ea   :  { %5237 = vmatmul.mubr.bf16.gmra.mrb[40].mxu1 %v4579_v58 }
 0x6eb   :  { %5254 = vmatpush1.bf16.msra.mxu1 %v11471_v20  ;;  %9518 = vmatprep.mubr.msk.bf16.mxu1 %vm4055_vm3, %v4576_v56  ;;  %v11499_v56 = vld [vmem:[%s15353_s4 + $0x2b8] ss:$12 sps:$4 sm:$0xff]   ;;  %v11512_v20 = vld [vmem:[%s15353_s4 + $0x230] ss:$12 sps:$4 sm:$0xff]  }
 0x6ec   :  { %5255 = vmatprep.subr.bf16.mxu1 %v11700_v12 }
 0x6ef   :  { %5256 = vmatpush1.bf16.msra.mxu1 %v11472_v49  ;;  %v11513_v49 = vld [vmem:[%s15353_s4 + $0x248] ss:$12 sps:$4 sm:$0xff]  }
 0x6f0   :  { %5257 = vmatprep.subr.bf16.mxu1 %v11700_v12 }
 0x6f3   :  { %5258 = vmatpush1.bf16.msra.mxu1 %v11473_v1 }
 0x6f4   :  { %5259 = vmatprep.subr.bf16.mxu1 %v11700_v12 }
 0x6f7   :  { %5260 = vmatpush1.bf16.msra.mxu1 %v11474_v23  ;;  %v11514_v23 = vld [vmem:[%s15353_s4 + $0x260] ss:$12 sps:$4 sm:$0xff]  }
 0x6f8   :  { %5261 = vmatprep.subr.bf16.mxu1 %v11700_v12 }
 0x6fb   :  { %5262 = vmatpush1.bf16.msra.mxu1 %v11475_v27  ;;  %v11515_v27 = vld [vmem:[%s15353_s4 + $0x278] ss:$12 sps:$4 sm:$0xff]  }
 0x6fc   :  { %5263 = vmatprep.subr.bf16.mxu1 %v11700_v12 }
 0x6ff   :  { %5264 = vmatpush1.bf16.msra.mxu1 %v11476_v60  ;;  %v11516_v60 = vld [vmem:[%s15353_s4 + $0x290] ss:$12 sps:$4 sm:$0xff]  }
 0x700   :  { %5265 = vmatprep.subr.bf16.mxu1 %v11700_v12 }
 0x703   :  { %5266 = vmatpush1.bf16.msra.mxu1 %v11477_v33  ;;  %v11517_v33 = vld [vmem:[%s15353_s4 + $0x2a8] ss:$12 sps:$4 sm:$0xff]  }
 0x704   :  { %5556 = vmatprep.subr.bf16.mxu1 %v11480_v35  ;;  %v11518_v35 = vld [vmem:[%s15353_s4 + $0x2c0] ss:$12 sps:$4 sm:$0xff]  }
 0x706   :  { %5278 = vmatmul.mubr.bf16.vlgmr.msra.gmra.mrb[44].mxu1 %v4575_v9  ;;  %v5303_v9 = vld [vmem:[#allocation2 + $0x50] sm:$0xf] }
 0x707   :  { %9519 = vmatprep.mubr.msk.bf16.mxu1 %vm4055_vm3, %v13908_v3  ;;  %5557 = vmatpush1.bf16.msra.mxu1 %v11478_v36  ;;  %v11519_v36 = vld [vmem:[%s15353_s4 + $0x2d8] ss:$12 sps:$4 sm:$0xff]  }
 0x708   :  { %5558 = vmatprep.subr.bf16.mxu1 %v11483_v4  ;;  %v11520_v4 = vld [vmem:[%s15353_s4 + $0x2f0] ss:$12 sps:$4 sm:$0xff]  }
 0x70b   :  { %5559 = vmatpush1.bf16.msra.mxu1 %v11481_v38  ;;  %v11521_v38 = vld [vmem:[%s15353_s4 + $0x308] ss:$12 sps:$4 sm:$0xff]  }
 0x70c   :  { %5560 = vmatprep.subr.bf16.mxu1 %v11486_v18  ;;  %v11524_v18 = vld [vmem:[%s15353_s4 + $0x31c] ss:$12 sps:$4 sm:$0xff]  }
 0x70e   :  { %5286 = vmatmul.mubr.bf16.gmra.mrb[48].mxu1 %v13910_v53 }
 0x70f   :  { %9520 = vmatprep.mubr.msk.bf16.mxu1 %vm4055_vm3, %v4580_v14  ;;  %5561 = vmatpush1.bf16.msra.mxu1 %v11484_v39  ;;  %v5307_v14 = vpack.c.bf16 %v5303_v9, %v13917_v32  ;;  %v11522_v39 = vld [vmem:[%s15353_s4 + $0x318] ss:$12 sps:$4 sm:$0xff]  }
 0x710   :  { %5562 = vmatprep.subr.bf16.mxu1 %v11489_v50  ;;  %v11525_v50 = vld [vmem:[%s15353_s4 + $0x330] ss:$12 sps:$4 sm:$0xff]  }
 0x713   :  { %5563 = vmatpush1.bf16.msra.mxu1 %v11487_v6  ;;  %v11528_v6 = vld [vmem:[%s15353_s4 + $0x348] ss:$12 sps:$4 sm:$0xff]  }
 0x714   :  { %5564 = vmatprep.subr.bf16.mxu1 %v11492_v22  ;;  %v5689_v22 = vld [vmem:[#allocation2 + $0x8] sm:$0xc0] }
 0x716   :  { %5294 = vmatmul.mubr.bf16.gmra.mrb[52].mxu1 %v4579_v58  ;;  %v14193_v58 = vrot.slane %v5307_v14, 2 }
 0x717   :  { %5565 = vmatpush1.bf16.msra.mxu1 %v11490_v44  ;;  %9598 = vmatprep.mubr.msk.bf16.mxu1 %vm4055_vm3, %v5363_v46 }
 0x718   :  { %5566 = vmatprep.subr.bf16.mxu1 %v11495_v45  ;;  %v5365_v1 = vsel %vm1752_vm1, %v5359_v24, %v14193_v58  ;;  %v5693_v45 = vpack.c.bf16 %v13896_v52, %v5689_v22  ;;  %v11534_v52 = vld [vmem:[%s15353_s4 + $0x378] ss:$12 sps:$4 sm:$0xff]  }
 0x719   :  { %v5691_v24 = vld [vmem:[#allocation2 + $0x58] sm:$0x3f] }
 0x71a   :  { %v5695_v14 = vpack.c.bf16 %v5691_v24, %v13912_v13  ;;  %v11583_v24 = vld [vmem:[%s15353_s4 + $0x49c] ss:$12 sps:$4 sm:$0xff]  }
 0x71b   :  { %5567 = vmatpush1.bf16.msra.mxu1 %v11493_v47  ;;  %v11531_v47 = vld [vmem:[%s15353_s4 + $0x360] ss:$12 sps:$4 sm:$0xff]  }
 0x71c   :  { %5568 = vmatprep.subr.bf16.mxu1 %v11498_v48 }
 0x71f   :  { %5569 = vmatpush1.bf16.msra.mxu1 %v11496_v51  ;;  %v11536_v51 = vld [vmem:[%s15353_s4 + $0x37c] ss:$12 sps:$4 sm:$0xff]  }
 0x720   :  { %5570 = vmatprep.subr.bf16.mxu1 %v11501_v55  ;;  %v5748_v55 = vrot.slane %v5693_v45, 3  ;;  %v11560_v45 = vld [vmem:[%s15353_s4 + $0x398] ss:$12 sps:$4 sm:$0xff]  }
 0x723   :  { %5571 = vmatpush1.bf16.msra.mxu1 %v11499_v56  ;;  %v5749_v56 = vrot.slane %v13908_v3, 3  ;;  %v11537_v3 = vld [vmem:[%s15353_s4 + $0x390] ss:$12 sps:$4 sm:$0xff]  }
 0x724   :  { %5572 = vmatprep.subr.bf16.mxu1 %v11504_v57  ;;  %v11539_v57 = vld [vmem:[%s15353_s4 + $0x394] ss:$12 sps:$4 sm:$0xff]  }
 0x727   :  { %5573 = vmatpush1.bf16.msra.mxu1 %v11502_v37  ;;  %v14281_v37 = vsel %vm2579_vm2, %v5748_v55, %v5749_v56  ;;  %v11565_v55 = vld [vmem:[%s15353_s4 + $0x410] ss:$12 sps:$4 sm:$0xff]  }
 0x728   :  { %5574 = vmatprep.subr.bf16.mxu1 %v11507_v63  ;;  %v11542_v63 = vld [vmem:[%s15353_s4 + $0x3ac] ss:$12 sps:$4 sm:$0xff]  }
 0x72b   :  { %5575 = vmatpush1.bf16.msra.mxu1 %v11505_v19  ;;  %v11545_v19 = vld [vmem:[%s15353_s4 + $0x3c4] ss:$12 sps:$4 sm:$0xff]  }
 0x72c   :  { %5576 = vmatprep.subr.bf16.mxu1 %v11510_v5  ;;  %v11548_v5 = vld [vmem:[%s15353_s4 + $0x3dc] ss:$12 sps:$4 sm:$0xff]  }
 0x72f   :  { %5577 = vmatpush1.bf16.msra.mxu1 %v11508_v7  ;;  %v5688_v7 = vld [vmem:[#allocation2] sm:$0xc0] }
 0x730   :  { %5617 = vmatprep.subr.bf16.mxu1 %v11700_v12 }
 0x732   :  { %5589 = vmatmul.mubr.bf16.vlgmr.msra.gmra.mrb[16].mxu1 %v5360_v34 }
 0x733   :  { %9599 = vmatprep.mubr.msk.bf16.mxu1 %vm4055_vm3, %v5367_v16  ;;  %5618 = vmatpush1.bf16.msra.mxu1 %v11511_v54  ;;  %v5692_v54 = vpack.c.bf16 %v13898_v62, %v5688_v7  ;;  %v11555_v62 = vld [vmem:[%s15353_s4 + $0x320] ss:$12 sps:$4 sm:$0xff]   ;;  %v11575_v7 = vld [vmem:[%s15353_s4 + $0x468] ss:$12 sps:$4 sm:$0xff]  }
 0x734   :  { %5619 = vmatprep.subr.bf16.mxu1 %v11700_v12 }
 0x737   :  { %5620 = vmatpush1.bf16.msra.mxu1 %v11512_v20  ;;  %v11552_v20 = vld [vmem:[%s15353_s4 + $0x408] ss:$12 sps:$4 sm:$0xff]  }
 0x738   :  { %5621 = vmatprep.subr.bf16.mxu1 %v11700_v12 }
 0x73a   :  { %5599 = vmatmul.mubr.bf16.gmra.mrb[20].mxu1 %v5365_v1 }
 0x73b   :  { %9600 = vmatprep.mubr.msk.bf16.mxu1 %vm4055_vm3, %v14178_v25  ;;  %5622 = vmatpush1.bf16.msra.mxu1 %v11513_v49  ;;  %v5745_v49 = vrot.slane %v5692_v54, 3  ;;  %v11586_v54 = vld [vmem:[%s15353_s4 + $0x4b4] ss:$12 sps:$4 sm:$0xff]  }
 0x73c   :  { %5623 = vmatprep.subr.bf16.mxu1 %v11700_v12 }
 0x73f   :  { %5624 = vmatpush1.bf16.msra.mxu1 %v11514_v23  ;;  %v14325_v23 = vrot.slane %v5695_v14, 3  ;;  %v11589_v14 = vld [vmem:[%s15353_s4 + $0x4cc] ss:$12 sps:$4 sm:$0xff]  }
 0x740   :  { %5625 = vmatprep.subr.bf16.mxu1 %v11700_v12 }
 0x742   :  { %5609 = vmatmul.mubr.bf16.gmra.mrb[56].mxu1 %v14193_v58 }
 0x743   :  { %5626 = vmatpush1.bf16.msra.mxu1 %v11515_v27  ;;  %9601 = vmatprep.mubr.msk.bf16.mxu1 %vm4055_vm3, %v5363_v46  ;;  %v5690_v27 = vld [vmem:[#allocation2 + $0x50] sm:$0x3f] }
 0x744   :  { %5627 = vmatprep.subr.bf16.mxu1 %v11700_v12 }
 0x747   :  { %5628 = vmatpush1.bf16.msra.mxu1 %v11516_v60 }
 0x748   :  { %5629 = vmatprep.subr.bf16.mxu1 %v11700_v12 }
 0x74b   :  { %5630 = vmatpush1.bf16.msra.mxu1 %v11517_v33  ;;  %v5694_v33 = vpack.c.bf16 %v5690_v27, %v13917_v32  ;;  %v11557_v32 = vld [vmem:[%s15353_s4 + $0x350] ss:$12 sps:$4 sm:$0xff]   ;;  %v11598_v27 = vld [vmem:[%s15353_s4 + $0x514] ss:$12 sps:$4 sm:$0xff]  }
 0x74c   :  { %5631 = vmatprep.subr.bf16.mxu1 %v11700_v12 }
 0x74f   :  { %5632 = vmatpush1.bf16.msra.mxu1 %v11518_v35 }
 0x750   :  { %5633 = vmatprep.subr.bf16.mxu1 %v11700_v12 }
 0x753   :  { %5634 = vmatpush1.bf16.msra.mxu1 %v11519_v36 }
 0x754   :  { %5635 = vmatprep.subr.bf16.mxu1 %v11700_v12 }
 0x757   :  { %5636 = vmatpush1.bf16.msra.mxu1 %v11520_v4  ;;  %v11556_v4 = vld [vmem:[%s15353_s4 + $0x338] ss:$12 sps:$4 sm:$0xff]  }
 0x758   :  { %5637 = vmatprep.subr.bf16.mxu1 %v11700_v12 }
 0x75b   :  { %5638 = vmatpush1.bf16.msra.mxu1 %v11521_v38 }
 0x75c   :  { %5943 = vmatprep.subr.bf16.mxu1 %v11524_v18  ;;  %v14344_v18 = vrot.slane %v5694_v33, 3 }
 0x75e   :  { %5650 = vmatmul.mubr.bf16.vlgmr.msra.gmra.mrb[60].mxu1 %v5360_v34 }
 0x75f   :  { %9602 = vmatprep.mubr.msk.bf16.mxu1 %vm4055_vm3, %v5367_v16  ;;  %5944 = vmatpush1.bf16.msra.mxu1 %v11522_v39 }
 0x760   :  { %5945 = vmatprep.subr.bf16.mxu1 %v11527_v11 }
 0x763   :  { %5946 = vmatpush1.bf16.msra.mxu1 %v11525_v50 }
 0x764   :  { %5947 = vmatprep.subr.bf16.mxu1 %v11530_v40 }
 0x765   :  { %v14259_v41 = vpop.f32.mrb[24].mxu1 }
 0x766   :  { %5658 = vmatmul.mubr.bf16.gmra.mrb[64].mxu1 %v5365_v1  ;;  %v14261_v44 = vpop.f32.mrb[25].mxu1  ;;  %v5746_v1 = vrot.slane %v13910_v53, 3  ;;  %v5754_v53 = vsel %vm2579_vm2, %v5749_v56, %v14325_v23  ;;  %v11568_v56 = vld [vmem:[%s15353_s4 + $0x424] ss:$12 sps:$4 sm:$0xff]  }
 0x767   :  { %9603 = vmatprep.mubr.msk.bf16.mxu1 %vm4055_vm3, %v14178_v25  ;;  %5948 = vmatpush1.bf16.msra.mxu1 %v11528_v6  ;;  %v4940_v46 = vpop.f32.mrb[26].mxu1  ;;  %v11554_v25 = vld [vmem:[%s15353_s4 + $0x40c] ss:$12 sps:$4 sm:$0xff]   ;;  %v11558_v6 = vld [vmem:[%s15353_s4 + $0x368] ss:$12 sps:$4 sm:$0xff]  }
 0x768   :  { %v4941_v48 = vpop.f32.mrb[27].mxu1  ;;  %5949 = vmatprep.subr.bf16.mxu1 %v11533_v26  ;;  %v5747_v60 = vsel %vm2579_vm2, %v5745_v49, %v5746_v1  ;;  %v5752_v11 = vsel %vm2579_vm2, %v5746_v1, %v14344_v18  ;;  %v11559_v26 = vld [vmem:[%s15353_s4 + $0x380] ss:$12 sps:$4 sm:$0xff]   ;;  %v11561_v46 = vld [vmem:[%s15353_s4 + $0x3b0] ss:$12 sps:$4 sm:$0xff]   ;;  %vm7404_vm2 = vcmask 785410  }
 0x769   :  { %v11563_v48 = vld [vmem:[%s15353_s4 + $0x3e0] ss:$12 sps:$4 sm:$0xff]   ;;  %v11595_v1 = vld [vmem:[%s15353_s4 + $0x4fc] ss:$12 sps:$4 sm:$0xff]  }
 0x76a   :  { %v11590_v49 = vld [vmem:[%s15353_s4 + $0x4e0] ss:$12 sps:$4 sm:$0xff]  }
 0x76b   :  { %5950 = vmatpush1.bf16.msra.mxu1 %v11531_v47  ;;  %v11562_v47 = vld [vmem:[%s15353_s4 + $0x3c8] ss:$12 sps:$4 sm:$0xff]  }
 0x76c   :  { %5951 = vmatprep.subr.bf16.mxu1 %v11536_v51  ;;  %v11564_v51 = vld [vmem:[%s15353_s4 + $0x3f8] ss:$12 sps:$4 sm:$0xff]  }
 0x76e   :  { %5666 = vmatmul.mubr.bf16.gmra.mrb[68].mxu1 %v14193_v58 }
 0x76f   :  { %5952 = vmatpush1.bf16.msra.mxu1 %v11534_v52  ;;  %9681 = vmatprep.mubr.msk.bf16.mxu1 %vm4055_vm3, %v14281_v37  ;;  %v11566_v52 = vld [vmem:[%s15353_s4 + $0x420] ss:$12 sps:$4 sm:$0xff]  }
 0x770   :  { %5953 = vmatprep.subr.bf16.mxu1 %v11539_v57  ;;  %v11571_v57 = vld [vmem:[%s15353_s4 + $0x43c] ss:$12 sps:$4 sm:$0xff]  }
 0x773   :  { %5954 = vmatpush1.bf16.msra.mxu1 %v11537_v3  ;;  %v11574_v3 = vld [vmem:[%s15353_s4 + $0x454] ss:$12 sps:$4 sm:$0xff]  }
 0x774   :  { %5955 = vmatprep.subr.bf16.mxu1 %v11542_v63  ;;  %v11572_v63 = vld [vmem:[%s15353_s4 + $0x450] ss:$12 sps:$4 sm:$0xff]  }
 0x777   :  { %5956 = vmatpush1.bf16.msra.mxu1 %v11540_v17  ;;  %v11577_v17 = vld [vmem:[%s15353_s4 + $0x46c] ss:$12 sps:$4 sm:$0xff]  }
 0x778   :  { %5957 = vmatprep.subr.bf16.mxu1 %v11545_v19 }
 0x77b   :  { %5958 = vmatpush1.bf16.msra.mxu1 %v11543_v0 }
 0x77c   :  { %5959 = vmatprep.subr.bf16.mxu1 %v11548_v5 }
 0x77f   :  { %5960 = vmatpush1.bf16.msra.mxu1 %v11546_v43 }
 0x780   :  { %5961 = vmatprep.subr.bf16.mxu1 %v11551_v61 }
 0x781   :  { %v14315_v9 = vpop.f32.mrb[28].mxu1 }
 0x782   :  { %v4979_v34 = vpop.f32.mrb[29].mxu1 }
 0x783   :  { %v14319_v16 = vpop.f32.mrb[30].mxu1  ;;  %5962 = vmatpush1.bf16.msra.mxu1 %v11549_v15  ;;  %v11584_v34 = vld [vmem:[%s15353_s4 + $0x4b0] ss:$12 sps:$4 sm:$0xff]  }
 0x784   :  { %v4982_v58 = vpop.f32.mrb[31].mxu1  ;;  %5963 = vmatprep.subr.bf16.mxu1 %v11554_v25  ;;  %v11581_v25 = vld [vmem:[%s15353_s4 + $0x498] ss:$12 sps:$4 sm:$0xff]  }
 0x785   :  { %v11592_v58 = vld [vmem:[%s15353_s4 + $0x4e4] ss:$12 sps:$4 sm:$0xff]  }
 0x787   :  { %5964 = vmatpush1.bf16.msra.mxu1 %v11552_v20  ;;  %v11587_v20 = vld [vmem:[%s15353_s4 + $0x4c8] ss:$12 sps:$4 sm:$0xff]  }
 0x788   :  { %6004 = vmatprep.subr.bf16.mxu1 %v11700_v12 }
 0x789   :  { %v14331_v13 = vpop.f32.mrb[32].mxu1 }
 0x78a   :  { %v4987_v35 = vpop.f32.mrb[33].mxu1  ;;  %5976 = vmatmul.mubr.bf16.vlgmr.msra.gmra.mrb[16].mxu1 %v5747_v60 }
 0x78b   :  { %v14337_v36 = vpop.f32.mrb[34].mxu1  ;;  %9682 = vmatprep.mubr.msk.bf16.mxu1 %vm4055_vm3, %v5754_v53  ;;  %6005 = vmatpush1.bf16.msra.mxu1 %v11555_v62 }
 0x78c   :  { %v4990_v38 = vpop.f32.mrb[35].mxu1  ;;  %6006 = vmatprep.subr.bf16.mxu1 %v11700_v12 }
 0x78f   :  { %6007 = vmatpush1.bf16.msra.mxu1 %v11556_v4 }
 0x790   :  { %6008 = vmatprep.subr.bf16.mxu1 %v11700_v12 }
 0x791   :  { %v14350_v39 = vpop.f32.mrb[36].mxu1 }
 0x792   :  { %v4995_v50 = vpop.f32.mrb[37].mxu1  ;;  %5986 = vmatmul.mubr.bf16.gmra.mrb[20].mxu1 %v5752_v11 }
 0x793   :  { %v4996_v40 = vpop.f32.mrb[38].mxu1  ;;  %9683 = vmatprep.mubr.msk.bf16.mxu1 %vm4055_vm3, %v14325_v23  ;;  %6009 = vmatpush1.bf16.msra.mxu1 %v11557_v32 }
 0x794   :  { %v4997_v22 = vpop.f32.mrb[39].mxu1  ;;  %6010 = vmatprep.subr.bf16.mxu1 %v11700_v12 }
 0x795   :  { %v11601_v22 = vld [vmem:[%s15353_s4 + $0x458] ss:$12 sps:$4 sm:$0xff]  }
 0x797   :  { %6011 = vmatpush1.bf16.msra.mxu1 %v11558_v6 }
 0x798   :  { %6012 = vmatprep.subr.bf16.mxu1 %v11700_v12 }
 0x79a   :  { %5996 = vmatmul.mubr.bf16.gmra.mrb[72].mxu1 %v14344_v18 }
 0x79b   :  { %6013 = vmatpush1.bf16.msra.mxu1 %v11559_v26  ;;  %9684 = vmatprep.mubr.msk.bf16.mxu1 %vm4055_vm3, %v14281_v37  ;;  %v11569_v37 = vld [vmem:[%s15353_s4 + $0x438] ss:$12 sps:$4 sm:$0xff]  }
 0x79c   :  { %6014 = vmatprep.subr.bf16.mxu1 %v11700_v12 }
 0x79f   :  { %6015 = vmatpush1.bf16.msra.mxu1 %v11560_v45 }
 0x7a0   :  { %6016 = vmatprep.subr.bf16.mxu1 %v11700_v12 }
 0x7a3   :  { %6017 = vmatpush1.bf16.msra.mxu1 %v11561_v46 }
 0x7a4   :  { %6018 = vmatprep.subr.bf16.mxu1 %v11700_v12 }
 0x7a7   :  { %6019 = vmatpush1.bf16.msra.mxu1 %v11562_v47 }
 0x7a8   :  { %6020 = vmatprep.subr.bf16.mxu1 %v11700_v12 }
 0x7ab   :  { %6021 = vmatpush1.bf16.msra.mxu1 %v11563_v48  ;;  %v11602_v48 = vld [vmem:[%s15353_s4 + $0x470] ss:$12 sps:$4 sm:$0xff]  }
 0x7ac   :  { %6022 = vmatprep.subr.bf16.mxu1 %v11700_v12 }
 0x7af   :  { %6023 = vmatpush1.bf16.msra.mxu1 %v11564_v51 }
 0x7b0   :  { %6024 = vmatprep.subr.bf16.mxu1 %v11700_v12 }
 0x7b3   :  { %6025 = vmatpush1.bf16.msra.mxu1 %v11565_v55  ;;  %v6075_v55 = vld [vmem:[#allocation2 + $0x50] sm:$0xff] }
 0x7b4   :  { %6313 = vmatprep.subr.bf16.mxu1 %v11568_v56  ;;  %v6081_v56 = vpack.c.bf16 %v6075_v55, %v6075_v55 }
 0x7b6   :  { %6037 = vmatmul.mubr.bf16.vlgmr.msra.gmra.mrb[76].mxu1 %v5747_v60 }
 0x7b7   :  { %9685 = vmatprep.mubr.msk.bf16.mxu1 %vm4055_vm3, %v5754_v53  ;;  %6314 = vmatpush1.bf16.msra.mxu1 %v11566_v52  ;;  %v11596_v53 = vld [vmem:[%s15353_s4 + $0x510] ss:$12 sps:$4 sm:$0xff]   ;;  %v11604_v52 = vld [vmem:[%s15353_s4 + $0x4a0] ss:$12 sps:$4 sm:$0xff]  }
 0x7b8   :  { %6315 = vmatprep.subr.bf16.mxu1 %v11571_v57  ;;  %v11605_v57 = vld [vmem:[%s15353_s4 + $0x4b8] ss:$12 sps:$4 sm:$0xff]  }
 0x7bb   :  { %6316 = vmatpush1.bf16.msra.mxu1 %v11569_v37  ;;  %v11606_v37 = vld [vmem:[%s15353_s4 + $0x4d0] ss:$12 sps:$4 sm:$0xff]  }
 0x7bc   :  { %6317 = vmatprep.subr.bf16.mxu1 %v11574_v3  ;;  %v11608_v3 = vld [vmem:[%s15353_s4 + $0x500] ss:$12 sps:$4 sm:$0xff]  }
 0x7bd   :  { %v5238_v19 = vpop.f32.mrb[40].mxu1 }
 0x7be   :  { %v14414_v0 = vadd.f32 %v5238_v19, %v14259_v41  ;;  %v5240_v5 = vpop.f32.mrb[41].mxu1  ;;  %6045 = vmatmul.mubr.bf16.gmra.mrb[80].mxu1 %v5752_v11  ;;  %v11580_v41 = vld [vmem:[%s15353_s4 + $0x484] ss:$12 sps:$4 sm:$0xff]  }
 0x7bf   :  { %v14417_v43 = vadd.f32 %v5240_v5, %v14261_v44  ;;  %v5242_v61 = vpop.f32.mrb[42].mxu1  ;;  %9686 = vmatprep.mubr.msk.bf16.mxu1 %vm4055_vm3, %v14325_v23  ;;  %6318 = vmatpush1.bf16.msra.mxu1 %v11572_v63  ;;  %v11578_v44 = vld [vmem:[%s15353_s4 + $0x480] ss:$12 sps:$4 sm:$0xff]   ;;  %v11593_v23 = vld [vmem:[%s15353_s4 + $0x4f8] ss:$12 sps:$4 sm:$0xff]  }
 0x7c0   :  { %v5243_v15 = vpop.f32.mrb[43].mxu1  ;;  %6319 = vmatprep.subr.bf16.mxu1 %v11577_v17  ;;  %v11609_v63 = vld [vmem:[%s15353_s4 + $0x518] ss:$12 sps:$4 sm:$0xff]  }
 0x7c3   :  { %6320 = vmatpush1.bf16.msra.mxu1 %v11575_v7 }
 0x7c4   :  { %6321 = vmatprep.subr.bf16.mxu1 %v11580_v41 }
 0x7c6   :  { %6053 = vmatmul.mubr.bf16.gmra.mrb[84].mxu1 %v14344_v18  ;;  %v11599_v18 = vld [vmem:[%s15353_s4 + $0x428] ss:$12 sps:$4 sm:$0xff]  }
 0x7c7   :  { %6322 = vmatpush1.bf16.msra.mxu1 %v11578_v44  ;;  %9764 = vmatprep.mubr.msk.bf16.mxu1 %vm4055_vm3, %v13903_v2 }
 0x7c8   :  { %6323 = vmatprep.subr.bf16.mxu1 %v11583_v24 }
 0x7cb   :  { %6324 = vmatpush1.bf16.msra.mxu1 %v11581_v25 }
 0x7cc   :  { %6325 = vmatprep.subr.bf16.mxu1 %v11586_v54 }
 0x7cf   :  { %6326 = vmatpush1.bf16.msra.mxu1 %v11584_v34 }
 0x7d0   :  { %6327 = vmatprep.subr.bf16.mxu1 %v11589_v14  ;;  %v6594_v14 = vld [vmem:[%s15354_s5 + $0x80] sm:$0xff] }
 0x7d3   :  { %6328 = vmatpush1.bf16.msra.mxu1 %v11587_v20  ;;  %v6595_v20 = vld [vmem:[%s15354_s5 + $0x88] sm:$0xff] }
 0x7d4   :  { %6329 = vmatprep.subr.bf16.mxu1 %v11592_v58 }
 0x7d7   :  { %6330 = vmatpush1.bf16.msra.mxu1 %v11590_v49  ;;  %v14564_v49 = vpack.c.bf16 %v6595_v20, %v6594_v14  ;;  %v14706_v20 = vld [vmem:[#allocation3] sm:$0xff] }
 0x7d8   :  { %6331 = vmatprep.subr.bf16.mxu1 %v11595_v1  ;;  %7324 = vst.msk [vmem:[#allocation3 + $0x10] sm:$0xff] %vm6512_vm12, %v14706_v20  ;;  %7327 = vst.msk [vmem:[#allocation3 + $0x28] sm:$0xff] %vm6512_vm12, %v14706_v20 }
 0x7d9   :  { %v5279_v62 = vpop.f32.mrb[44].mxu1  ;;  %7330 = vst.msk [vmem:[#allocation3 + $0x40] sm:$0xff] %vm6512_vm12, %v14706_v20  ;;  %7333 = vst.msk [vmem:[#allocation3 + $0x58] sm:$0xff] %vm6512_vm12, %v14706_v20 }
 0x7da   :  { %v14467_v60 = vadd.f32 %v5279_v62, %v14315_v9  ;;  %v5281_v33 = vpop.f32.mrb[45].mxu1  ;;  %7336 = vst.msk [vmem:[#allocation3 + $0x70] sm:$0xff] %vm6512_vm12, %v14706_v20 }
 0x7db   :  { %v5282_v35 = vpop.f32.mrb[46].mxu1  ;;  %6332 = vmatpush1.bf16.msra.mxu1 %v11593_v23  ;;  %v6579_v33 = vld [vmem:[%s15354_s5 + $0x8] sm:$0xff]  ;;  %7340 = vst.msk [vmem:[#allocation3 + $0x88] sm:$0xf] %vm7339_vm14, %v14706_v20 }
 0x7dc   :  { %v14473_v4 = vadd.f32 %v5282_v35, %v14319_v16  ;;  %v5284_v38 = vpop.f32.mrb[47].mxu1  ;;  %6333 = vmatprep.subr.bf16.mxu1 %v11598_v27  ;;  %v11600_v16 = vld [vmem:[%s15353_s4 + $0x440] ss:$12 sps:$4 sm:$0xff]  }
 0x7dd   :  { %v6580_v38 = vld [vmem:[%s15354_s5 + $0x10] sm:$0xff] }
 0x7df   :  { %6334 = vmatpush1.bf16.msra.mxu1 %v11596_v53  ;;  %v6596_v53 = vld [vmem:[%s15354_s5 + $0x90] sm:$0xff] }
 0x7e0   :  { %6374 = vmatprep.subr.bf16.mxu1 %v11700_v12 }
 0x7e1   :  { %v5287_v9 = vpop.f32.mrb[48].mxu1 }
 0x7e2   :  { %v14480_v32 = vadd.f32 %v5287_v9, %v14331_v13  ;;  %v5289_v11 = vpop.f32.mrb[49].mxu1  ;;  %6346 = vmatmul.mubr.bf16.vlgmr.msra.gmra.mrb[16].mxu1 %v13906_v8  ;;  %v6076_v13 = vld [vmem:[#allocation2 + $0x58] sm:$0xff] }
 0x7e3   :  { %v5290_v50 = vpop.f32.mrb[50].mxu1  ;;  %9765 = vmatprep.mubr.msk.bf16.mxu1 %vm4055_vm3, %v13933_v30  ;;  %6375 = vmatpush1.bf16.msra.mxu1 %v11599_v18  ;;  %v6082_v45 = vpack.c.bf16 %v6076_v13, %v6076_v13  ;;  %v6581_v9 = vld [vmem:[%s15354_s5 + $0x18] sm:$0xff]  ;;  %v6599_v11 = vld [vmem:[%s15354_s5 + $0xa8] sm:$0xff] }
 0x7e4   :  { %v14489_v40 = vadd.f32 %v5290_v50, %v14337_v36  ;;  %v5292_v6 = vpop.f32.mrb[51].mxu1  ;;  %6376 = vmatprep.subr.bf16.mxu1 %v11700_v12  ;;  %v14599_v50 = vpack.c.bf16 %v6581_v9, %v6580_v38 }
 0x7e5   :  { %v6583_v6 = vld [vmem:[%s15354_s5 + $0x28] sm:$0xff] }
 0x7e7   :  { %6377 = vmatpush1.bf16.msra.mxu1 %v11600_v16 }
 0x7e8   :  { %6378 = vmatprep.subr.bf16.mxu1 %v11700_v12 }
 0x7e9   :  { %v5295_v26 = vpop.f32.mrb[52].mxu1 }
 0x7ea   :  { %v14497_v46 = vadd.f32 %v5295_v26, %v14350_v39  ;;  %v5297_v47 = vpop.f32.mrb[53].mxu1  ;;  %6356 = vmatmul.mubr.bf16.gmra.mrb[20].mxu1 %v13936_v31  ;;  %v11603_v39 = vld [vmem:[%s15353_s4 + $0x488] ss:$12 sps:$4 sm:$0xff]   ;;  %v6601_v26 = vld [vmem:[%s15354_s5 + $0xb8] sm:$0xff] }
 0x7eb   :  { %v5298_v36 = vpop.f32.mrb[54].mxu1  ;;  %9766 = vmatprep.mubr.msk.bf16.mxu1 %vm4055_vm3, %v6082_v45  ;;  %6379 = vmatpush1.bf16.msra.mxu1 %v11601_v22  ;;  %v6600_v22 = vld [vmem:[%s15354_s5 + $0xb0] sm:$0xff]  ;;  %v6585_v47 = vld [vmem:[%s15354_s5 + $0x38] sm:$0xff] }
 0x7ec   :  { %v5299_v51 = vpop.f32.mrb[55].mxu1  ;;  %6380 = vmatprep.subr.bf16.mxu1 %v11700_v12 }
 0x7ed   :  { %v6603_v51 = vld [vmem:[%s15354_s5 + $0xc8] sm:$0xff] }
 0x7ef   :  { %6381 = vmatpush1.bf16.msra.mxu1 %v11602_v48  ;;  %v6602_v48 = vld [vmem:[%s15354_s5 + $0xc0] sm:$0xff] }
 0x7f0   :  { %6382 = vmatprep.subr.bf16.mxu1 %v11700_v12  ;;  %v14639_v55 = vpack.c.bf16 %v6603_v51, %v6602_v48 }
 0x7f2   :  { %6366 = vmatmul.mubr.bf16.gmra.mrb[88].mxu1 %v6081_v56 }
 0x7f3   :  { %6383 = vmatpush1.bf16.msra.mxu1 %v11603_v39  ;;  %9767 = vmatprep.mubr.msk.bf16.mxu1 %vm4055_vm3, %v13903_v2  ;;  %v11607_v2 = vld [vmem:[%s15353_s4 + $0x4e8] ss:$12 sps:$4 sm:$0xff]   ;;  %v6586_v39 = vld [vmem:[%s15354_s5 + $0x40] sm:$0xff] }
 0x7f4   :  { %6384 = vmatprep.subr.bf16.mxu1 %v11700_v12 }
 0x7f7   :  { %6385 = vmatpush1.bf16.msra.mxu1 %v11604_v52 }
 0x7f8   :  { %6386 = vmatprep.subr.bf16.mxu1 %v11700_v12 }
 0x7fb   :  { %6387 = vmatpush1.bf16.msra.mxu1 %v11605_v57  ;;  %v6604_v57 = vld [vmem:[%s15354_s5 + $0xd0] sm:$0xff] }
 0x7fc   :  { %6388 = vmatprep.subr.bf16.mxu1 %v11700_v12 }
 0x7ff   :  { %6389 = vmatpush1.bf16.msra.mxu1 %v11606_v37  ;;  %v6605_v37 = vld [vmem:[%s15354_s5 + $0xd8] sm:$0xff] }
 0x800   :  { %6390 = vmatprep.subr.bf16.mxu1 %v11700_v12 }
 0x803   :  { %6391 = vmatpush1.bf16.msra.mxu1 %v11607_v2  ;;  %v6588_v2 = vld [vmem:[%s15354_s5 + $0x50] sm:$0xff] }
 0x804   :  { %6392 = vmatprep.subr.bf16.mxu1 %v11700_v12 }
 0x807   :  { %6393 = vmatpush1.bf16.msra.mxu1 %v11608_v3  ;;  %v14660_v3 = vpack.c.bf16 %v6605_v37, %v6604_v57 }
 0x808   :  { %6394 = vmatprep.subr.bf16.mxu1 %v11700_v12 }
 0x80b   :  { %6395 = vmatpush1.bf16.msra.mxu1 %v11609_v63  ;;  %v6589_v63 = vld [vmem:[%s15354_s5 + $0x58] sm:$0xff] }
 0x80c   :  { %10397 = vmatprep.subr.bf16.mxu1 %v14564_v49 }
 0x80e   :  { %6407 = vmatmul.mubr.bf16.vlgmr.msra.gmra.mrb[92].mxu1 %v13906_v8 }
 0x80f   :  { %9768 = vmatprep.mubr.msk.bf16.mxu1 %vm4055_vm3, %v13933_v30 }
 0x815   :  { %v5610_v17 = vpop.f32.mrb[56].mxu1 }
 0x816   :  { %v14539_v19 = vadd.f32 %v5610_v17, %v14414_v0  ;;  %v5612_v5 = vpop.f32.mrb[57].mxu1  ;;  %6415 = vmatmul.mubr.bf16.gmra.mrb[96].mxu1 %v13936_v31  ;;  %v6606_v17 = vld [vmem:[%s15354_s5 + $0xe0] sm:$0xff] }
 0x817   :  { %v14543_v61 = vadd.f32 %v5612_v5, %v14417_v43  ;;  %v5614_v7 = vpop.f32.mrb[58].mxu1  ;;  %9769 = vmatprep.mubr.msk.bf16.mxu1 %vm4055_vm3, %v6082_v45  ;;  %v14621_v45 = vpack.c.bf16 %v6601_v26, %v6600_v22  ;;  %v6607_v5 = vld [vmem:[%s15354_s5 + $0xe8] sm:$0xff]  ;;  %vm7420_vm3 = vcmask 779264  }
 0x818   :  { %v5615_v12 = vpop.f32.mrb[59].mxu1  ;;  %v14671_v7 = vpack.c.bf16 %v6589_v63, %v6588_v2 }
 0x819   :  { %v14673_v12 = vpack.c.bf16 %v6607_v5, %v6606_v17 }
 0x81e   :  { %6423 = vmatmul.mubr.bf16.gmra.mrb[100].mxu1 %v6081_v56  ;;  %v6587_v56 = vld [vmem:[%s15354_s5 + $0x48] sm:$0xff] }
 0x81f   :  { %v14647_v52 = vpack.c.bf16 %v6587_v56, %v6586_v39 }
 0x831   :  { %v5651_v15 = vpop.f32.mrb[60].mxu1 }
 0x832   :  { %v14547_v8 = vadd.f32 %v5651_v15, %v14467_v60  ;;  %v5653_v30 = vpop.f32.mrb[61].mxu1  ;;  %v6578_v60 = vld [vmem:[%s15354_s5] sm:$0xff] }
 0x833   :  { %v5654_v41 = vpop.f32.mrb[62].mxu1  ;;  %v14576_v35 = vpack.c.bf16 %v6579_v33, %v6578_v60  ;;  %v6590_v15 = vld [vmem:[%s15354_s5 + $0x60] sm:$0xff]  ;;  %v6591_v30 = vld [vmem:[%s15354_s5 + $0x68] sm:$0xff] }
 0x834   :  { %v14550_v0 = vadd.f32 %v5654_v41, %v14473_v4  ;;  %v5656_v44 = vpop.f32.mrb[63].mxu1  ;;  %v6597_v4 = vld [vmem:[%s15354_s5 + $0x98] sm:$0xff]  ;;  %v6608_v41 = vld [vmem:[%s15354_s5 + $0xf0] sm:$0xff] }
 0x835   :  { %10399 = vmatpush3.bf16.msra.mxu1 %v14576_v35  ;;  %v14588_v18 = vpack.c.bf16 %v6597_v4, %v6596_v53  ;;  %v6609_v44 = vld [vmem:[%s15354_s5 + $0xf8] sm:$0xff] }
 0x837   :  { %10401 = vmatprep.subr.bf16.mxu1 %v14588_v18 }
 0x839   :  { %v5659_v24 = vpop.f32.mrb[64].mxu1  ;;  %10403 = vmatpush3.bf16.msra.mxu1 %v14599_v50 }
 0x83a   :  { %v14553_v31 = vadd.f32 %v5659_v24, %v14480_v32  ;;  %v5661_v43 = vpop.f32.mrb[65].mxu1  ;;  %v6598_v32 = vld [vmem:[%s15354_s5 + $0xa0] sm:$0xff]  ;;  %v14689_v24 = vpack.c.bf16 %v6591_v30, %v6590_v15 }
 0x83b   :  { %v5662_v25 = vpop.f32.mrb[66].mxu1  ;;  %v14601_v16 = vpack.c.bf16 %v6599_v11, %v6598_v32  ;;  %v14692_v43 = vpack.c.bf16 %v6609_v44, %v6608_v41 }
 0x83c   :  { %v14556_v54 = vadd.f32 %v5662_v25, %v14489_v40  ;;  %v5664_v34 = vpop.f32.mrb[67].mxu1  ;;  %v6582_v40 = vld [vmem:[%s15354_s5 + $0x20] sm:$0xff]  ;;  %v6592_v25 = vld [vmem:[%s15354_s5 + $0x70] sm:$0xff] }
 0x83d   :  { %10405 = vmatprep.subr.bf16.mxu1 %v14601_v16  ;;  %v14612_v13 = vpack.c.bf16 %v6583_v6, %v6582_v40  ;;  %v6593_v34 = vld [vmem:[%s15354_s5 + $0x78] sm:$0xff] }
 0x83e   :  { %v14701_v14 = vpack.c.bf16 %v6593_v34, %v6592_v25 }
 0x83f   :  { %10407 = vmatpush3.bf16.msra.mxu1 %v14612_v13 }
 0x840   :  { %10409 = vmatprep.subr.bf16.mxu1 %v14621_v45 }
 0x841   :  { %v5667_v58 = vpop.f32.mrb[68].mxu1 }
 0x842   :  { %v14567_v1 = vadd.f32 %v5667_v58, %v14497_v46  ;;  %v5669_v23 = vpop.f32.mrb[69].mxu1  ;;  %v6584_v46 = vld [vmem:[%s15354_s5 + $0x30] sm:$0xff] }
 0x843   :  { %v5670_v27 = vpop.f32.mrb[70].mxu1  ;;  %v14629_v36 = vpack.c.bf16 %v6585_v47, %v6584_v46 }
 0x844   :  { %v5671_v62 = vpop.f32.mrb[71].mxu1 }
 0x845   :  { %10411 = vmatpush3.bf16.msra.mxu1 %v14629_v36 }
 0x846   :  { %10413 = vmatprep.subr.bf16.mxu1 %v14639_v55 }
 0x849   :  { %10415 = vmatpush3.bf16.msra.mxu1 %v14647_v52 }
 0x84a   :  { %10417 = vmatprep.subr.bf16.mxu1 %v14660_v3 }
 0x84d   :  { %10419 = vmatpush3.bf16.msra.mxu1 %v14671_v7 }
 0x84e   :  { %10421 = vmatprep.subr.bf16.mxu1 %v14673_v12 }
 0x851   :  { %10423 = vmatpush3.bf16.msra.mxu1 %v14689_v24 }
 0x852   :  { %10425 = vmatprep.subr.bf16.mxu1 %v14692_v43 }
 0x855   :  { %10427 = vmatpush3.bf16.msra.mxu1 %v14701_v14 }
 0x856   :  { %10428 = vmatprep.subr.bf16.mxu1 %v11697_v59 }
 0x86d   :  { %v5997_v58 = vpop.f32.mrb[72].mxu1 }
 0x86e   :  { %v6072_v23 = vadd.f32 %v5997_v58, %v14539_v19  ;;  %v5999_v27 = vpop.f32.mrb[73].mxu1 }
 0x86f   :  { %v6073_v62 = vadd.f32 %v5999_v27, %v14543_v61  ;;  %v6001_v60 = vpop.f32.mrb[74].mxu1 }
 0x870   :  { %v6002_v33 = vpop.f32.mrb[75].mxu1 }
 0x889   :  { %v6038_v53 = vpop.f32.mrb[76].mxu1 }
 0x88a   :  { %v14721_v4 = vadd.f32 %v6038_v53, %v14547_v8  ;;  %v6040_v38 = vpop.f32.mrb[77].mxu1 }
 0x88b   :  { %v6041_v9 = vpop.f32.mrb[78].mxu1 }
 0x88c   :  { %v14724_v32 = vadd.f32 %v6041_v9, %v14550_v0  ;;  %v6043_v11 = vpop.f32.mrb[79].mxu1 }
 0x891   :  { %v6046_v40 = vpop.f32.mrb[80].mxu1 }
 0x892   :  { %v14727_v6 = vadd.f32 %v6046_v40, %v14553_v31  ;;  %v6048_v19 = vpop.f32.mrb[81].mxu1  ;;  %v14738_v31 = vld [vmem:[%s15355_s6] ss:$8 sm:$0x7] }
 0x893   :  { %v6049_v22 = vpop.f32.mrb[82].mxu1  ;;  %v6454_v37 = vrot.slane %v14738_v31, %v13692_v10 }
 0x894   :  { %v14730_v61 = vadd.f32 %v6049_v22, %v14556_v54  ;;  %v6051_v26 = vpop.f32.mrb[83].mxu1  ;;  %v6450_v54 = vrot.slane %v14738_v31, %v13699_v28 }
 0x899   :  { %v6054_v46 = vpop.f32.mrb[84].mxu1 }
 0x89a   :  { %v14733_v8 = vadd.f32 %v6054_v46, %v14567_v1  ;;  %v6056_v47 = vpop.f32.mrb[85].mxu1 }
 0x89b   :  { %v6057_v48 = vpop.f32.mrb[86].mxu1 }
 0x89c   :  { %v6058_v51 = vpop.f32.mrb[87].mxu1 }
 0x8b5   :  { %v6347_v0 = vpop.f32.mrb[16].mxu1 }
 0x8b6   :  { %v6349_v39 = vpop.f32.mrb[17].mxu1  ;;  %v6462_v17 = vadd.f32 %v6450_v54, %v6347_v0 }
 0x8b7   :  { %v6351_v56 = vpop.f32.mrb[18].mxu1  ;;  %v6463_v30 = vadd.f32 %v6454_v37, %v6349_v39 }
 0x8b8   :  { %v6353_v57 = vpop.f32.mrb[19].mxu1  ;;  %v6465_v1 = vadd.f32 %v6450_v54, %v6351_v56  ;;  %v14748_v27 = vmax.f32 %v6462_v17, 0.0 }
 0x8b9   :  { %v6466_v2 = vadd.f32 %v6454_v37, %v6353_v57  ;;  %v14752_v53 = vmax.f32 %v6463_v30, 0.0 }
 0x8ba   :  { %v14744_v25 = vmax.f32 %v6465_v1, 0.0 }
 0x8bb   :  { %v14746_v58 = vmax.f32 %v6466_v2, 0.0 }
 0x8bc   :  { %v6492_v11 = vadd.f32 %v14744_v25, %v14748_v27 }
 0x8bd   :  { %v6357_v63 = vpop.f32.mrb[20].mxu1  ;;  %v6502_v40 = vadd.f32 %v14746_v58, %v14752_v53 }
 0x8be   :  { %v6468_v5 = vadd.f32 %v6450_v54, %v6357_v63  ;;  %v6359_v15 = vpop.f32.mrb[21].mxu1 }
 0x8bf   :  { %v6469_v41 = vadd.f32 %v6454_v37, %v6359_v15  ;;  %v6361_v44 = vpop.f32.mrb[22].mxu1 }
 0x8c0   :  { %v6363_v34 = vpop.f32.mrb[23].mxu1  ;;  %v14750_v60 = vmax.f32 %v6468_v5, 0.0  ;;  %v6471_v33 = vadd.f32 %v6450_v54, %v6361_v44 }
 0x8c1   :  { %v14754_v38 = vmax.f32 %v6469_v41, 0.0  ;;  %v6472_v9 = vadd.f32 %v6454_v37, %v6363_v34 }
 0x8c2   :  { %v6493_v22 = vadd.f32 %v6492_v11, %v14750_v60  ;;  %v14761_v26 = vmax.f32 %v6471_v33, 0.0  ;;  %v6610_v11 = vld [vmem:[%s15354_s5 + $0x100] sm:$0xff] }
 0x8c3   :  { %v6503_v48 = vadd.f32 %v6502_v40, %v14754_v38  ;;  %v14764_v51 = vmax.f32 %v6472_v9, 0.0  ;;  %v6611_v40 = vld [vmem:[%s15354_s5 + $0x108] sm:$0xff] }
 0x8c4   :  { %v6494_v2 = vadd.f32 %v6493_v22, %v14761_v26 }
 0x8c5   :  { %v6367_v19 = vpop.f32.mrb[88].mxu1  ;;  %v6504_v17 = vadd.f32 %v6503_v48, %v14764_v51  ;;  %v6612_v48 = vld [vmem:[%s15354_s5 + $0x110] sm:$0xff] }
 0x8c6   :  { %v6442_v46 = vadd.f32 %v6367_v19, %v6072_v23  ;;  %v6369_v47 = vpop.f32.mrb[89].mxu1 }
 0x8c7   :  { %v6443_v0 = vadd.f32 %v6369_v47, %v6073_v62  ;;  %v6371_v39 = vpop.f32.mrb[90].mxu1 }
 0x8c8   :  { %v6474_v56 = vadd.f32 %v6450_v54, %v6442_v46  ;;  %v6372_v57 = vpop.f32.mrb[91].mxu1  ;;  %v14780_v46 = vpack.c.bf16 %v6611_v40, %v6610_v11 }
 0x8c9   :  { %v6475_v1 = vadd.f32 %v6454_v37, %v6443_v0  ;;  %v6613_v0 = vld [vmem:[%s15354_s5 + $0x118] sm:$0xff]  ;;  %v6615_v57 = vld [vmem:[%s15354_s5 + $0x128] sm:$0xff] }
 0x8ca   :  { %v14767_v63 = vmax.f32 %v6474_v56, 0.0  ;;  %v14789_v39 = vpack.c.bf16 %v6613_v0, %v6612_v48  ;;  %v6614_v56 = vld [vmem:[%s15354_s5 + $0x120] sm:$0xff] }
 0x8cb   :  { %v14770_v5 = vmax.f32 %v6475_v1, 0.0  ;;  %v6457_v1 = vsub.s32 2, %v13689_v42 }
 0x8cc   :  { %v6495_v23 = vadd.f32 %v6494_v2, %v14767_v63 }
 0x8cd   :  { %v6505_v15 = vadd.f32 %v6504_v17, %v14770_v5  ;;  %v14802_v17 = vpack.c.bf16 %v6615_v57, %v6614_v56  ;;  %v6541_v56 = vmul.f32 %v14770_v5, %v14770_v5 }
 0x8ce   :  { %v6496_v30 = vrot.slane %v6495_v23, 4 }
 0x8cf   :  { %v6506_v41 = vrot.slane %v6505_v15, 4 }
 0x8d0   :  { %v6497_v44 = vadd.f32 %v6496_v30, %v6495_v23  ;;  %v6532_v23 = vmul.f32 %v14746_v58, %v14746_v58 }
 0x8d1   :  { %v6507_v62 = vadd.f32 %v6506_v41, %v6505_v15  ;;  %v6616_v41 = vld [vmem:[%s15354_s5 + $0x130] sm:$0xff] }
 0x8d2   :  { %v6498_v34 = vrot.slane %v6497_v44, 2 }
 0x8d3   :  { %v6508_v54 = vrot.slane %v6507_v62, 2 }
 0x8d4   :  { %v6499_v33 = vadd.f32 %v6498_v34, %v6497_v44  ;;  %v6617_v44 = vld [vmem:[%s15354_s5 + $0x138] sm:$0xff]  ;;  %v6529_v34 = vmul.f32 %v14752_v53, %v14752_v53 }
 0x8d5   :  { %v6509_v37 = vadd.f32 %v6508_v54, %v6507_v62  ;;  %v6535_v54 = vmul.f32 %v14754_v38, %v14754_v38 }
 0x8d6   :  { %v6500_v9 = vrot.slane %v6499_v33, 1  ;;  %v6553_v11 = vadd.f32 %v6532_v23, %v6529_v34 }
 0x8d7   :  { %v6510_v19 = vrot.slane %v6509_v37, 1 }
 0x8d8   :  { %v6501_v47 = vadd.f32 %v6500_v9, %v6499_v33  ;;  %v14823_v9 = vpack.c.bf16 %v6617_v44, %v6616_v41 }
 0x8d9   :  { %v6511_v22 = vadd.f32 %v6510_v19, %v6509_v37  ;;  %v6618_v19 = vld [vmem:[%s15354_s5 + $0x140] sm:$0xff] }
 0x8db   :  { %6689 = vmatprep.mubr.f32.mxu1 %v6511_v22  ;;  %v6619_v22 = vld [vmem:[%s15354_s5 + $0x148] sm:$0xff] }
 0x8dc   :  { %6690 = vmatmul.mubr.f32.vlgmr.msra.gmra.mrb[14].mxu1 %v6501_v47  ;;  %v14835_v0 = vpack.c.bf16 %v6619_v22, %v6618_v19 }
 0x8dd   :  { %10430 = vmatpush3.bf16.msra.mxu1 %v14780_v46  ;;  %10202 = vmatprep.mubr.msk.f32.mxu1 %vm11702_vm13, %v14706_v20 }
 0x8de   :  { %10431 = vmatprep.subr.bf16.mxu1 %v11697_v59 }
 0x8e1   :  { %v6408_v2 = vpop.f32.mrb[92].mxu1  ;;  %10433 = vmatpush3.bf16.msra.mxu1 %v14789_v39 }
 0x8e2   :  { %v6432_v15 = vadd.f32 %v6408_v2, %v14721_v4  ;;  %v6410_v30 = vpop.f32.mrb[93].mxu1  ;;  %10434 = vmatprep.subr.bf16.mxu1 %v11697_v59  ;;  %v6458_v4 = vrot.slane %v14738_v31, %v6457_v1  ;;  %v6554_v31 = vadd.f32 %v6553_v11, %v6535_v54 }
 0x8e3   :  { %v6411_v62 = vpop.f32.mrb[94].mxu1  ;;  %v6620_v30 = vld [vmem:[%s15354_s5 + $0x150] sm:$0xff] }
 0x8e4   :  { %v6435_v33 = vadd.f32 %v6411_v62, %v14724_v32  ;;  %v6413_v37 = vpop.f32.mrb[95].mxu1  ;;  %v6538_v32 = vmul.f32 %v14764_v51, %v14764_v51  ;;  %v6464_v47 = vadd.f32 %v6458_v4, %v6432_v15  ;;  %v6621_v15 = vld [vmem:[%s15354_s5 + $0x158] sm:$0xff] }
 0x8e5   :  { %10436 = vmatpush3.bf16.msra.mxu1 %v14802_v17 }
 0x8e6   :  { %v6467_v40 = vadd.f32 %v6458_v4, %v6435_v33  ;;  %10437 = vmatprep.subr.bf16.mxu1 %v11697_v59  ;;  %v6555_v44 = vadd.f32 %v6554_v31, %v6538_v32  ;;  %v14849_v62 = vmax.f32 %v6464_v47, 0.0 }
 0x8e8   :  { %v14839_v57 = vmax.f32 %v6467_v40, 0.0  ;;  %v6556_v37 = vadd.f32 %v6555_v44, %v6541_v56  ;;  %v6513_v22 = vsel %vm6512_vm12, %v14849_v62, 0.0 }
 0x8e9   :  { %v6416_v48 = vpop.f32.mrb[96].mxu1  ;;  %10439 = vmatpush3.bf16.msra.mxu1 %v14823_v9 }
 0x8ea   :  { %v6438_v2 = vadd.f32 %v6416_v48, %v14727_v6  ;;  %v6418_v23 = vpop.f32.mrb[97].mxu1  ;;  %10440 = vmatprep.subr.bf16.mxu1 %v11697_v59  ;;  %v14853_v6 = vpack.c.bf16 %v6621_v15, %v6620_v30  ;;  %v6514_v11 = vsel %vm6512_vm12, %v14839_v57, 0.0 }
 0x8eb   :  { %v6419_v41 = vpop.f32.mrb[98].mxu1  ;;  %v6515_v32 = vadd.f32 %v6514_v11, %v6513_v22 }
 0x8ec   :  { %v6470_v34 = vadd.f32 %v6458_v4, %v6438_v2  ;;  %v6441_v54 = vadd.f32 %v6419_v41, %v14730_v61  ;;  %v6421_v33 = vpop.f32.mrb[99].mxu1  ;;  %v6557_v2 = vrot.slane %v6556_v37, 4 }
 0x8ed   :  { %10442 = vmatpush3.bf16.msra.mxu1 %v14835_v0 }
 0x8ee   :  { %v14857_v40 = vmax.f32 %v6470_v34, 0.0  ;;  %v6473_v19 = vadd.f32 %v6458_v4, %v6441_v54  ;;  %10443 = vmatprep.subr.bf16.mxu1 %v11697_v59  ;;  %v6558_v54 = vadd.f32 %v6557_v2, %v6556_v37  ;;  %v6534_v37 = vmul.f32 %v14750_v60, %v14750_v60 }
 0x8f0   :  { %v6516_v61 = vsel %vm6512_vm12, %v14857_v40, 0.0  ;;  %v14864_v31 = vmax.f32 %v6473_v19, 0.0 }
 0x8f1   :  { %v6424_v47 = vpop.f32.mrb[100].mxu1  ;;  %10445 = vmatpush3.bf16.msra.mxu1 %v14853_v6  ;;  %v6517_v23 = vadd.f32 %v6516_v61, %v6515_v32  ;;  %v6531_v61 = vmul.f32 %v14744_v25, %v14744_v25 }
 0x8f2   :  { %v6444_v48 = vadd.f32 %v6424_v47, %v14733_v8  ;;  %v6426_v56 = vpop.f32.mrb[101].mxu1  ;;  %10447 = vmatprep.subr.bf16.mxu1 %v14564_v49  ;;  %v6518_v15 = vsel %vm6512_vm12, %v14864_v31, 0.0  ;;  %v6559_v8 = vrot.slane %v6558_v54, 2 }
 0x8f3   :  { %v6427_v30 = vpop.f32.mrb[102].mxu1  ;;  %v6519_v33 = vadd.f32 %v6518_v15, %v6517_v23 }
 0x8f4   :  { %v6476_v41 = vadd.f32 %v6458_v4, %v6444_v48  ;;  %v6428_v44 = vpop.f32.mrb[103].mxu1  ;;  %v6560_v49 = vadd.f32 %v6559_v8, %v6558_v54  ;;  %v6528_v4 = vmul.f32 %v14748_v27, %v14748_v27  ;;  %v6540_v54 = vmul.f32 %v14767_v63, %v14767_v63 }
 0x8f5   :  { %v6537_v44 = vmul.f32 %v14761_v26, %v14761_v26  ;;  %v6533_v8 = vmul.f32 %v14839_v57, %v14839_v57 }
 0x8f6   :  { %v14871_v34 = vmax.f32 %v6476_v41, 0.0  ;;  %v6561_v30 = vrot.slane %v6560_v49, 1  ;;  %v6543_v2 = vadd.f32 %v6531_v61, %v6528_v4 }
 0x8f8   :  { %v6520_v11 = vsel %vm6512_vm12, %v14871_v34, 0.0  ;;  %v6562_v15 = vadd.f32 %v6561_v30, %v6560_v49  ;;  %v6544_v41 = vadd.f32 %v6543_v2, %v6534_v37 }
 0x8f9   :  { %v6521_v19 = vadd.f32 %v6520_v11, %v6519_v33 }
 0x8fa   :  { %v6545_v33 = vadd.f32 %v6544_v41, %v6537_v44 }
 0x8fb   :  { %v6522_v22 = vrot.slane %v6521_v19, 4 }
 0x8fc   :  { %v6546_v11 = vadd.f32 %v6545_v33, %v6540_v54 }
 0x8fd   :  { %v6523_v47 = vadd.f32 %v6522_v22, %v6521_v19 }
 0x8fe   :  { %v6547_v19 = vrot.slane %v6546_v11, 4 }
 0x8ff   :  { %v6524_v56 = vrot.slane %v6523_v47, 2 }
 0x901   :  { %v6525_v32 = vadd.f32 %v6524_v56, %v6523_v47 }
 0x903   :  { %v6526_v48 = vrot.slane %v6525_v32, 1 }
 0x905   :  { %v6527_v23 = vadd.f32 %v6526_v48, %v6525_v32 }
 0x907   :  { %10203 = vmatmul.mubr.msk.f32.vlgmr.msra.gmra.mrb[104].mxu1 %vm6512_vm12, %v6527_v23 }
 0x908   :  { %10449 = vmatpush3.bf16.msra.mxu1 %v14576_v35  ;;  %6833 = vmatprep.mubr.f32.mxu1 %v6562_v15  ;;  %v6548_v35 = vadd.f32 %v6547_v19, %v6546_v11 }
 0x909   :  { %10451 = vmatprep.subr.bf16.mxu1 %v14588_v18  ;;  %v6530_v18 = vmul.f32 %v14849_v62, %v14849_v62 }
 0x90c   :  { %10453 = vmatpush3.bf16.msra.mxu1 %v14599_v50  ;;  %v6536_v50 = vmul.f32 %v14857_v40, %v14857_v40 }
 0x90d   :  { %10455 = vmatprep.subr.bf16.mxu1 %v14601_v16  ;;  %v6549_v16 = vrot.slane %v6548_v35, 2 }
 0x90f   :  { %v6550_v47 = vadd.f32 %v6549_v16, %v6548_v35 }
 0x910   :  { %10457 = vmatpush3.bf16.msra.mxu1 %v14612_v13  ;;  %v6564_v13 = vsel %vm6512_vm12, %v6533_v8, 0.0 }
 0x911   :  { %10459 = vmatprep.subr.bf16.mxu1 %v14621_v45  ;;  %v6563_v45 = vsel %vm6512_vm12, %v6530_v18, 0.0  ;;  %v6551_v56 = vrot.slane %v6550_v47, 1 }
 0x912   :  { %v6565_v22 = vadd.f32 %v6564_v13, %v6563_v45 }
 0x913   :  { %v6552_v30 = vadd.f32 %v6551_v56, %v6550_v47  ;;  %v6917_v56 = vld [vmem:[%s15355_s6 + $0x10] sm:$0xfc] }
 0x914   :  { %10461 = vmatpush3.bf16.msra.mxu1 %v14629_v36  ;;  %v6566_v36 = vsel %vm6512_vm12, %v6536_v50, 0.0 }
 0x915   :  { %10463 = vmatprep.subr.bf16.mxu1 %v14639_v55  ;;  %v6539_v55 = vmul.f32 %v14864_v31, %v14864_v31 }
 0x917   :  { %v6568_v49 = vsel %vm6512_vm12, %v6539_v55, 0.0 }
 0x918   :  { %10465 = vmatpush3.bf16.msra.mxu1 %v14647_v52  ;;  %v6542_v52 = vmul.f32 %v14871_v34, %v14871_v34 }
 0x919   :  { %10467 = vmatprep.subr.bf16.mxu1 %v14660_v3  ;;  %v6567_v3 = vadd.f32 %v6566_v36, %v6565_v22 }
 0x91a   :  { %v6570_v61 = vsel %vm6512_vm12, %v6542_v52, 0.0 }
 0x91b   :  { %v6569_v32 = vadd.f32 %v6568_v49, %v6567_v3 }
 0x91c   :  { %10469 = vmatpush3.bf16.msra.mxu1 %v14671_v7 }
 0x91d   :  { %10471 = vmatprep.subr.bf16.mxu1 %v14673_v12  ;;  %v6571_v7 = vadd.f32 %v6570_v61, %v6569_v32  ;;  %v6920_v61 = vld [vmem:[%s15355_s6 + $0x28] sm:$0x1f]  ;;  %v6933_v32 = vrot.slane %v6917_v56, 2 }
 0x91f   :  { %v6572_v12 = vrot.slane %v6571_v7, 4 }
 0x920   :  { %10473 = vmatpush3.bf16.msra.mxu1 %v14689_v24 }
 0x921   :  { %10475 = vmatprep.subr.bf16.mxu1 %v14692_v43  ;;  %v6573_v24 = vadd.f32 %v6572_v12, %v6571_v7  ;;  %v6934_v7 = vrot.slane %v6920_v61, 2 }
 0x923   :  { %v6574_v43 = vrot.slane %v6573_v24, 2 }
 0x924   :  { %10477 = vmatpush3.bf16.msra.mxu1 %v14701_v14 }
 0x925   :  { %10478 = vmatprep.subr.bf16.mxu1 %v11697_v59  ;;  %v6575_v14 = vadd.f32 %v6574_v43, %v6573_v24 }
 0x927   :  { %6834 = vmatmul.mubr.f32.vlgmr.msra.gmra.mrb[106].mxu1 %v6552_v30  ;;  %v6935_v30 = vsel %vm1752_vm1, %v6933_v32, %v6934_v7 }
 0x928   :  { %10480 = vmatpush3.bf16.msra.mxu1 %v14780_v46  ;;  %10229 = vmatprep.mubr.msk.f32.mxu1 %vm11702_vm13, %v14706_v20  ;;  %v6576_v46 = vrot.slane %v6575_v14, 1  ;;  %v10503_v12 = vpack.c.bf16 %v6934_v7, %v6935_v30 }
 0x929   :  { %10481 = vmatprep.subr.bf16.mxu1 %v11697_v59 }
 0x92c   :  { %10483 = vmatpush3.bf16.msra.mxu1 %v14789_v39  ;;  %v6577_v39 = vadd.f32 %v6576_v46, %v6575_v14  ;;  %v11610_v14 = vld [vmem:[%s15356_s7 + $0xf0] sm:$0xff]  }
 0x92d   :  { %10484 = vmatprep.subr.bf16.mxu1 %v11697_v59  ;;  %v11611_v46 = vld [vmem:[%s15356_s7 + $0xb0] sm:$0xff]  }
 0x930   :  { %10486 = vmatpush3.bf16.msra.mxu1 %v14802_v17  ;;  %v6916_v17 = vld [vmem:[%s15355_s6 + $0x8] sm:$0xfc] }
 0x931   :  { %10487 = vmatprep.subr.bf16.mxu1 %v11697_v59  ;;  %v6930_v4 = vrot.slane %v6916_v17, 2  ;;  %v11615_v17 = vld [vmem:[%s15356_s7 + $0xc0] sm:$0xff]  }
 0x934   :  { %10489 = vmatpush3.bf16.msra.mxu1 %v14823_v9  ;;  %v6919_v9 = vld [vmem:[%s15355_s6 + $0x20] sm:$0x1f] }
 0x935   :  { %10490 = vmatprep.subr.bf16.mxu1 %v11697_v59  ;;  %v6931_v37 = vrot.slane %v6919_v9, 2  ;;  %v11616_v9 = vld [vmem:[%s15356_s7 + $0x108] sm:$0xff]  }
 0x937   :  { %v6932_v23 = vsel %vm1752_vm1, %v6930_v4, %v6931_v37  ;;  %v11618_v4 = vld [vmem:[%s15356_s7 + $0x110] sm:$0xff]  }
 0x938   :  { %10492 = vmatpush3.bf16.msra.mxu1 %v14835_v0  ;;  %v6915_v0 = vld [vmem:[%s15355_s6] sm:$0xfc]  ;;  %v10496_v15 = vpack.c.bf16 %v6931_v37, %v6932_v23  ;;  %v11619_v37 = vld [vmem:[%s15356_s7 + $0xd0] sm:$0xff]  }
 0x939   :  { %10493 = vmatprep.subr.bf16.mxu1 %v11697_v59  ;;  %v6927_v48 = vrot.slane %v6915_v0, 2  ;;  %v11617_v0 = vld [vmem:[%s15356_s7 + $0xc8] sm:$0xff]   ;;  %v11623_v23 = vld [vmem:[%s15356_s7 + $0xe0] sm:$0xff]  }
 0x93c   :  { %10495 = vmatpush3.bf16.msra.mxu1 %v14853_v6  ;;  %v6918_v6 = vld [vmem:[%s15355_s6 + $0x18] sm:$0x1f] }
 0x93d   :  { %v6928_v2 = vrot.slane %v6918_v6, 2  ;;  %10498 = vmatprep.subr.msk.bf16.mxu1 %vm13780_vm8, %v10496_v15  ;;  %v11620_v6 = vld [vmem:[%s15356_s7 + $0x118] sm:$0xff]  }
 0x93f   :  { %10230 = vmatmul.mubr.msk.f32.vlgmr.msra.gmra.mrb[108].mxu1 %vm6512_vm12, %v6577_v39  ;;  %v6929_v41 = vsel %vm1752_vm1, %v6927_v48, %v6928_v2  ;;  %v11614_v39 = vld [vmem:[%s15356_s7 + $0x100] sm:$0xff]   ;;  %v11621_v48 = vld [vmem:[%s15356_s7 + $0xd8] sm:$0xff]  }
 0x940   :  { %7012 = vmatprep.mubr.f32.mxu1 %v14706_v20  ;;  %v10499_v44 = vpack.c.bf16 %v6928_v2, %v6929_v41  ;;  %v11622_v2 = vld [vmem:[%s15356_s7 + $0x120] sm:$0xff]   ;;  %v11625_v41 = vld [vmem:[%s15356_s7 + $0xe8] sm:$0xff]  }
 0x942   :  { %10501 = vmatpush1.bf16.msk.msra.mxu1 %vm13780_vm8, %v10499_v44 }
 0x943   :  { %10502 = vmatprep.subr.bf16.mxu1 %v11697_v59 }
 0x9af   :  { %v9979_v54 = vpop.f32.mrb[14].mxu1 }
 0x9b0   :  { %v9980_v33 = vpop.f32.mrb[15].mxu1 }
 0x9b1   :  { %v9981_v11 = vadd.f32 %v9980_v33, %v9979_v54 }
 0x9da   :  { %v6761_v19 = vpop.f32.mrb[104].mxu1 }
 0x9db   :  { %v6762_v35 = vadd.f32 %v9981_v11, %v6761_v19  ;;  %v10204_v8 = vpop.f32.mrb[105].mxu1 }
 0x9dd   :  { %v6765_v13 = vmul.f32 0.00078125, %v6762_v35 }
 0x9df   :  { %v6910_v22 = vmul.f32 %v6765_v13, %v6765_v13 }
 0x9fa   :  { %v10027_v18 = vpop.f32.mrb[106].mxu1 }
 0x9fb   :  { %v10028_v50 = vpop.f32.mrb[107].mxu1 }
 0x9fc   :  { %v10029_v16 = vadd.f32 %v10028_v50, %v10027_v18 }
 0xa12   :  { %v6905_v45 = vpop.f32.mrb[108].mxu1 }
 0xa13   :  { %v6906_v36 = vadd.f32 %v10029_v16, %v6905_v45  ;;  %v10231_v55 = vpop.f32.mrb[109].mxu1 }
 0xa15   :  { %v6909_v47 = vmul.f32 0.00078125, %v6906_v36 }
 0xa17   :  { %v6911_v52 = vsub.f32 %v6909_v47, %v6910_v22  ;;  %v9777_v22 = vld [vmem:[%s15355_s6 + $0x1] ss:$8 sm:$0x7] }
 0xa19   :  { %v6912_v3 = vmax.f32 %v6911_v52, 0.0 }
 0xa1b   :  { %v6913_v49 = vadd.f32 1e-05, %v6912_v3 }
 0xa1d   :  { %11678 = vrsqrt.f32 %v6913_v49 }
 0xa27   :  { %v11679_v24 = vpop.eup %11678 }
 0xa28   :  { %9774 = vmatmul.mubr.msk.f32.vlgmr.msra.gmra.mrb[110].mxu1 %vm4286_vm9, %v11679_v24  ;;  %v7091_v43 = vmul.f32 %v11679_v24, %v6765_v13 }
 0xa29   :  { %10505 = vmatpush3.bf16.msk.msra.mxu1 %vm13780_vm8, %v10503_v12  ;;  %10236 = vmatprep.mubr.msk.f32.mxu1 %vm11702_vm13, %v14706_v20 }
 0xa2a   :  { %10508 = vmatprep.subr.msk.bf16.mxu1 %vm13780_vm8, %v10496_v15  ;;  %v11624_v15 = vld [vmem:[%s15356_s7 + $0x128] sm:$0xff]  }
 0xa2c   :  { %10237 = vmatmul.mubr.msk.f32.vlgmr.msra.gmra.mrb[112].mxu1 %vm4286_vm9, %v11679_v24 }
 0xa2d   :  { %10511 = vmatpush1.bf16.msk.msra.mxu1 %vm13780_vm8, %v10499_v44  ;;  %7159 = vmatprep.mubr.f32.mxu1 %v14706_v20 }
 0xa2e   :  { %10512 = vmatprep.subr.bf16.mxu1 %v11697_v59  ;;  %v11612_v59 = vld [vmem:[%s15356_s7 + $0xf8] sm:$0xff]  }
 0xa30   :  { %9780 = vmatmul.mubr.msk.f32.vlgmr.msra.gmra.mrb[114].mxu1 %vm4286_vm9, %v7091_v43 }
 0xa31   :  { %10515 = vmatpush3.bf16.msk.msra.mxu1 %vm13780_vm8, %v10503_v12  ;;  %10243 = vmatprep.mubr.msk.f32.mxu1 %vm11702_vm13, %v14706_v20 }
 0xa32   :  { %10049 = vmatprep.subr.bf16.mxu1 %v11610_v14 }
 0xa34   :  { %10244 = vmatmul.mubr.msk.f32.vlgmr.msra.gmra.mrb[116].mxu1 %vm4286_vm9, %v7091_v43 }
 0xa35   :  { %10050 = vmatpush3.bf16.msra.mxu1 %v11611_v46 }
 0xa36   :  { %10051 = vmatprep.subr.bf16.mxu1 %v11612_v59 }
 0xa39   :  { %10052 = vmatpush3.bf16.msra.mxu1 %v11613_v21 }
 0xa3a   :  { %10053 = vmatprep.subr.bf16.mxu1 %v11614_v39 }
 0xa3d   :  { %10054 = vmatpush3.bf16.msra.mxu1 %v11615_v17 }
 0xa3e   :  { %10055 = vmatprep.subr.bf16.mxu1 %v11616_v9 }
 0xa41   :  { %10056 = vmatpush3.bf16.msra.mxu1 %v11617_v0 }
 0xa42   :  { %10057 = vmatprep.subr.bf16.mxu1 %v11618_v4 }
 0xa45   :  { %10058 = vmatpush3.bf16.msra.mxu1 %v11619_v37 }
 0xa46   :  { %10059 = vmatprep.subr.bf16.mxu1 %v11620_v6 }
 0xa49   :  { %10060 = vmatpush3.bf16.msra.mxu1 %v11621_v48 }
 0xa4a   :  { %10061 = vmatprep.subr.bf16.mxu1 %v11622_v2 }
 0xa4d   :  { %10062 = vmatpush3.bf16.msra.mxu1 %v11623_v23 }
 0xa4e   :  { %10063 = vmatprep.subr.bf16.mxu1 %v11624_v15 }
 0xa51   :  { %10064 = vmatpush3.bf16.msra.mxu1 %v11625_v41 }
 0xa52   :  { %10246 = vmatprep.subr.bf16.mxu1 %v14706_v20 }
 0xafb   :  { %v7014_v44 = vpop.f32.mrb[110].mxu1 }
 0xafc   :  { %v7016_v54 = vpop.f32.mrb[111].mxu1  ;;  %v7267_v45 = vrot.slane %v7014_v44, %v13699_v28 }
 0xafd   :  { %v7271_v36 = vrot.slane %v7016_v54, %v13699_v28 }
 0xafe   :  { %v7276_v3 = vmul.f32 %v7267_v45, %v14748_v27  ;;  %v7279_v49 = vmul.f32 %v7267_v45, %v14744_v25  ;;  %v7282_v56 = vmul.f32 %v7267_v45, %v14750_v60  ;;  %v7285_v61 = vmul.f32 %v7267_v45, %v14761_v26 }
 0xaff   :  { %v7085_v33 = vpop.f32.mrb[112].mxu1  ;;  %v7288_v32 = vmul.f32 %v7267_v45, %v14767_v63  ;;  %v7277_v7 = vmul.f32 %v7271_v36, %v14752_v53  ;;  %v7280_v12 = vmul.f32 %v7271_v36, %v14746_v58  ;;  %v7283_v24 = vmul.f32 %v7271_v36, %v14754_v38 }
 0xb00   :  { %v10238_v11 = vpop.f32.mrb[113].mxu1  ;;  %v7275_v47 = vrot.slane %v7085_v33, %v13699_v28  ;;  %v7289_v27 = vmul.f32 %v7271_v36, %v14770_v5 }
 0xb02   :  { %v7278_v25 = vmul.f32 %v7275_v47, %v14849_v62  ;;  %v7281_v53 = vmul.f32 %v7275_v47, %v14839_v57  ;;  %v7284_v63 = vmul.f32 %v7275_v47, %v14857_v40  ;;  %v7287_v58 = vmul.f32 %v7275_v47, %v14864_v31 }
 0xb03   :  { %v7161_v19 = vpop.f32.mrb[114].mxu1  ;;  %v7290_v38 = vmul.f32 %v7275_v47, %v14871_v34 }
 0xb04   :  { %v7163_v35 = vpop.f32.mrb[115].mxu1 }
 0xb05   :  { %v7239_v8 = vcombine.low %v7161_v19, %v7163_v35 }
 0xb07   :  { %v7246_v18 = vrot.slane %v7239_v8, %v13869_v29  ;;  %v7232_v50 = vpop.f32.mrb[116].mxu1 }
 0xb08   :  { %v7253_v16 = vrot.slane %v7232_v50, %v13869_v29  ;;  %v10245_v13 = vpop.f32.mrb[117].mxu1 }
 0xb0a   :  { %v7254_v55 = vcombine.low %v7246_v18, %v7253_v16 }
 0xb0c   :  { %v7261_v52 = vrot.slane %v7254_v55, %v13869_v29  ;;  %v7286_v29 = vmul.f32 %v7271_v36, %v14764_v51 }
 0xb0e   :  { %v7263_v30 = vsub.f32 %v9777_v22, %v7261_v52 }
 0xb10   :  { %v7295_v60 = vrot.slane %v7263_v30, %v13699_v28  ;;  %v7299_v43 = vrot.slane %v7263_v30, %v13692_v10  ;;  %v7303_v26 = vrot.slane %v7263_v30, %v6457_v1 }
 0xb12   :  { %v7307_v51 = vadd.f32 %v7295_v60, %v7276_v3  ;;  %v7308_v14 = vadd.f32 %v7299_v43, %v7277_v7  ;;  %v7309_v5 = vadd.f32 %v7303_v26, %v7278_v25  ;;  %v7310_v46 = vadd.f32 %v7295_v60, %v7279_v49 }
 0xb13   :  { %v7311_v62 = vadd.f32 %v7299_v43, %v7280_v12  ;;  %v7312_v28 = vadd.f32 %v7303_v26, %v7281_v53  ;;  %v7313_v59 = vadd.f32 %v7295_v60, %v7282_v56  ;;  %v7314_v10 = vadd.f32 %v7299_v43, %v7283_v24 }
 0xb14   :  { %v7315_v21 = vadd.f32 %v7303_v26, %v7284_v63  ;;  %v7316_v42 = vadd.f32 %v7295_v60, %v7285_v61  ;;  %v7317_v1 = vadd.f32 %v7299_v43, %v7286_v29  ;;  %v7318_v39 = vadd.f32 %v7303_v26, %v7287_v58  ;;  %v11626_v29 = vld [vmem:[%s15356_s7 + $0x130] sm:$0xff]   ;;  %v11627_v63 = vld [vmem:[%s15356_s7 + $0x138] sm:$0xff]  }
 0xb15   :  { %v7319_v57 = vadd.f32 %v7295_v60, %v7288_v32  ;;  %v7320_v17 = vadd.f32 %v7299_v43, %v7289_v27  ;;  %v7321_v40 = vadd.f32 %v7303_v26, %v7290_v38  ;;  %v7357_v9 = vrot.slane %v7307_v51, 6  ;;  %v11628_v51 = vld [vmem:[%s15356_s7 + $0x140] sm:$0xff]  }
 0xb16   :  { %v7358_v31 = vrot.slane %v7308_v14, 6  ;;  %v7359_v0 = vrot.slane %v7309_v5, 6  ;;  %v7360_v34 = vrot.slane %v7310_v46, 6  ;;  %v7362_v4 = vrot.slane %v7311_v62, 6  ;;  %v11629_v5 = vld [vmem:[%s15356_s7 + $0x148] sm:$0xff]  }
 0xb17   :  { %v7364_v37 = vrot.slane %v7312_v28, 6  ;;  %v7366_v6 = vrot.slane %v7313_v59, 6  ;;  %v7368_v48 = vrot.slane %v7314_v10, 6  ;;  %v7370_v2 = vrot.slane %v7315_v21, 6  ;;  %7402 = vst [vmem:[#allocation3] sm:$0xfc] %v7357_v9 }
 0xb18   :  { %v15055_v23 = vsel %vm7356_vm15, %v7357_v9, %v7360_v34  ;;  %v15058_v15 = vsel %vm7356_vm15, %v7358_v31, %v7362_v4  ;;  %v7372_v41 = vrot.slane %v7316_v42, 6  ;;  %v7374_v44 = vrot.slane %v7317_v1, 6  ;;  %7403 = vst [vmem:[#allocation3 + $0x8] sm:$0xfc] %v7358_v31  ;;  %7405 = vst.msk [vmem:[#allocation3 + $0x10] sm:$0xfc] %vm7404_vm2, %v7359_v0 }
 0xb19   :  { %v7365_v54 = vsel %vm7356_vm15, %v7359_v0, %v7364_v37  ;;  %v7367_v33 = vsel %vm7356_vm15, %v7360_v34, %v7366_v6  ;;  %v7369_v11 = vsel %vm7356_vm15, %v7362_v4, %v7368_v48  ;;  %v7371_v19 = vsel %vm7356_vm15, %v7364_v37, %v7370_v2  ;;  %v11630_v10 = vld [vmem:[%s15356_s7 + $0x150] sm:$0xff]   ;;  %v11631_v1 = vld [vmem:[%s15356_s7 + $0x158] sm:$0xff]   ;;  %v11633_v31 = vld [vmem:[%s15356_s7] sm:$0xff]  }
 0xb1a   :  { %v7373_v35 = vsel %vm7356_vm15, %v7366_v6, %v7372_v41  ;;  %v7375_v8 = vsel %vm7356_vm15, %v7368_v48, %v7374_v44  ;;  %v7376_v18 = vrot.slane %v7318_v39, 6  ;;  %v7378_v50 = vrot.slane %v7319_v57, 6  ;;  %7408 = vst.msk [vmem:[#allocation3 + $0x28] sm:$0xff] %vm6512_vm12, %v7365_v54  ;;  %7411 = vst.msk [vmem:[#allocation3 + $0x40] sm:$0xff] %vm6512_vm12, %v7371_v19  ;;  %v11632_v39 = vld [vmem:[%s15356_s7 + $0x40] sm:$0xff]   ;;  %v11634_v0 = vld [vmem:[%s15356_s7 + $0x48] sm:$0xff]  }
 0xb1b   :  { %v7380_v16 = vrot.slane %v7320_v17, 6  ;;  %v7382_v13 = vrot.slane %v7321_v40, 6  ;;  %v15069_v45 = vpack.c.bf16 %v7375_v8, %v7369_v11  ;;  %v15071_v36 = vpack.c.bf16 %v7373_v35, %v7367_v33  ;;  %v11635_v37 = vld [vmem:[%s15356_s7 + $0x8] sm:$0xff]   ;;  %v11636_v6 = vld [vmem:[%s15356_s7 + $0x50] sm:$0xff]   ;;  %v11639_v54 = vld [vmem:[%s15356_s7 + $0x18] sm:$0xff]  }
 0xb1c   :  { %v7377_v55 = vsel %vm7356_vm15, %v7370_v2, %v7376_v18  ;;  %v15075_v22 = vsel %vm7356_vm15, %v7372_v41, %v7378_v50  ;;  %7418 = vst [vmem:[#allocation3 + $0x78] sm:$0x3] %v7378_v50  ;;  %v11637_v2 = vld [vmem:[%s15356_s7 + $0x10] sm:$0xff]   ;;  %v11638_v41 = vld [vmem:[%s15356_s7 + $0x58] sm:$0xff]   ;;  %v11640_v33 = vld [vmem:[%s15356_s7 + $0x60] sm:$0xff]  }
 0xb1d   :  { %v15078_v47 = vsel %vm7356_vm15, %v7374_v44, %v7380_v16  ;;  %v7383_v52 = vsel %vm7356_vm15, %v7376_v18, %v7382_v13  ;;  %7414 = vst.msk [vmem:[#allocation3 + $0x58] sm:$0xff] %vm6512_vm12, %v7377_v55  ;;  %7419 = vst [vmem:[#allocation3 + $0x80] sm:$0x3] %v7380_v16  ;;  %v7557_v7 = vrot.slane %v15071_v36, 1  ;;  %v7560_v12 = vrot.slane %v15069_v45, 1  ;;  %v11641_v19 = vld [vmem:[%s15356_s7 + $0x20] sm:$0xff]  }
 0xb1e   :  { %7421 = vst.msk [vmem:[#allocation3 + $0x88] sm:$0x3] %vm7420_vm3, %v7382_v13  ;;  %v7490_v3 = vld [vmem:[#allocation3] sm:$0xfc]  ;;  %v11642_v35 = vld [vmem:[%s15356_s7 + $0x68] sm:$0xff]   ;;  %v11644_v50 = vld [vmem:[%s15356_s7 + $0x70] sm:$0xff]  }
 0xb1f   :  { %7417 = vst.msk [vmem:[#allocation3 + $0x70] sm:$0xff] %vm6512_vm12, %v7383_v52  ;;  %v7491_v49 = vld [vmem:[#allocation3 + $0x8] sm:$0xfc]  ;;  %v7496_v56 = vpack.c.bf16 %v15055_v23, %v7490_v3  ;;  %v7492_v46 = vld [vmem:[#allocation3 + $0x10] sm:$0xfc]  ;;  %v11646_v13 = vld [vmem:[%s15356_s7 + $0x78] sm:$0xff]  }
 0xb20   :  { %v7497_v61 = vpack.c.bf16 %v15058_v15, %v7491_v49  ;;  %v7423_v11 = vld [vmem:[#allocation3 + $0x8] sm:$0xff]  ;;  %v11645_v16 = vld [vmem:[%s15356_s7 + $0x30] sm:$0xff]   ;;  %v11647_v55 = vld [vmem:[%s15356_s7 + $0x38] sm:$0xff]  }
 0xb21   :  { %v7556_v32 = vrot.slane %v7496_v56, 1  ;;  %v15109_v62 = vld [vmem:[#allocation3 + $0x28] sm:$0xff]  ;;  %v7430_v28 = vld [vmem:[#allocation3 + $0x40] sm:$0xff]  ;;  %v7438_v8 = vpack.c.bf16 %v15058_v15, %v7423_v11  ;;  %v8085_v11 = vld [vmem:[#allocation3 + $0x10] sm:$0xf0] }
 0xb22   :  { %v7559_v30 = vrot.slane %v7497_v61, 1  ;;  %v7498_v42 = vpack.c.bf16 %v15109_v62, %v7492_v46  ;;  %v11643_v18 = vld [vmem:[%s15356_s7 + $0x28] sm:$0xff]   ;;  %v7422_v52 = vld [vmem:[#allocation3] sm:$0xff]  ;;  %v11650_v61 = vld [vmem:[%s15356_s7 + $0x90] sm:$0xff]  }
 0xb23   :  { %v7558_v24 = vsel %vm280_vm0, %v7556_v32, %v7557_v7  ;;  %v7493_v27 = vld [vmem:[#allocation3 + $0x78] sm:$0x3]  ;;  %v11648_v3 = vld [vmem:[%s15356_s7 + $0x80] sm:$0xff]   ;;  %v7437_v49 = vpack.c.bf16 %v15055_v23, %v7422_v52  ;;  %v11649_v56 = vld [vmem:[%s15356_s7 + $0x88] sm:$0xff]   ;;  %v7444_v32 = vpack.c.bf16 %v15078_v47, %v15078_v47 }
 0xb24   :  { %v7561_v25 = vsel %vm280_vm0, %v7559_v30, %v7560_v12  ;;  %v7494_v60 = vld [vmem:[#allocation3 + $0x80] sm:$0x3]  ;;  %v7499_v26 = vpack.c.bf16 %v7493_v27, %v15075_v22  ;;  %v7433_v59 = vld [vmem:[#allocation3 + $0x58] sm:$0xff]  ;;  %v7562_v57 = vrot.slane %v7498_v42, 1  ;;  %v7424_v27 = vld [vmem:[#allocation3 + $0x10] sm:$0xff] }
 0xb25   :  { %7750 = vmatprep.mubr.bf16.mxu1 %v7561_v25  ;;  %v7500_v43 = vpack.c.bf16 %v7494_v60, %v15078_v47  ;;  %v15115_v21 = vpack.c.bf16 %v7433_v59, %v7430_v28  ;;  %v7495_v9 = vld [vmem:[#allocation3 + $0x88] sm:$0x3]  ;;  %v11652_v30 = vld [vmem:[%s15356_s7 + $0xa0] sm:$0xff]   ;;  %v7439_v60 = vpack.c.bf16 %v15109_v62, %v7424_v27  ;;  %v8150_v59 = vrot.slane %v15069_v45, 2 }
 0xb26   :  { %7751 = vmatmul.mubr.bf16.vlgmr.msra.gmra.mrb[120].mxu1 %v7558_v24  ;;  %v7565_v38 = vrot.slane %v7499_v26, 1  ;;  %v15128_v40 = vld [vmem:[#allocation3 + $0x70] sm:$0xff]  ;;  %v11653_v24 = vld [vmem:[%s15356_s7 + $0xa8] sm:$0xff]   ;;  %v11655_v25 = vld [vmem:[%s15356_s7 + $0x160] sm:$0xff]  }
 0xb27   :  { %10247 = vmatpush3.bf16.msra.mxu1 %v11626_v29  ;;  %v7567_v53 = vrot.slane %v7500_v43, 1  ;;  %v7563_v17 = vrot.slane %v15115_v21, 1  ;;  %v7501_v4 = vpack.c.bf16 %v7495_v9, %v15128_v40  ;;  %v11654_v29 = vld [vmem:[%s15356_s7 + $0x1a0] sm:$0xff]   ;;  %v11656_v43 = vld [vmem:[%s15356_s7 + $0x1a8] sm:$0xff]   ;;  %v11668_v9 = vld [vmem:[%s15356_s7 + $0x1d8] sm:$0xff]  }
 0xb28   :  { %10248 = vmatprep.subr.bf16.mxu1 %v14706_v20  ;;  %v7566_v14 = vsel %vm280_vm0, %v7557_v7, %v7565_v38  ;;  %v11651_v7 = vld [vmem:[%s15356_s7 + $0x98] sm:$0xff]   ;;  %v11657_v26 = vld [vmem:[%s15356_s7 + $0x168] sm:$0xff]   ;;  %v11663_v28 = vld [vmem:[%s15356_s7 + $0x180] sm:$0xff]  }
 0xb29   :  { %v7568_v58 = vsel %vm280_vm0, %v7560_v12, %v7567_v53  ;;  %v7564_v34 = vsel %vm280_vm0, %v7562_v57, %v7563_v17  ;;  %v7569_v48 = vrot.slane %v7501_v4, 1  ;;  %v7443_v12 = vpack.c.bf16 %v15075_v22, %v15075_v22  ;;  %v11667_v57 = vld [vmem:[%s15356_s7 + $0x190] sm:$0xff]  }
 0xb2a   :  { %7758 = vmatprep.mubr.bf16.mxu1 %v7568_v58  ;;  %v8084_v58 = vld [vmem:[#allocation3 + $0x8] sm:$0xf0] }
 0xb2b   :  { %10249 = vmatpush3.bf16.msra.mxu1 %v11627_v63  ;;  %v7570_v44 = vsel %vm280_vm0, %v7563_v17, %v7569_v48  ;;  %v11659_v63 = vld [vmem:[%s15356_s7 + $0x170] sm:$0xff]   ;;  %v8087_v17 = vld [vmem:[#allocation3 + $0x80] sm:$0xf] }
 0xb2c   :  { %10250 = vmatprep.subr.bf16.mxu1 %v14706_v20 }
 0xb2e   :  { %7759 = vmatmul.mubr.bf16.gmra.mrb[124].mxu1 %v7566_v14  ;;  %v11661_v14 = vld [vmem:[%s15356_s7 + $0x178] sm:$0xff]  }
 0xb2f   :  { %10251 = vmatpush3.bf16.msra.mxu1 %v11628_v51  ;;  %7766 = vmatprep.mubr.bf16.mxu1 %v7567_v53  ;;  %v11658_v53 = vld [vmem:[%s15356_s7 + $0x1b0] sm:$0xff]   ;;  %v8090_v51 = vpack.c.bf16 %v15058_v15, %v8084_v58  ;;  %v7445_v15 = vpack.c.bf16 %v15128_v40, %v15128_v40 }
 0xb30   :  { %10252 = vmatprep.subr.bf16.mxu1 %v14706_v20 }
 0xb31   :  { %v8149_v46 = vrot.slane %v8090_v51, 2 }
 0xb33   :  { %10253 = vmatpush3.bf16.msra.mxu1 %v11629_v5  ;;  %v11662_v5 = vld [vmem:[%s15356_s7 + $0x1c0] sm:$0xff]   ;;  %v8151_v42 = vsel %vm1752_vm1, %v8149_v46, %v8150_v59 }
 0xb34   :  { %10254 = vmatprep.subr.bf16.mxu1 %v14706_v20 }
 0xb36   :  { %7767 = vmatmul.mubr.bf16.gmra.mrb[128].mxu1 %v7565_v38  ;;  %v11660_v38 = vld [vmem:[%s15356_s7 + $0x1b8] sm:$0xff]  }
 0xb37   :  { %10255 = vmatpush3.bf16.msra.mxu1 %v11630_v10  ;;  %10258 = vmatprep.mubr.msk.bf16.mxu1 %vm11702_vm13, %v14706_v20  ;;  %v11664_v10 = vld [vmem:[%s15356_s7 + $0x1c8] sm:$0xff]  }
 0xb38   :  { %10256 = vmatprep.subr.bf16.mxu1 %v14706_v20 }
 0xb3b   :  { %10257 = vmatpush3.bf16.msra.mxu1 %v11631_v1  ;;  %v11665_v1 = vld [vmem:[%s15356_s7 + $0x188] sm:$0xff]  }
 0xb3c   :  { %10092 = vmatprep.subr.bf16.mxu1 %v11632_v39  ;;  %v11666_v39 = vld [vmem:[%s15356_s7 + $0x1d0] sm:$0xff]  }
 0xb3e   :  { %10259 = vmatmul.mubr.msk.bf16.vlgmr.msra.gmra.mrb[132].mxu1 %vm6512_vm12, %v7564_v34  ;;  %v11669_v34 = vld [vmem:[%s15356_s7 + $0x198] sm:$0xff]  }
 0xb3f   :  { %10093 = vmatpush3.bf16.msra.mxu1 %v11633_v31  ;;  %10262 = vmatprep.mubr.msk.bf16.mxu1 %vm11702_vm13, %v14706_v20 }
 0xb40   :  { %10094 = vmatprep.subr.bf16.mxu1 %v11634_v0  ;;  %v8093_v0 = vpack.c.bf16 %v8087_v17, %v15078_v47 }
 0xb43   :  { %10095 = vmatpush3.bf16.msra.mxu1 %v11635_v37  ;;  %v8157_v37 = vrot.slane %v8093_v0, 2 }
 0xb44   :  { %10096 = vmatprep.subr.bf16.mxu1 %v11636_v6  ;;  %v8086_v6 = vld [vmem:[#allocation3 + $0x78] sm:$0xf] }
 0xb45   :  { %v8092_v47 = vpack.c.bf16 %v8086_v6, %v15075_v22 }
 0xb46   :  { %10263 = vmatmul.mubr.msk.bf16.gmra.mrb[136].mxu1 %vm6512_vm12, %v7570_v44  ;;  %v11671_v44 = vld [vmem:[%s15356_s7 + $0x1e8] sm:$0xff]  }
 0xb47   :  { %10097 = vmatpush3.bf16.msra.mxu1 %v11637_v2  ;;  %10266 = vmatprep.mubr.msk.bf16.mxu1 %vm11702_vm13, %v14706_v20  ;;  %v11670_v2 = vld [vmem:[%s15356_s7 + $0x1e0] sm:$0xff]  }
 0xb48   :  { %10098 = vmatprep.subr.bf16.mxu1 %v11638_v41  ;;  %v8158_v41 = vsel %vm1752_vm1, %v8150_v59, %v8157_v37 }
 0xb4b   :  { %10099 = vmatpush3.bf16.msra.mxu1 %v11639_v54  ;;  %v11672_v54 = vld [vmem:[%s15356_s7 + $0x1f0] sm:$0xff]  }
 0xb4c   :  { %10100 = vmatprep.subr.bf16.mxu1 %v11640_v33  ;;  %v11673_v33 = vld [vmem:[%s15356_s7 + $0x1f8] sm:$0xff]  }
 0xb4e   :  { %10267 = vmatmul.mubr.msk.bf16.gmra.mrb[140].mxu1 %vm6512_vm12, %v7569_v48  ;;  %v8147_v48 = vrot.slane %v15071_v36, 2 }
 0xb4f   :  { %10101 = vmatpush3.bf16.msra.mxu1 %v11641_v19  ;;  %8003 = vmatprep.mubr.bf16.mxu1 %v7438_v8  ;;  %v11674_v19 = vld [vmem:[%s15356_s7 + $0x200] sm:$0xff]   ;;  %v11675_v8 = vld [vmem:[%s15356_s7 + $0x208] sm:$0xff]  }
 0xb50   :  { %10102 = vmatprep.subr.bf16.mxu1 %v11642_v35  ;;  %v8091_v35 = vpack.c.bf16 %v15109_v62, %v8085_v11 }
 0xb53   :  { %10103 = vmatpush3.bf16.msra.mxu1 %v11643_v18  ;;  %v8152_v18 = vrot.slane %v8091_v35, 2 }
 0xb54   :  { %10104 = vmatprep.subr.bf16.mxu1 %v11644_v50  ;;  %v8153_v50 = vrot.slane %v15115_v21, 2 }
 0xb57   :  { %10105 = vmatpush3.bf16.msra.mxu1 %v11645_v16  ;;  %v8088_v16 = vld [vmem:[#allocation3 + $0x88] sm:$0xf] }
 0xb58   :  { %10106 = vmatprep.subr.bf16.mxu1 %v11646_v13  ;;  %v8154_v13 = vsel %vm1752_vm1, %v8152_v18, %v8153_v50  ;;  %v8094_v62 = vpack.c.bf16 %v8088_v16, %v15128_v40 }
 0xb5b   :  { %10107 = vmatpush3.bf16.msra.mxu1 %v11647_v55  ;;  %v8159_v55 = vrot.slane %v8094_v62, 2 }
 0xb5c   :  { %10270 = vmatprep.subr.bf16.mxu1 %v14706_v20 }
 0xb5d   :  { %v8160_v52 = vsel %vm1752_vm1, %v8153_v50, %v8159_v55 }
 0xb5e   :  { %8004 = vmatmul.mubr.bf16.vlgmr.msra.gmra.mrb[144].mxu1 %v7437_v49 }
 0xb5f   :  { %8011 = vmatprep.mubr.bf16.mxu1 %v15069_v45  ;;  %10271 = vmatpush3.bf16.msra.mxu1 %v11648_v3  ;;  %v8083_v45 = vld [vmem:[#allocation3] sm:$0xf0] }
 0xb60   :  { %10272 = vmatprep.subr.bf16.mxu1 %v14706_v20  ;;  %v8089_v31 = vpack.c.bf16 %v15055_v23, %v8083_v45 }
 0xb62   :  { %v8146_v4 = vrot.slane %v8089_v31, 2 }
 0xb63   :  { %10273 = vmatpush3.bf16.msra.mxu1 %v11649_v56 }
 0xb64   :  { %10274 = vmatprep.subr.bf16.mxu1 %v14706_v20  ;;  %v8148_v23 = vsel %vm1752_vm1, %v8146_v4, %v8147_v48 }
 0xb66   :  { %8012 = vmatmul.mubr.bf16.gmra.mrb[148].mxu1 %v15071_v36  ;;  %v8155_v36 = vrot.slane %v8092_v47, 2 }
 0xb67   :  { %8019 = vmatprep.mubr.bf16.mxu1 %v7444_v32  ;;  %10275 = vmatpush3.bf16.msra.mxu1 %v11650_v61 }
 0xb68   :  { %10276 = vmatprep.subr.bf16.mxu1 %v14706_v20  ;;  %v8156_v22 = vsel %vm1752_vm1, %v8147_v48, %v8155_v36 }
 0xb6b   :  { %10277 = vmatpush3.bf16.msra.mxu1 %v11651_v7 }
 0xb6c   :  { %10278 = vmatprep.subr.bf16.mxu1 %v14706_v20 }
 0xb6e   :  { %8020 = vmatmul.mubr.bf16.gmra.mrb[152].mxu1 %v7443_v12 }
 0xb6f   :  { %10279 = vmatpush3.bf16.msra.mxu1 %v11652_v30  ;;  %10282 = vmatprep.mubr.msk.bf16.mxu1 %vm11702_vm13, %v14706_v20 }
 0xb70   :  { %10280 = vmatprep.subr.bf16.mxu1 %v14706_v20 }
 0xb73   :  { %10281 = vmatpush3.bf16.msra.mxu1 %v11653_v24 }
 0xb74   :  { %10135 = vmatprep.subr.bf16.mxu1 %v11654_v29 }
 0xb76   :  { %10283 = vmatmul.mubr.msk.bf16.vlgmr.msra.gmra.mrb[156].mxu1 %vm6512_vm12, %v7439_v60 }
 0xb77   :  { %10136 = vmatpush3.bf16.msra.mxu1 %v11655_v25  ;;  %10286 = vmatprep.mubr.msk.bf16.mxu1 %vm11702_vm13, %v14706_v20 }
 0xb78   :  { %10137 = vmatprep.subr.bf16.mxu1 %v11656_v43 }
 0xb7b   :  { %10138 = vmatpush3.bf16.msra.mxu1 %v11657_v26 }
 0xb7c   :  { %10139 = vmatprep.subr.bf16.mxu1 %v11658_v53 }
 0xb7e   :  { %10287 = vmatmul.mubr.msk.bf16.gmra.mrb[160].mxu1 %vm6512_vm12, %v15115_v21 }
 0xb7f   :  { %10140 = vmatpush3.bf16.msra.mxu1 %v11659_v63  ;;  %10290 = vmatprep.mubr.msk.bf16.mxu1 %vm11702_vm13, %v14706_v20 }
 0xb80   :  { %10141 = vmatprep.subr.bf16.mxu1 %v11660_v38 }
 0xb83   :  { %10142 = vmatpush3.bf16.msra.mxu1 %v11661_v14 }
 0xb84   :  { %10143 = vmatprep.subr.bf16.mxu1 %v11662_v5 }
 0xb86   :  { %10291 = vmatmul.mubr.msk.bf16.gmra.mrb[164].mxu1 %vm6512_vm12, %v7445_v15 }
 0xb87   :  { %10144 = vmatpush3.bf16.msra.mxu1 %v11663_v28  ;;  %8340 = vmatprep.mubr.bf16.mxu1 %v8151_v42 }
 0xb88   :  { %10145 = vmatprep.subr.bf16.mxu1 %v11664_v10 }
 0xb8b   :  { %10146 = vmatpush3.bf16.msra.mxu1 %v11665_v1 }
 0xb8c   :  { %10147 = vmatprep.subr.bf16.mxu1 %v11666_v39 }
 0xb8f   :  { %10148 = vmatpush3.bf16.msra.mxu1 %v11667_v57 }
 0xb90   :  { %10149 = vmatprep.subr.bf16.mxu1 %v11668_v9 }
 0xb93   :  { %10150 = vmatpush3.bf16.msra.mxu1 %v11669_v34 }
 0xb94   :  { %10294 = vmatprep.subr.bf16.mxu1 %v14706_v20 }
 0xb96   :  { %8341 = vmatmul.mubr.bf16.vlgmr.msra.gmra.mrb[168].mxu1 %v8148_v23 }
 0xb97   :  { %8348 = vmatprep.mubr.bf16.mxu1 %v8158_v41  ;;  %10295 = vmatpush3.bf16.msra.mxu1 %v11670_v2 }
 0xb98   :  { %10296 = vmatprep.subr.bf16.mxu1 %v14706_v20 }
 0xb9b   :  { %10297 = vmatpush3.bf16.msra.mxu1 %v11671_v44 }
 0xb9c   :  { %10298 = vmatprep.subr.bf16.mxu1 %v14706_v20 }
 0xb9e   :  { %8349 = vmatmul.mubr.bf16.gmra.mrb[172].mxu1 %v8156_v22 }
 0xb9f   :  { %8356 = vmatprep.mubr.bf16.mxu1 %v8157_v37  ;;  %10299 = vmatpush3.bf16.msra.mxu1 %v11672_v54 }
 0xba0   :  { %10300 = vmatprep.subr.bf16.mxu1 %v14706_v20 }
 0xba3   :  { %10301 = vmatpush3.bf16.msra.mxu1 %v11673_v33 }
 0xba4   :  { %10302 = vmatprep.subr.bf16.mxu1 %v14706_v20 }
 0xba6   :  { %8357 = vmatmul.mubr.bf16.gmra.mrb[176].mxu1 %v8155_v36 }
 0xba7   :  { %10303 = vmatpush3.bf16.msra.mxu1 %v11674_v19  ;;  %10306 = vmatprep.mubr.msk.bf16.mxu1 %vm11702_vm13, %v14706_v20 }
 0xba8   :  { %10304 = vmatprep.subr.bf16.mxu1 %v14706_v20 }
 0xbab   :  { %10305 = vmatpush3.bf16.msra.mxu1 %v11675_v8 }
 0xbae   :  { %10307 = vmatmul.mubr.msk.bf16.vlgmr.msra.gmra.mrb[180].mxu1 %vm6512_vm12, %v8154_v13 }
 0xbaf   :  { %10310 = vmatprep.mubr.msk.bf16.mxu1 %vm11702_vm13, %v14706_v20 }
 0xbb6   :  { %10311 = vmatmul.mubr.msk.bf16.gmra.mrb[184].mxu1 %vm6512_vm12, %v8160_v52 }
 0xbb7   :  { %10314 = vmatprep.mubr.msk.bf16.mxu1 %vm11702_vm13, %v14706_v20 }
 0xbbe   :  { %10315 = vmatmul.mubr.msk.bf16.gmra.mrb[188].mxu1 %vm6512_vm12, %v8159_v55 }
 0xbf9   :  { %v10065_v21 = vpop.f32.mrb[120].mxu1 }
 0xbfa   :  { %v10066_v3 = vpop.f32.mrb[121].mxu1 }
 0xbfb   :  { %v10067_v49 = vadd.f32 %v10066_v3, %v10065_v21  ;;  %v10068_v56 = vpop.f32.mrb[122].mxu1 }
 0xbfc   :  { %v10069_v40 = vpop.f32.mrb[123].mxu1 }
 0xbfd   :  { %v10070_v61 = vadd.f32 %v10069_v40, %v10068_v56 }
 0xc01   :  { %v10071_v32 = vpop.f32.mrb[124].mxu1 }
 0xc02   :  { %v10072_v7 = vpop.f32.mrb[125].mxu1 }
 0xc03   :  { %v10073_v30 = vadd.f32 %v10072_v7, %v10071_v32  ;;  %v10074_v12 = vpop.f32.mrb[126].mxu1 }
 0xc04   :  { %v10075_v24 = vpop.f32.mrb[127].mxu1 }
 0xc05   :  { %v10076_v29 = vadd.f32 %v10075_v24, %v10074_v12 }
 0xc09   :  { %v10077_v27 = vpop.f32.mrb[128].mxu1 }
 0xc0a   :  { %v10078_v25 = vpop.f32.mrb[129].mxu1 }
 0xc0b   :  { %v10079_v60 = vadd.f32 %v10078_v25, %v10077_v27  ;;  %v10080_v43 = vpop.f32.mrb[130].mxu1 }
 0xc0c   :  { %v10081_v26 = vpop.f32.mrb[131].mxu1 }
 0xc11   :  { %v7808_v20 = vpop.f32.mrb[132].mxu1 }
 0xc12   :  { %v7809_v53 = vadd.f32 %v10067_v49, %v7808_v20  ;;  %v10260_v63 = vpop.f32.mrb[133].mxu1 }
 0xc13   :  { %v7811_v58 = vpop.f32.mrb[134].mxu1 }
 0xc14   :  { %v7812_v38 = vadd.f32 %v10070_v61, %v7811_v58  ;;  %v10261_v51 = vpop.f32.mrb[135].mxu1 }
 0xc19   :  { %v7816_v14 = vpop.f32.mrb[136].mxu1 }
 0xc1a   :  { %v7817_v5 = vadd.f32 %v10073_v30, %v7816_v14  ;;  %v10264_v46 = vpop.f32.mrb[137].mxu1 }
 0xc1b   :  { %v7819_v28 = vpop.f32.mrb[138].mxu1 }
 0xc1c   :  { %v7820_v15 = vadd.f32 %v10076_v29, %v7819_v28  ;;  %v10265_v59 = vpop.f32.mrb[139].mxu1 }
 0xc21   :  { %v7824_v10 = vpop.f32.mrb[140].mxu1 }
 0xc22   :  { %v7825_v42 = vadd.f32 %v10079_v60, %v7824_v10  ;;  %v10268_v1 = vpop.f32.mrb[141].mxu1  ;;  %v9946_v10 = vld [vmem:[%s15357_s8] ss:$0 sm:$0xff] }
 0xc23   :  { %v7827_v39 = vpop.f32.mrb[142].mxu1 }
 0xc24   :  { %v10269_v45 = vpop.f32.mrb[143].mxu1 }
 0xc31   :  { %v10108_v57 = vpop.f32.mrb[144].mxu1 }
 0xc32   :  { %v10109_v17 = vpop.f32.mrb[145].mxu1 }
 0xc33   :  { %v10110_v9 = vadd.f32 %v10109_v17, %v10108_v57  ;;  %v10111_v31 = vpop.f32.mrb[146].mxu1 }
 0xc34   :  { %v10112_v0 = vpop.f32.mrb[147].mxu1 }
 0xc35   :  { %v10113_v34 = vadd.f32 %v10112_v0, %v10111_v31  ;;  %v8006_v4 = vadd.f32 %v10110_v9, %v7809_v53 }
 0xc37   :  { %v8009_v37 = vadd.f32 %v10113_v34, %v7812_v38 }
 0xc39   :  { %v10114_v6 = vpop.f32.mrb[148].mxu1 }
 0xc3a   :  { %v10115_v48 = vpop.f32.mrb[149].mxu1 }
 0xc3b   :  { %v10116_v2 = vadd.f32 %v10115_v48, %v10114_v6  ;;  %v10117_v23 = vpop.f32.mrb[150].mxu1 }
 0xc3c   :  { %v10118_v47 = vpop.f32.mrb[151].mxu1 }
 0xc3d   :  { %v10119_v41 = vadd.f32 %v10118_v47, %v10117_v23  ;;  %v8014_v44 = vadd.f32 %v10116_v2, %v7817_v5 }
 0xc3f   :  { %v8017_v36 = vadd.f32 %v10119_v41, %v7820_v15 }
 0xc41   :  { %v10120_v54 = vpop.f32.mrb[152].mxu1 }
 0xc42   :  { %v10121_v22 = vpop.f32.mrb[153].mxu1 }
 0xc43   :  { %v10122_v33 = vadd.f32 %v10121_v22, %v10120_v54  ;;  %v10123_v11 = vpop.f32.mrb[154].mxu1 }
 0xc44   :  { %v10124_v19 = vpop.f32.mrb[155].mxu1 }
 0xc45   :  { %v8022_v35 = vadd.f32 %v10122_v33, %v7825_v42 }
 0xc49   :  { %v8061_v8 = vpop.f32.mrb[156].mxu1 }
 0xc4a   :  { %v8062_v18 = vadd.f32 %v8061_v8, %v8006_v4  ;;  %v10284_v50 = vpop.f32.mrb[157].mxu1 }
 0xc4b   :  { %v8064_v16 = vpop.f32.mrb[158].mxu1 }
 0xc4c   :  { %v8065_v13 = vadd.f32 %v8064_v16, %v8009_v37  ;;  %v10285_v62 = vpop.f32.mrb[159].mxu1 }
 0xc51   :  { %v8069_v55 = vpop.f32.mrb[160].mxu1 }
 0xc52   :  { %v8070_v52 = vadd.f32 %v8069_v55, %v8014_v44  ;;  %v10288_v21 = vpop.f32.mrb[161].mxu1 }
 0xc53   :  { %v8072_v3 = vpop.f32.mrb[162].mxu1 }
 0xc54   :  { %v8073_v49 = vadd.f32 %v8072_v3, %v8017_v36  ;;  %v10289_v56 = vpop.f32.mrb[163].mxu1 }
 0xc59   :  { %v8077_v40 = vpop.f32.mrb[164].mxu1 }
 0xc5a   :  { %v8078_v61 = vadd.f32 %v8077_v40, %v8022_v35  ;;  %v10292_v32 = vpop.f32.mrb[165].mxu1 }
 0xc5b   :  { %v8080_v7 = vpop.f32.mrb[166].mxu1 }
 0xc5c   :  { %v10293_v30 = vpop.f32.mrb[167].mxu1 }
 0xc69   :  { %v10151_v12 = vpop.f32.mrb[168].mxu1 }
 0xc6a   :  { %v10152_v24 = vpop.f32.mrb[169].mxu1 }
 0xc6b   :  { %v10153_v29 = vadd.f32 %v10152_v24, %v10151_v12  ;;  %v10154_v27 = vpop.f32.mrb[170].mxu1 }
 0xc6c   :  { %v10155_v25 = vpop.f32.mrb[171].mxu1 }
 0xc6d   :  { %v10156_v60 = vadd.f32 %v10155_v25, %v10154_v27 }
 0xc71   :  { %v10157_v43 = vpop.f32.mrb[172].mxu1 }
 0xc72   :  { %v10158_v26 = vpop.f32.mrb[173].mxu1 }
 0xc73   :  { %v10159_v20 = vadd.f32 %v10158_v26, %v10157_v43  ;;  %v10160_v53 = vpop.f32.mrb[174].mxu1 }
 0xc74   :  { %v10161_v63 = vpop.f32.mrb[175].mxu1 }
 0xc75   :  { %v10162_v58 = vadd.f32 %v10161_v63, %v10160_v53 }
 0xc79   :  { %v10163_v38 = vpop.f32.mrb[176].mxu1 }
 0xc7a   :  { %v10164_v51 = vpop.f32.mrb[177].mxu1 }
 0xc7b   :  { %v10165_v14 = vadd.f32 %v10164_v51, %v10163_v38  ;;  %v10166_v5 = vpop.f32.mrb[178].mxu1 }
 0xc7c   :  { %v10167_v46 = vpop.f32.mrb[179].mxu1 }
 0xc81   :  { %v8398_v28 = vpop.f32.mrb[180].mxu1 }
 0xc82   :  { %v8399_v15 = vadd.f32 %v10153_v29, %v8398_v28  ;;  %v10308_v59 = vpop.f32.mrb[181].mxu1 }
 0xc83   :  { %v8401_v42 = vpop.f32.mrb[182].mxu1 }
 0xc84   :  { %v8420_v1 = vadd.f32 %v8399_v15, %v8062_v18  ;;  %v8402_v39 = vadd.f32 %v10156_v60, %v8401_v42  ;;  %v10309_v45 = vpop.f32.mrb[183].mxu1 }
 0xc86   :  { %v8432_v57 = vadd.f32 %v9946_v10, %v8420_v1  ;;  %v8421_v17 = vadd.f32 %v8402_v39, %v8065_v13 }
 0xc88   :  { %v8437_v9 = vmul.f32 0.5, %v8432_v57  ;;  %v8433_v31 = vadd.f32 %v9946_v10, %v8421_v17 }
 0xc89   :  { %v8406_v0 = vpop.f32.mrb[184].mxu1 }
 0xc8a   :  { %11680 = vtanh.f32 %v8437_v9  ;;  %v8438_v34 = vmul.f32 0.5, %v8433_v31  ;;  %v8407_v4 = vadd.f32 %v10159_v20, %v8406_v0  ;;  %v10312_v37 = vpop.f32.mrb[185].mxu1 }
 0xc8b   :  { %v8409_v6 = vpop.f32.mrb[186].mxu1 }
 0xc8c   :  { %11682 = vtanh.f32 %v8438_v34  ;;  %v8422_v48 = vadd.f32 %v8407_v4, %v8070_v52  ;;  %v8410_v2 = vadd.f32 %v10162_v58, %v8409_v6  ;;  %v10313_v23 = vpop.f32.mrb[187].mxu1 }
 0xc8e   :  { %v8434_v47 = vadd.f32 %v9946_v10, %v8422_v48  ;;  %v8423_v41 = vadd.f32 %v8410_v2, %v8073_v49 }
 0xc90   :  { %v8439_v44 = vmul.f32 0.5, %v8434_v47  ;;  %v8435_v36 = vadd.f32 %v9946_v10, %v8423_v41 }
 0xc91   :  { %v8414_v54 = vpop.f32.mrb[188].mxu1 }
 0xc92   :  { %11684 = vtanh.f32 %v8439_v44  ;;  %v8440_v22 = vmul.f32 0.5, %v8435_v36  ;;  %v8415_v33 = vadd.f32 %v10165_v14, %v8414_v54  ;;  %v10316_v11 = vpop.f32.mrb[189].mxu1 }
 0xc93   :  { %v8417_v19 = vpop.f32.mrb[190].mxu1 }
 0xc94   :  { %v11681_v35 = vpop.eup %11680  ;;  %11686 = vtanh.f32 %v8440_v22  ;;  %v8424_v8 = vadd.f32 %v8415_v33, %v8078_v61  ;;  %v10317_v18 = vpop.f32.mrb[191].mxu1 }
 0xc95   :  { %v8447_v50 = vmul.f32 0.5, %v11681_v35 }
 0xc96   :  { %v11683_v16 = vpop.eup %11682  ;;  %v8436_v13 = vadd.f32 %v9946_v10, %v8424_v8 }
 0xc97   :  { %v8452_v62 = vadd.f32 0.5, %v8447_v50  ;;  %v8448_v55 = vmul.f32 0.5, %v11683_v16 }
 0xc98   :  { %v8441_v52 = vmul.f32 0.5, %v8436_v13 }
 0xc99   :  { %8457 = vst.msk [vmem:[%s15358_s9] sm:$0xff] %vm6512_vm12, %v8452_v62  ;;  %v8453_v21 = vadd.f32 0.5, %v8448_v55 }
 0xc9a   :  { %11688 = vtanh.f32 %v8441_v52 }
 0xc9b   :  { %8458 = vst.msk [vmem:[%s15358_s9 + $0x8] sm:$0xff] %vm6512_vm12, %v8453_v21 }
 0xc9c   :  { %v11685_v3 = vpop.eup %11684 }
 0xc9d   :  { %v8449_v49 = vmul.f32 0.5, %v11685_v3 }
 0xc9e   :  { %v11687_v56 = vpop.eup %11686 }
 0xc9f   :  { %v8454_v40 = vadd.f32 0.5, %v8449_v49  ;;  %v8450_v61 = vmul.f32 0.5, %v11687_v56 }
 0xca1   :  { %8459 = vst.msk [vmem:[%s15358_s9 + $0x10] sm:$0xff] %vm6512_vm12, %v8454_v40  ;;  %v8455_v32 = vadd.f32 0.5, %v8450_v61 }
 0xca3   :  { %8460 = vst.msk [vmem:[%s15358_s9 + $0x18] sm:$0xff] %vm6512_vm12, %v8455_v32 }
 0xca4   :  { %v11689_v7 = vpop.eup %11688 }
 0xca5   :  { %v8451_v30 = vmul.f32 0.5, %v11689_v7 }
 0xca7   :  { %v8456_v12 = vadd.f32 0.5, %v8451_v30 }
 0xca9   :  { %8461 = vst.msk [vmem:[%s15358_s9 + $0x20] sm:$0xff] %vm6512_vm12, %v8456_v12 }

</bundles_post_ra>
